<compile_context>
chip_gen: v5e
topology: v5e:2x2
jax: 0.10.0
libtpu: 0.0.40
codegen_flags: <defaults>
</compile_context>

<pallas_src>
import math

import jax
import jax.numpy as jnp
import numpy as np
from jax.experimental import pallas as pl
from jax.experimental.pallas import tpu as pltpu

WINDOW_SIZE = 11
SIGMA = 1.5
LOSS_WEIGHT = 1.0
_C1 = 0.01 ** 2
_C2 = 0.03 ** 2


def _gaussian_1d(window_size, sigma):
    # matches gaussian(window_size, sigma) in the PyTorch reference
    vals = [
        math.exp(-((x - window_size // 2) ** 2) / (2.0 * sigma ** 2))
        for x in range(window_size)
    ]
    s = sum(vals)
    return [v / s for v in vals]


def _band_matrix(W, taps, pad):
    """(W, W) banded matrix: y @ Tw == 1D 'same' (zero-padded) conv along W."""
    ws = len(taps)
    tw = np.zeros((W, W), np.float32)
    for i in range(W):              # output position
        for j in range(ws):         # tap index
            k = i - pad + j         # input position feeding output i
            if 0 <= k < W:
                tw[k, i] = taps[j]
    # bf16 weights: MXU-native; tap quantization error << 1e-2 SSIM tolerance.
    return jnp.asarray(tw, jnp.bfloat16)


def _vmem_budgets():
    """(working-set budget, scoped vmem limit) sized for the actual chip."""
    cap = 64 * 1024 * 1024                       # conservative default (v7x)
    try:
        info = pltpu.get_tpu_info()
        cap = int(getattr(info, "vmem_capacity_bytes", cap)) or cap
    except Exception:
        pass
    budget = min(int(cap * 0.40), 56 * 1024 * 1024)   # ~25 MiB v7x / ~51 MiB v5e,v6e
    limit = min(int(cap * 0.78), 100 * 1024 * 1024)   # ~50 MiB v7x / ~100 MiB v5e,v6e
    return budget, limit


def _planes_per_step(N, Hp, W, in_itemsize, window_size, budget_bytes):
    """Largest P (planes per grid step) whose working set fits the budget."""
    pad = window_size // 2
    plane_px = Hp * W
    per_plane = (
        2 * 2 * plane_px * in_itemsize   # 2 inputs x double-buffered DMA
        + 32 * plane_px * 4              # conservative count of live f32 slabs
                                         # (inputs, 5-field slab, bf16 copy,
                                         #  matmul out, halo scratch, conv out,
                                         #  SSIM intermediates)
        + 5 * 2 * pad * W * 4            # halo rows of the H-conv scratch
    )
    max_p = max(1, budget_bytes // per_plane)
    max_p = min(max_p, 256)
    if N >= 2:
        # Keep G >= 2 so a "parallel" grid axis can shard across the two
        # TensorCores on v7x (costs only ~0.35us extra on single-core chips).
        max_p = min(max_p, -(-N // 2))
    return max(1, min(max_p, N))


def _make_ssim_kernel(P, Hp, W, taps, pad, n_valid_planes, n_padded_planes,
                      n_valid_rows):
    WS = len(taps)
    FP = 5 * P
    mask_planes = n_padded_planes > n_valid_planes
    mask_rows = Hp > n_valid_rows

    def kernel(tw_ref, x1_ref, x2_ref, out_ref, hpad_ref):
        x1 = x1_ref[...].astype(jnp.float32)      # (P, Hp, W)
        x2 = x2_ref[...].astype(jnp.float32)

        # Stack all five conv inputs (products computed in f32) so the MXU
        # matmul and the VPU H-pass are each issued exactly once per step.
        fields = jnp.concatenate([x1, x2, x1 * x1, x2 * x2, x1 * x2], axis=0)

        # ---- W (lane) pass: zero-padded Gaussian == banded (W,W) matmul,
        # folded to a single 2-D matmul with M = 5*P*Hp (keeps the MXU fed).
        # Operands bf16, accumulation f32.
        y2d = fields.reshape(FP * Hp, W).astype(jnp.bfloat16)
        t = jnp.dot(y2d, tw_ref[...],
                    preferred_element_type=jnp.float32).reshape(FP, Hp, W)

        # ---- H (sublane) pass on the VPU: zero-haloed scratch + WS shifted
        # multiply-adds, split over 4 accumulators to break the add chain.
        halo = jnp.zeros((FP, pad, W), jnp.float32)
        hpad_ref[:, :pad, :] = halo
        hpad_ref[:, pad + Hp:, :] = halo
        hpad_ref[:, pad:pad + Hp, :] = t

        n_acc = min(4, WS)
        accs = [None] * n_acc
        for j in range(WS):
            term = hpad_ref[:, j:j + Hp, :] * taps[j]
            k = j % n_acc
            accs[k] = term if accs[k] is None else accs[k] + term
        while len(accs) > 1:
            accs = [accs[i] + accs[i + 1] if i + 1 < len(accs) else accs[i]
                    for i in range(0, len(accs), 2)]
        conv = accs[0]                            # (5P, Hp, W)

        mu1, mu2 = conv[0:P], conv[P:2 * P]
        s11, s22, s12 = conv[2 * P:3 * P], conv[3 * P:4 * P], conv[4 * P:5 * P]

        mu1_sq = mu1 * mu1
        mu2_sq = mu2 * mu2
        mu1_mu2 = mu1 * mu2
        sigma1_sq = s11 - mu1_sq
        sigma2_sq = s22 - mu2_sq
        sigma12 = s12 - mu1_mu2

        num = (2.0 * mu1_mu2 + _C1) * (2.0 * sigma12 + _C2)
        den = (mu1_sq + mu2_sq + _C1) * (sigma1_sq + sigma2_sq + _C2)
        r = pl.reciprocal(den, approx=True)
        r = r * (2.0 - den * r)                   # one Newton step (EUP bias fix)
        ssim_map = num * r                        # (P, Hp, W)

        # Mask out padded planes / rows (padding only exists when B*C or H
        # were not nicely shaped; masks are compile-time eliminated otherwise).
        valid = None
        if mask_planes:
            plane_idx = (pl.program_id(0) * P
                         + jax.lax.broadcasted_iota(jnp.int32, (P, Hp, W), 0))
            valid = plane_idx < n_valid_planes
        if mask_rows:
            row_ok = (jax.lax.broadcasted_iota(jnp.int32, (P, Hp, W), 1)
                      < n_valid_rows)
            valid = row_ok if valid is None else jnp.logical_and(valid, row_ok)
        if valid is not None:
            ssim_map = jnp.where(valid, ssim_map, 0.0)

        # Lane-dense partial-sum store (unmasked vst); wrapper reads lane 0.
        s = jnp.sum(ssim_map)
        out_ref[...] = jnp.broadcast_to(s.reshape(1, 1, 1), (1, 8, 128))

    return kernel


def ssim_loss(img1, img2, window_size=WINDOW_SIZE, loss_weight=LOSS_WEIGHT):
    """Equivalent of SSIMLoss()(img1, img2) with size_average=True (NCHW)."""
    B, C, H, W = img1.shape
    N = B * C
    pad = window_size // 2
    taps = _gaussian_1d(window_size, SIGMA)

    # Sublane-align H so the in-kernel (5P,Hp,W)->(5P*Hp,W) fold is free.
    Hp = ((H + 7) // 8) * 8

    x1 = img1.reshape(N, H, W)        # free reshape, native dtype
    x2 = img2.reshape(N, H, W)
    tw = _band_matrix(W, taps, pad)

    budget, vmem_limit = _vmem_budgets()
    P = _planes_per_step(N, Hp, W, jnp.dtype(img1.dtype).itemsize,
                         window_size, budget)
    G = -(-N // P)
    Np = G * P

    pad_planes = Np - N
    pad_rows = Hp - H
    if pad_planes or pad_rows:
        cfg = ((0, pad_planes), (0, pad_rows), (0, 0))
        x1 = jnp.pad(x1, cfg)
        x2 = jnp.pad(x2, cfg)

    kernel = _make_ssim_kernel(P, Hp, W, taps, pad, N, Np, H)

    partial = pl.pallas_call(
        kernel,
        out_shape=jax.ShapeDtypeStruct((G, 8, 128), jnp.float32),
        grid=(G,),
        in_specs=[
            pl.BlockSpec((W, W), lambda g: (0, 0)),        # banded taps (resident)
            pl.BlockSpec((P, Hp, W), lambda g: (g, 0, 0)),
            pl.BlockSpec((P, Hp, W), lambda g: (g, 0, 0)),
        ],
        out_specs=pl.BlockSpec((1, 8, 128), lambda g: (g, 0, 0)),
        scratch_shapes=[pltpu.VMEM((5 * P, Hp + 2 * pad, W), jnp.float32)],
        compiler_params=pltpu.CompilerParams(
            dimension_semantics=("parallel",),
            vmem_limit_bytes=vmem_limit,
        ),
    )(tw, x1, x2)

    total = jnp.sum(partial[:, 0, 0])
    ssim_mean = total / jnp.float32(N * H * W)
    return jnp.asarray(loss_weight, jnp.float32) * (1.0 - ssim_mean)


def _ssim_loss_reference(img1, img2, window_size=WINDOW_SIZE,
                         loss_weight=LOSS_WEIGHT):
    """Pure-JAX reference matching the PyTorch module (validation only)."""
    B, C, H, W = img1.shape
    g = jnp.asarray(_gaussian_1d(window_size, SIGMA), jnp.float32)
    win = jnp.broadcast_to(jnp.outer(g, g), (C, 1, window_size, window_size))
    pad = window_size // 2

    def conv(x):
        return jax.lax.conv_general_dilated(
            x.astype(jnp.float32), win, window_strides=(1, 1),
            padding=[(pad, pad), (pad, pad)],
            dimension_numbers=("NCHW", "OIHW", "NCHW"),
            feature_group_count=C)

    i1 = img1.astype(jnp.float32)
    i2 = img2.astype(jnp.float32)
    mu1, mu2 = conv(i1), conv(i2)
    mu1_sq, mu2_sq, mu1_mu2 = mu1 * mu1, mu2 * mu2, mu1 * mu2
    sigma1_sq = conv(i1 * i1) - mu1_sq
    sigma2_sq = conv(i2 * i2) - mu2_sq
    sigma12 = conv(i1 * i2) - mu1_mu2
    ssim_map = ((2 * mu1_mu2 + _C1) * (2 * sigma12 + _C2)) / (
        (mu1_sq + mu2_sq + _C1) * (sigma1_sq + sigma2_sq + _C2))
    return loss_weight * (1.0 - jnp.mean(ssim_map))


if __name__ == "__main__":
    key = jax.random.PRNGKey(0)
    k1, k2 = jax.random.split(key)
    B, C, H, W = 2, 4, 16, 16
    img1 = jax.random.uniform(k1, (B, C, H, W), dtype=jnp.float32)
    img2 = jax.random.uniform(k2, (B, C, H, W), dtype=jnp.float32)

    loss = jax.jit(ssim_loss)(img1, img2)
    loss = jax.block_until_ready(loss)

    ref = _ssim_loss_reference(img1, img2)
    if (not bool(jnp.isfinite(loss))) or abs(float(loss) - float(ref)) > 1e-2:
        raise SystemExit(
            f"MISMATCH: pallas={float(loss)} reference={float(ref)}")
    print("KERNEL_OK")
</pallas_src>

<mosaic_0001>
module attributes {stable_mosaic.version = 11 : i64} {
  func.func @kernel(%arg0: i32, %arg1: memref<16x16xbf16, #tpu.memory_space<vmem>>, %arg2: memref<4x16x16xf32, #tpu.memory_space<vmem>>, %arg3: memref<4x16x16xf32, #tpu.memory_space<vmem>>, %arg4: memref<1x8x128xf32, #tpu.memory_space<vmem>>, %arg5: memref<20x26x16xf32, #tpu.memory_space<vmem>>) attributes {dimension_semantics = [#tpu.dimension_semantics<parallel>], iteration_bounds = array<i64: 2>, scalar_prefetch = 0 : i64, scratch_operands = 1 : i64, tpu.core_type = #tpu.core_type<tc>, window_params = [{pipeline_mode = #tpu.pipeline_mode<synchronous>, transform_indices = @transform_0, window_bounds = array<i64: 16, 16>}, {transform_indices = @transform_1, window_bounds = array<i64: 4, 16, 16>}, {transform_indices = @transform_2, window_bounds = array<i64: 4, 16, 16>}, {transform_indices = @transform_3, window_bounds = array<i64: 1, 8, 128>}]} {
    %c0 = arith.constant 0 : index
    %c0_0 = arith.constant 0 : index
    %c0_1 = arith.constant 0 : index
    %0 = vector.load %arg2[%c0, %c0_0, %c0_1] : memref<4x16x16xf32, #tpu.memory_space<vmem>>, vector<4x16x16xf32>
    %c0_2 = arith.constant 0 : index
    %c0_3 = arith.constant 0 : index
    %c0_4 = arith.constant 0 : index
    %1 = vector.load %arg3[%c0_2, %c0_3, %c0_4] : memref<4x16x16xf32, #tpu.memory_space<vmem>>, vector<4x16x16xf32>
    %2 = arith.mulf %0, %0 : vector<4x16x16xf32>
    %3 = arith.mulf %1, %1 : vector<4x16x16xf32>
    %4 = arith.mulf %0, %1 : vector<4x16x16xf32>
    %5 = tpu.concatenate %0, %1, %2, %3, %4 in 0 : vector<4x16x16xf32>, vector<4x16x16xf32>, vector<4x16x16xf32>, vector<4x16x16xf32>, vector<4x16x16xf32> -> vector<20x16x16xf32>
    %6 = vector.shape_cast %5 : vector<20x16x16xf32> to vector<320x16xf32>
    %7 = arith.truncf %6 : vector<320x16xf32> to vector<320x16xbf16>
    %c0_5 = arith.constant 0 : index
    %c0_6 = arith.constant 0 : index
    %8 = vector.load %arg1[%c0_5, %c0_6] : memref<16x16xbf16, #tpu.memory_space<vmem>>, vector<16x16xbf16>
    %cst = arith.constant dense<0.000000e+00> : vector<320x16xf32>
    %9 = tpu.matmul %7, %8, %cst {dimension_numbers = #tpu.dot_dimension_numbers<[1], [0], [0], [1], [0, 0, 1, 1], [], []>} : vector<320x16xbf16>, vector<16x16xbf16>, vector<320x16xf32> -> vector<320x16xf32>
    %10 = vector.shape_cast %9 : vector<320x16xf32> to vector<20x16x16xf32>
    %cst_7 = arith.constant 0.000000e+00 : f32
    %11 = vector.broadcast %cst_7 : f32 to vector<20x5x16xf32>
    %c0_8 = arith.constant 0 : index
    %c0_9 = arith.constant 0 : index
    %c0_10 = arith.constant 0 : index
    %12 = vector.load %arg5[%c0_8, %c0_9, %c0_10] : memref<20x26x16xf32, #tpu.memory_space<vmem>>, vector<20x5x16xf32>
    tpu.vector_store %arg5[%c0_8, %c0_9, %c0_10], %11 {strides = array<i32>} : memref<20x26x16xf32, #tpu.memory_space<vmem>>, vector<20x5x16xf32>,
    %c0_11 = arith.constant 0 : index
    %c21 = arith.constant 21 : index
    %c0_12 = arith.constant 0 : index
    %13 = vector.load %arg5[%c0_11, %c21, %c0_12] : memref<20x26x16xf32, #tpu.memory_space<vmem>>, vector<20x5x16xf32>
    tpu.vector_store %arg5[%c0_11, %c21, %c0_12], %11 {strides = array<i32>} : memref<20x26x16xf32, #tpu.memory_space<vmem>>, vector<20x5x16xf32>,
    %c0_13 = arith.constant 0 : index
    %c5 = arith.constant 5 : index
    %c0_14 = arith.constant 0 : index
    %14 = vector.load %arg5[%c0_13, %c5, %c0_14] : memref<20x26x16xf32, #tpu.memory_space<vmem>>, vector<20x16x16xf32>
    tpu.vector_store %arg5[%c0_13, %c5, %c0_14], %10 {strides = array<i32>} : memref<20x26x16xf32, #tpu.memory_space<vmem>>, vector<20x16x16xf32>,
    %c0_15 = arith.constant 0 : index
    %c0_16 = arith.constant 0 : index
    %c0_17 = arith.constant 0 : index
    %15 = vector.load %arg5[%c0_15, %c0_16, %c0_17] : memref<20x26x16xf32, #tpu.memory_space<vmem>>, vector<20x16x16xf32>
    %cst_18 = arith.constant 0.00102838012 : f32
    %16 = vector.broadcast %cst_18 : f32 to vector<20x16x16xf32>
    %17 = arith.mulf %15, %16 : vector<20x16x16xf32>
    %c0_19 = arith.constant 0 : index
    %c1 = arith.constant 1 : index
    %c0_20 = arith.constant 0 : index
    %18 = vector.load %arg5[%c0_19, %c1, %c0_20] : memref<20x26x16xf32, #tpu.memory_space<vmem>>, vector<20x16x16xf32>
    %cst_21 = arith.constant 0.00759875821 : f32
    %19 = vector.broadcast %cst_21 : f32 to vector<20x16x16xf32>
    %20 = arith.mulf %18, %19 : vector<20x16x16xf32>
    %c0_22 = arith.constant 0 : index
    %c2 = arith.constant 2 : index
    %c0_23 = arith.constant 0 : index
    %21 = vector.load %arg5[%c0_22, %c2, %c0_23] : memref<20x26x16xf32, #tpu.memory_space<vmem>>, vector<20x16x16xf32>
    %cst_24 = arith.constant 0.0360007733 : f32
    %22 = vector.broadcast %cst_24 : f32 to vector<20x16x16xf32>
    %23 = arith.mulf %21, %22 : vector<20x16x16xf32>
    %c0_25 = arith.constant 0 : index
    %c3 = arith.constant 3 : index
    %c0_26 = arith.constant 0 : index
    %24 = vector.load %arg5[%c0_25, %c3, %c0_26] : memref<20x26x16xf32, #tpu.memory_space<vmem>>, vector<20x16x16xf32>
    %cst_27 = arith.constant 0.109360687 : f32
    %25 = vector.broadcast %cst_27 : f32 to vector<20x16x16xf32>
    %26 = arith.mulf %24, %25 : vector<20x16x16xf32>
    %c0_28 = arith.constant 0 : index
    %c4 = arith.constant 4 : index
    %c0_29 = arith.constant 0 : index
    %27 = vector.load %arg5[%c0_28, %c4, %c0_29] : memref<20x26x16xf32, #tpu.memory_space<vmem>>, vector<20x16x16xf32>
    %cst_30 = arith.constant 0.213005543 : f32
    %28 = vector.broadcast %cst_30 : f32 to vector<20x16x16xf32>
    %29 = arith.mulf %27, %28 : vector<20x16x16xf32>
    %30 = arith.addf %17, %29 : vector<20x16x16xf32>
    %c0_31 = arith.constant 0 : index
    %c5_32 = arith.constant 5 : index
    %c0_33 = arith.constant 0 : index
    %31 = vector.load %arg5[%c0_31, %c5_32, %c0_33] : memref<20x26x16xf32, #tpu.memory_space<vmem>>, vector<20x16x16xf32>
    %cst_34 = arith.constant 0.266011715 : f32
    %32 = vector.broadcast %cst_34 : f32 to vector<20x16x16xf32>
    %33 = arith.mulf %31, %32 : vector<20x16x16xf32>
    %34 = arith.addf %20, %33 : vector<20x16x16xf32>
    %c0_35 = arith.constant 0 : index
    %c6 = arith.constant 6 : index
    %c0_36 = arith.constant 0 : index
    %35 = vector.load %arg5[%c0_35, %c6, %c0_36] : memref<20x26x16xf32, #tpu.memory_space<vmem>>, vector<20x16x16xf32>
    %cst_37 = arith.constant 0.213005543 : f32
    %36 = vector.broadcast %cst_37 : f32 to vector<20x16x16xf32>
    %37 = arith.mulf %35, %36 : vector<20x16x16xf32>
    %38 = arith.addf %23, %37 : vector<20x16x16xf32>
    %c0_38 = arith.constant 0 : index
    %c7 = arith.constant 7 : index
    %c0_39 = arith.constant 0 : index
    %39 = vector.load %arg5[%c0_38, %c7, %c0_39] : memref<20x26x16xf32, #tpu.memory_space<vmem>>, vector<20x16x16xf32>
    %cst_40 = arith.constant 0.109360687 : f32
    %40 = vector.broadcast %cst_40 : f32 to vector<20x16x16xf32>
    %41 = arith.mulf %39, %40 : vector<20x16x16xf32>
    %42 = arith.addf %26, %41 : vector<20x16x16xf32>
    %c0_41 = arith.constant 0 : index
    %c8 = arith.constant 8 : index
    %c0_42 = arith.constant 0 : index
    %43 = vector.load %arg5[%c0_41, %c8, %c0_42] : memref<20x26x16xf32, #tpu.memory_space<vmem>>, vector<20x16x16xf32>
    %cst_43 = arith.constant 0.0360007733 : f32
    %44 = vector.broadcast %cst_43 : f32 to vector<20x16x16xf32>
    %45 = arith.mulf %43, %44 : vector<20x16x16xf32>
    %46 = arith.addf %30, %45 : vector<20x16x16xf32>
    %c0_44 = arith.constant 0 : index
    %c9 = arith.constant 9 : index
    %c0_45 = arith.constant 0 : index
    %47 = vector.load %arg5[%c0_44, %c9, %c0_45] : memref<20x26x16xf32, #tpu.memory_space<vmem>>, vector<20x16x16xf32>
    %cst_46 = arith.constant 0.00759875821 : f32
    %48 = vector.broadcast %cst_46 : f32 to vector<20x16x16xf32>
    %49 = arith.mulf %47, %48 : vector<20x16x16xf32>
    %50 = arith.addf %34, %49 : vector<20x16x16xf32>
    %c0_47 = arith.constant 0 : index
    %c10 = arith.constant 10 : index
    %c0_48 = arith.constant 0 : index
    %51 = vector.load %arg5[%c0_47, %c10, %c0_48] : memref<20x26x16xf32, #tpu.memory_space<vmem>>, vector<20x16x16xf32>
    %cst_49 = arith.constant 0.00102838012 : f32
    %52 = vector.broadcast %cst_49 : f32 to vector<20x16x16xf32>
    %53 = arith.mulf %51, %52 : vector<20x16x16xf32>
    %54 = arith.addf %38, %53 : vector<20x16x16xf32>
    %55 = arith.addf %46, %50 : vector<20x16x16xf32>
    %56 = arith.addf %54, %42 : vector<20x16x16xf32>
    %57 = arith.addf %55, %56 : vector<20x16x16xf32>
    %58 = vector.extract_strided_slice %57 {offsets = [0, 0, 0], sizes = [4, 16, 16], strides = [1, 1, 1]} : vector<20x16x16xf32> to vector<4x16x16xf32>
    %59 = vector.extract_strided_slice %57 {offsets = [4, 0, 0], sizes = [4, 16, 16], strides = [1, 1, 1]} : vector<20x16x16xf32> to vector<4x16x16xf32>
    %60 = vector.extract_strided_slice %57 {offsets = [8, 0, 0], sizes = [4, 16, 16], strides = [1, 1, 1]} : vector<20x16x16xf32> to vector<4x16x16xf32>
    %61 = vector.extract_strided_slice %57 {offsets = [12, 0, 0], sizes = [4, 16, 16], strides = [1, 1, 1]} : vector<20x16x16xf32> to vector<4x16x16xf32>
    %62 = vector.extract_strided_slice %57 {offsets = [16, 0, 0], sizes = [4, 16, 16], strides = [1, 1, 1]} : vector<20x16x16xf32> to vector<4x16x16xf32>
    %63 = arith.mulf %58, %58 : vector<4x16x16xf32>
    %64 = arith.mulf %59, %59 : vector<4x16x16xf32>
    %65 = arith.mulf %58, %59 : vector<4x16x16xf32>
    %66 = arith.subf %60, %63 : vector<4x16x16xf32>
    %67 = arith.subf %61, %64 : vector<4x16x16xf32>
    %68 = arith.subf %62, %65 : vector<4x16x16xf32>
    %cst_50 = arith.constant 2.000000e+00 : f32
    %69 = vector.broadcast %cst_50 : f32 to vector<4x16x16xf32>
    %70 = arith.mulf %69, %65 : vector<4x16x16xf32>
    %cst_51 = arith.constant 9.99999974E-5 : f32
    %71 = vector.broadcast %cst_51 : f32 to vector<4x16x16xf32>
    %72 = arith.addf %70, %71 : vector<4x16x16xf32>
    %cst_52 = arith.constant 2.000000e+00 : f32
    %73 = vector.broadcast %cst_52 : f32 to vector<4x16x16xf32>
    %74 = arith.mulf %73, %68 : vector<4x16x16xf32>
    %cst_53 = arith.constant 8.99999984E-4 : f32
    %75 = vector.broadcast %cst_53 : f32 to vector<4x16x16xf32>
    %76 = arith.addf %74, %75 : vector<4x16x16xf32>
    %77 = arith.mulf %72, %76 : vector<4x16x16xf32>
    %78 = arith.addf %63, %64 : vector<4x16x16xf32>
    %cst_54 = arith.constant 9.99999974E-5 : f32
    %79 = vector.broadcast %cst_54 : f32 to vector<4x16x16xf32>
    %80 = arith.addf %78, %79 : vector<4x16x16xf32>
    %81 = arith.addf %66, %67 : vector<4x16x16xf32>
    %cst_55 = arith.constant 8.99999984E-4 : f32
    %82 = vector.broadcast %cst_55 : f32 to vector<4x16x16xf32>
    %83 = arith.addf %81, %82 : vector<4x16x16xf32>
    %84 = arith.mulf %80, %83 : vector<4x16x16xf32>
    %85 = tpu.reciprocal %84 {approx = true} : vector<4x16x16xf32> -> vector<4x16x16xf32>
    %86 = arith.mulf %84, %85 : vector<4x16x16xf32>
    %cst_56 = arith.constant 2.000000e+00 : f32
    %87 = vector.broadcast %cst_56 : f32 to vector<4x16x16xf32>
    %88 = arith.subf %87, %86 : vector<4x16x16xf32>
    %89 = arith.mulf %85, %88 : vector<4x16x16xf32>
    %90 = arith.mulf %77, %89 : vector<4x16x16xf32>
    %91 = vector.shape_cast %90 : vector<4x16x16xf32> to vector<1x4x16x16xf32>
    %cst_57 = arith.constant dense<0.000000e+00> : vector<1xf32>
    %92 = vector.multi_reduction <add>, %91, %cst_57 [1, 2, 3] : vector<1x4x16x16xf32> to vector<1xf32>
    %93 = vector.shape_cast %92 : vector<1xf32> to vector<1x1x1x1xf32>
    %94 = vector.extract %93[0, 0, 0, 0] : f32 from vector<1x1x1x1xf32>
    %95 = vector.broadcast %94 : f32 to vector<1x1x1xf32>
    %96 = vector.shape_cast %95 : vector<1x1x1xf32> to vector<1x1x1xf32>
    %97 = vector.broadcast %96 : vector<1x1x1xf32> to vector<1x8x128xf32>
    %c0_58 = arith.constant 0 : index
    %c0_59 = arith.constant 0 : index
    %c0_60 = arith.constant 0 : index
    %98 = vector.load %arg4[%c0_58, %c0_59, %c0_60] : memref<1x8x128xf32, #tpu.memory_space<vmem>>, vector<1x8x128xf32>
    tpu.vector_store %arg4[%c0_58, %c0_59, %c0_60], %97 {strides = array<i32>} : memref<1x8x128xf32, #tpu.memory_space<vmem>>, vector<1x8x128xf32>,
    return
  }
  func.func @transform_0(%arg0: i32) -> (i32, i32) {
    %c0_i32 = arith.constant 0 : i32
    %c0_i32_0 = arith.constant 0 : i32
    %c0_i32_1 = arith.constant 0 : i32
    return %c0_i32, %c0_i32_0 : i32, i32
  }
  func.func @transform_1(%arg0: i32) -> (i32, i32, i32) {
    %c0_i32 = arith.constant 0 : i32
    %c0_i32_0 = arith.constant 0 : i32
    %c0_i32_1 = arith.constant 0 : i32
    return %arg0, %c0_i32, %c0_i32_0 : i32, i32, i32
  }
  func.func @transform_2(%arg0: i32) -> (i32, i32, i32) {
    %c0_i32 = arith.constant 0 : i32
    %c0_i32_0 = arith.constant 0 : i32
    %c0_i32_1 = arith.constant 0 : i32
    return %arg0, %c0_i32, %c0_i32_0 : i32, i32, i32
  }
  func.func @transform_3(%arg0: i32) -> (i32, i32, i32) {
    %c0_i32 = arith.constant 0 : i32
    %c0_i32_0 = arith.constant 0 : i32
    %c0_i32_1 = arith.constant 0 : i32
    return %arg0, %c0_i32, %c0_i32_0 : i32, i32, i32
  }
}

</mosaic_0001>

<bundles_post_ra>
// kernel: ssim_loss.1
= control target key start
LH: loop header
LB: loop body
LE: loop exit
PB: predicated region body
PF: predicated region fallthrough
CT: control target
= control target key end

     0   :  { %8 = vsyncpa [#allocation4], 0  ;;  %s4336_s0 = inlined_call_operand.hbm [shape: bf16[16,16], index: 0, kind: input, shape index: {}]   ;;  %s4337_s1 = inlined_call_operand.hbm [shape: f32[8,16,16], index: 1, kind: input, shape index: {}]   ;;  %s4338_s2 = inlined_call_operand.hbm [shape: f32[8,16,16], index: 2, kind: input, shape index: {}]   ;;  %s4339_s3 = inlined_call_operand.vmem [shape: f32[2,8,128], index: 3, kind: output, shape index: {}]  }
   0x1   :  { %9 = vsyncpa [#allocation6], 0 }
   0x2   :  { %11 = vsyncpa [#allocation6 + $0x1], 0  ;;  %s2387_s12 = smov 0   ;;  %s2389_s13 = smov 0  }
   0x3   :  { %s2391_s14 = smov 0   ;;  %s2393_s15 = smov 0  }
   0x4 LB: > { %s2408_s16 = sadd.s32 1, %s2359_s15   ;;  %s45_s17 = sadd.s32 1, %s2355_s14  ;;  %s2359_s15 = sphi %s2393_s15, %s5166_s15   ;;  %s2355_s14 = sphi %s2391_s14, %s5165_s14   ;;  %s2351_s13 = sphi %s2389_s13, %s5164_s13   ;;  %s2347_s12 = sphi %s2387_s12, %s5163_s12  }
   0x5   : > { %s42_s18 = ssub.s32 %s2359_s15, %s2408_s16  ;;  %p52_p0 = scmp.ne.s32.totalorder %s2355_s14, %s2351_s13 }
   0x6   : > { %p43_p1 = scmp.eq.s32.totalorder %s42_s18, 0  ;;  %p53_p2 = scmp.eq.s32.totalorder %s2359_s15, 0 }
   0x7   : > { %p2135_p3 = scmp.lt.s32.totalorder %s2359_s15, 2  ;;  %s148_s20 = sand.u32 1, %s2359_s15  }
   0x8   : > { %s2418_s19 = scalar_select %p43_p1, %s2355_s14, %s45_s17  }
   0x9   : > { %p54_p4 = por %p53_p2, %p52_p0  ;;  %s150_s21 = sand.u32 1, %s2355_s14  }
   0xa   : > { %s2422_s22 = sshll.u32 %s150_s21, 6  ;;  %s2106_s23 = sshll.u32 %s2359_s15, 6 }
   0xb   : > { %s158_s26 = scalar_lea.hbm %s4337_s1, %s2106_s23  ;;  %s152_s28 = scalar_lea.vmem [#allocation5], %s2422_s22 }
   0xc   : > { %s159_s27 = sshll.u32 %s158_s26, 4  ;;  %s161_s29 = sshll.u32 %s152_s28, 4  ;;  %s160_s27 = int_to_ptr.hbm [resolvable:$true] %s159_s27  ;;  %s162_s29 = int_to_ptr.vmem [resolvable:$true] %s161_s29 }
   0xd   : > { %p2431_p5 = pnand %p2135_p3, %p54_p4  ;;  %s181_s6 = scalar_lea.hbm %s4338_s2, %s2106_s23 }
   0xe   : > { %s2438_s7 = scalar_lea.sflag [#allocation6], %s148_s20  ;;  %s2231_s8 = sshra.s32 %s160_s27, 4  ;;  %s2232_s8 = int_to_ptr.hbm [resolvable:$true] %s2231_s8 }
   0xf   : > { %s2233_s9 = scalar_lea.hbm %s2232_s8, 64  ;;  %p2235_p7 = pneg %p2431_p5 }
  0x10   : > { %p2234_p6 = scmp.ne.s32.totalorder %s2232_s8, %s2233_s9  ;;  %s2238_s17 = scalar_lea.hbm %s4337_s1, 128 }
  0x11   : > { %p2239_p10 = scmp.lt.s32.totalorder %s2232_s8, %s4337_s1  ;;  %p2240_p11 = scmp.lt.s32.totalorder %s2238_s17, %s2233_s9 }
  0x12   : > { %p2236_p8 = pnand %p2235_p7, %p2234_p6 }
  0x13   : > { %p2241_p12 = por %p2240_p11, %p2239_p10 }
  0x14   : > { %p2237_p9 = pneg %p2236_p8 }
  0x16   : > { %p2242_p13 = pnand %p2241_p12, %p2237_p9 }
  0x18   : > { %2245 = shalt.err (!%p2242_p13)
}
  0x19   : > { %s2361_s20 = smov 128   ;;  %s2362_s23 = smov 8  }
  0x1a   : > { %2130 = dma.hbm_to_vmem [thread:$0]  (!%p2431_p5), %s160_s27, 1024, %s162_s29, %s2438_s7, %s2361_s20, %s2361_s20, %s2362_s23  }
  0x1b   : > { %s182_s24 = sshll.u32 %s181_s6, 4  ;;  %s175_s25 = scalar_lea.vmem [#allocation7], %s2422_s22  ;;  %s2457_s24 = int_to_ptr.hbm [resolvable:$true] %s182_s24 }
  0x1c   : > { %s2460_s26 = sshll.u32 %s175_s25, 4  ;;  %s2463_s28 = sadd.s32 4294967295, %s2359_s15   ;;  %s185_s26 = int_to_ptr.vmem [resolvable:$true] %s2460_s26 }
  0x1d   : > { %p59_p0 = scmp.eq.s32.totalorder %s2463_s28, 0  ;;  %p58_p1 = scmp.ne.s32.totalorder %s2351_s13, %s2347_s12 }
  0x1e   : > { %p2063_p2 = scmp.ge.s32.totalorder %s2359_s15, 1  ;;  %p121_p3 = scmp.lt.s32.totalorder %s2359_s15, 3 }
  0x1f   : > { %p2472_p4 = por %p59_p0, %p58_p1  ;;  %s132_s4 = sshll.u32 %s4336_s0, 4  ;;  %s133_s4 = int_to_ptr.hbm [resolvable:$true] %s132_s4 }
  0x20   : > { %p2480_p6 = pnand %p2063_p2, %p121_p3  ;;  %s2363_s12 = smov [#allocation3]  }
  0x21   : > { %s134_s15 = sshll.u32 %s2363_s12, 4  ;;  %s2261_s8 = sshra.s32 %s2457_s24, 4  ;;  %s135_s15 = int_to_ptr.vmem [resolvable:$true] %s134_s15  ;;  %s2262_s8 = int_to_ptr.hbm [resolvable:$true] %s2261_s8 }
  0x22   : > { %p2123_p8 = pneg %p2480_p6  ;;  %s2263_s9 = scalar_lea.hbm %s2262_s8, 64 }
  0x23   : > { %p2264_p10 = scmp.ne.s32.totalorder %s2262_s8, %s2263_s9  ;;  %s2268_s17 = scalar_lea.hbm %s4338_s2, 128 }
  0x24   : > { %p2488_p9 = pnand %p2123_p8, %p59_p0  ;;  %p2269_p13 = scmp.lt.s32.totalorder %s2262_s8, %s4338_s2 }
  0x25   : > { %p2266_p11 = pnand %p2264_p10, %p2235_p7  ;;  %p2270_p1 = scmp.lt.s32.totalorder %s2268_s17, %s2263_s9 }
  0x27   : > { %p2267_p12 = pneg %p2266_p11  ;;  %p2271_p2 = por %p2270_p1, %p2269_p13 }
  0x29   : > { %p2272_p3 = pnand %p2271_p2, %p2267_p12 }
  0x2b   : > { %2275 = shalt.err (!%p2272_p3)
}
  0x2c   : > { %2133 = dma.hbm_to_vmem [thread:$0]  (!%p2431_p5), %s2457_s24, 1024, %s185_s26, %s2438_s7, %s2361_s20, %s2361_s20, %s2362_s23  }
  0x2d   : > { %s2364_s25 = smov 64   ;;  %s2365_s22 = smov 4  }
  0x2e   : > { %2126 = dma.hbm_to_vmem [thread:$0]  (!%p2488_p9), %s133_s4, 128, %s135_s15, [#allocation4], %s2364_s25, %s2364_s25, %s2365_s22  }
  0x2f   : > { %196 = sbr.rel (%p2480_p6) target bundleno = 900 (0x384), region = 32 }
  0x34   : > { %2338 = dma.done.wait (%p59_p0), [#allocation4], 128  }
  0x35   : > { %2340 = vsyncadd (%p59_p0), [#allocation4], 4294967168  ;;  %s203_s30 = sand.u32 1, %s2463_s28   ;;  %s205_s29 = sand.u32 1, %s2351_s13  }
  0x36   : > { %s2076_s12 = sshll.u32 %s205_s29, 6  ;;  %s204_s7 = scalar_lea.sflag [#allocation6], %s203_s30 }
  0x37   : > { %s2519_s20 = scalar_lea.vmem [#allocation5], %s2076_s12 }
  0x38   : > { %2342 = dma.done.wait (%p2472_p4), %s204_s7, 2048  }
  0x39   : > { %2344 = vsyncadd (%p2472_p4), %s204_s7, 4294965248  ;;  %v2109_v0 = vld [vmem:[#allocation3] sm:$0xff]  ;;  %v252_v1 = vld [vmem:[%s2519_s20] sm:$0xff]  ;;  %s217_s23 = scalar_lea.vmem [#allocation7], %s2076_s12  ;;  %vm320_vm0 = vcmask 130048   ;;  %vm490_vm1 = vcmask 126976  }
  0x3a   : > { %v253_v2 = vld [vmem:[%s2519_s20 + $0x8] sm:$0xff]  ;;  %v262_v4 = vld [vmem:[%s217_s23 + $0x10] sm:$0xff]  ;;  %v263_v5 = vld [vmem:[%s217_s23 + $0x18] sm:$0xff]  ;;  %388 = vmatpush.bf16.msra.mxu0 %v2109_v0  ;;  %2110 = vmatpush.bf16.msra.mxu1 %v2109_v0  ;;  %v268_v44 = vmul.f32 %v252_v1, %v252_v1  ;;  %v2366_v61 = vmov 0.0   ;;  %p247_p5 = scmp.lt.s32.totalorder %s2463_s28, 1 }
  0x3b   : > { %v292_v3 = vpack.c.bf16 %v253_v2, %v252_v1  ;;  %v256_v6 = vld [vmem:[%s2519_s20 + $0x20] sm:$0xff]  ;;  %v297_v7 = vpack.c.bf16 %v263_v5, %v262_v4  ;;  %v257_v8 = vld [vmem:[%s2519_s20 + $0x28] sm:$0xff]  ;;  %v266_v10 = vld [vmem:[%s217_s23 + $0x30] sm:$0xff]  ;;  %2111 = vmatpush.bf16.msra.mxu2 %v2109_v0  ;;  %2112 = vmatpush.bf16.msra.mxu3 %v2109_v0  ;;  %v269_v45 = vmul.f32 %v253_v2, %v253_v2 }
  0x3c   : > { %v272_v9 = vmul.f32 %v256_v6, %v256_v6  ;;  %v267_v11 = vld [vmem:[%s217_s23 + $0x38] sm:$0xff]  ;;  %v273_v12 = vmul.f32 %v257_v8, %v257_v8  ;;  %v282_v13 = vmul.f32 %v266_v10, %v266_v10  ;;  %v258_v17 = vld [vmem:[%s2519_s20 + $0x30] sm:$0xff]  ;;  %v260_v19 = vld [vmem:[%s217_s23] sm:$0xff]  ;;  %v294_v37 = vpack.c.bf16 %v257_v8, %v256_v6  ;;  %503 = vst.msk [vmem:[#allocation2 + $0x180] sm:$0x1f] %vm490_vm1, %v2366_v61  ;;  %s5168_s28 = smov (!%p247_p5, %s2463_s28), 1 }
  0x3d   : > { %v283_v14 = vmul.f32 %v267_v11, %v267_v11  ;;  %2083 = vmatmul.msk.bf16.vlgmr.msra.gmra.mxu0 %vm320_vm0, %v292_v3  ;;  %2088 = vmatmul.msk.bf16.vlgmr.msra.gmra.mxu1 %vm320_vm0, %v297_v7  ;;  %v259_v18 = vld [vmem:[%s2519_s20 + $0x38] sm:$0xff]  ;;  %v261_v20 = vld [vmem:[%s217_s23 + $0x8] sm:$0xff]  ;;  %v254_v21 = vld [vmem:[%s2519_s20 + $0x10] sm:$0xff]  ;;  %v274_v25 = vmul.f32 %v258_v17, %v258_v17  ;;  %v284_v27 = vmul.f32 %v260_v19, %v252_v1  ;;  %s2078_s24 = sshll.u32 %s5168_s28, 3 }
  0x3e   : > { %v302_v15 = vpack.c.bf16 %v273_v12, %v272_v9  ;;  %v255_v22 = vld [vmem:[%s2519_s20 + $0x18] sm:$0xff]  ;;  %v264_v23 = vld [vmem:[%s217_s23 + $0x20] sm:$0xff]  ;;  %v265_v24 = vld [vmem:[%s217_s23 + $0x28] sm:$0xff]  ;;  %v275_v26 = vmul.f32 %v259_v18, %v259_v18  ;;  %v285_v28 = vmul.f32 %v261_v20, %v253_v2  ;;  %v276_v33 = vmul.f32 %v260_v19, %v260_v19  ;;  %491 = vst.msk [vmem:[#allocation2] sm:$0x1f] %vm490_vm1, %v2366_v61  ;;  %s250_s4 = scalar_lea.vmem %s4339_s3, %s2078_s24 }
  0x3f   : > { %v307_v16 = vpack.c.bf16 %v283_v14, %v282_v13  ;;  %v293_v29 = vpack.c.bf16 %v255_v22, %v254_v21  ;;  %v298_v30 = vpack.c.bf16 %v265_v24, %v264_v23  ;;  %v277_v34 = vmul.f32 %v261_v20, %v261_v20  ;;  %492 = vst.msk [vmem:[#allocation2 + $0x20] sm:$0x1f] %vm490_vm1, %v2366_v61 }
  0x40   : > { %2093 = vmatmul.msk.bf16.vlgmr.msra.gmra.mxu2 %vm320_vm0, %v302_v15  ;;  %v303_v31 = vpack.c.bf16 %v275_v26, %v274_v25  ;;  %v308_v32 = vpack.c.bf16 %v285_v28, %v284_v27  ;;  %v286_v35 = vmul.f32 %v262_v4, %v254_v21  ;;  %v287_v36 = vmul.f32 %v263_v5, %v255_v22 }
  0x41   : > { %2098 = vmatmul.msk.bf16.vlgmr.msra.gmra.mxu3 %vm320_vm0, %v307_v16  ;;  %v299_v38 = vpack.c.bf16 %v267_v11, %v266_v10  ;;  %v304_v39 = vpack.c.bf16 %v277_v34, %v276_v33  ;;  %v290_v41 = vmul.f32 %v266_v10, %v258_v17  ;;  %v291_v42 = vmul.f32 %v267_v11, %v259_v18 }
  0x42   : > { %v309_v40 = vpack.c.bf16 %v287_v36, %v286_v35  ;;  %v278_v46 = vmul.f32 %v262_v4, %v262_v4  ;;  %v279_v47 = vmul.f32 %v263_v5, %v263_v5  ;;  %v288_v48 = vmul.f32 %v264_v23, %v256_v6  ;;  %493 = vst.msk [vmem:[#allocation2 + $0x40] sm:$0x1f] %vm490_vm1, %v2366_v61 }
  0x43   : > { %v311_v43 = vpack.c.bf16 %v291_v42, %v290_v41  ;;  %v289_v49 = vmul.f32 %v265_v24, %v257_v8  ;;  %v295_v50 = vpack.c.bf16 %v259_v18, %v258_v17  ;;  %v300_v51 = vpack.c.bf16 %v269_v45, %v268_v44  ;;  %494 = vst.msk [vmem:[#allocation2 + $0x60] sm:$0x1f] %vm490_vm1, %v2366_v61 }
  0x44   : > { %v305_v52 = vpack.c.bf16 %v279_v47, %v278_v46  ;;  %v270_v54 = vmul.f32 %v254_v21, %v254_v21  ;;  %v271_v55 = vmul.f32 %v255_v22, %v255_v22  ;;  %v280_v56 = vmul.f32 %v264_v23, %v264_v23  ;;  %495 = vst.msk [vmem:[#allocation2 + $0x80] sm:$0x1f] %vm490_vm1, %v2366_v61 }
  0x45   : > { %v310_v53 = vpack.c.bf16 %v289_v49, %v288_v48  ;;  %v281_v57 = vmul.f32 %v265_v24, %v265_v24  ;;  %v296_v58 = vpack.c.bf16 %v261_v20, %v260_v19  ;;  %496 = vst.msk [vmem:[#allocation2 + $0xa0] sm:$0x1f] %vm490_vm1, %v2366_v61 }
  0x46   : > { %v301_v59 = vpack.c.bf16 %v271_v55, %v270_v54  ;;  %497 = vst.msk [vmem:[#allocation2 + $0xc0] sm:$0x1f] %vm490_vm1, %v2366_v61 }
  0x47   : > { %v306_v60 = vpack.c.bf16 %v281_v57, %v280_v56  ;;  %498 = vst.msk [vmem:[#allocation2 + $0xe0] sm:$0x1f] %vm490_vm1, %v2366_v61 }
  0x48   : > { %499 = vst.msk [vmem:[#allocation2 + $0x100] sm:$0x1f] %vm490_vm1, %v2366_v61 }
  0x49   : > { %500 = vst.msk [vmem:[#allocation2 + $0x120] sm:$0x1f] %vm490_vm1, %v2366_v61 }
  0x4a   : > { %501 = vst.msk [vmem:[#allocation2 + $0x140] sm:$0x1f] %vm490_vm1, %v2366_v61 }
  0x4b   : > { %502 = vst.msk [vmem:[#allocation2 + $0x160] sm:$0x1f] %vm490_vm1, %v2366_v61 }
  0x4c   : > { %504 = vst.msk [vmem:[#allocation2 + $0x1a0] sm:$0x1f] %vm490_vm1, %v2366_v61 }
  0x4d   : > { %2084 = vmatmul.msk.bf16.gmra.mxu0 %vm320_vm0, %v293_v29  ;;  %2089 = vmatmul.msk.bf16.gmra.mxu1 %vm320_vm0, %v298_v30  ;;  %505 = vst.msk [vmem:[#allocation2 + $0x1c0] sm:$0x1f] %vm490_vm1, %v2366_v61 }
  0x4e   : > { %506 = vst.msk [vmem:[#allocation2 + $0x1e0] sm:$0x1f] %vm490_vm1, %v2366_v61 }
  0x4f   : > { %507 = vst.msk [vmem:[#allocation2 + $0x200] sm:$0x1f] %vm490_vm1, %v2366_v61 }
  0x50   : > { %2094 = vmatmul.msk.bf16.gmra.mxu2 %vm320_vm0, %v303_v31  ;;  %508 = vst.msk [vmem:[#allocation2 + $0x220] sm:$0x1f] %vm490_vm1, %v2366_v61 }
  0x51   : > { %2099 = vmatmul.msk.bf16.gmra.mxu3 %vm320_vm0, %v308_v32  ;;  %509 = vst.msk [vmem:[#allocation2 + $0x240] sm:$0x1f] %vm490_vm1, %v2366_v61 }
  0x52   : > { %510 = vst.msk [vmem:[#allocation2 + $0x260] sm:$0x1f] %vm490_vm1, %v2366_v61 }
  0x53   : > { %511 = vst.msk [vmem:[#allocation2 + $0x15] sm:$0x1f] %vm490_vm1, %v2366_v61 }
  0x54   : > { %512 = vst.msk [vmem:[#allocation2 + $0x35] sm:$0x1f] %vm490_vm1, %v2366_v61 }
  0x55   : > { %513 = vst.msk [vmem:[#allocation2 + $0x55] sm:$0x1f] %vm490_vm1, %v2366_v61 }
  0x56   : > { %514 = vst.msk [vmem:[#allocation2 + $0x75] sm:$0x1f] %vm490_vm1, %v2366_v61 }
  0x57   : > { %515 = vst.msk [vmem:[#allocation2 + $0x95] sm:$0x1f] %vm490_vm1, %v2366_v61 }
  0x58   : > { %516 = vst.msk [vmem:[#allocation2 + $0xb5] sm:$0x1f] %vm490_vm1, %v2366_v61 }
  0x59   : > { %517 = vst.msk [vmem:[#allocation2 + $0xd5] sm:$0x1f] %vm490_vm1, %v2366_v61 }
  0x5a   : > { %518 = vst.msk [vmem:[#allocation2 + $0xf5] sm:$0x1f] %vm490_vm1, %v2366_v61 }
  0x5b   : > { %519 = vst.msk [vmem:[#allocation2 + $0x115] sm:$0x1f] %vm490_vm1, %v2366_v61 }
  0x5c   : > { %520 = vst.msk [vmem:[#allocation2 + $0x135] sm:$0x1f] %vm490_vm1, %v2366_v61 }
  0x5d   : > { %2085 = vmatmul.msk.bf16.gmra.mxu0 %vm320_vm0, %v294_v37  ;;  %2090 = vmatmul.msk.bf16.gmra.mxu1 %vm320_vm0, %v299_v38  ;;  %521 = vst.msk [vmem:[#allocation2 + $0x155] sm:$0x1f] %vm490_vm1, %v2366_v61 }
  0x5e   : > { %522 = vst.msk [vmem:[#allocation2 + $0x175] sm:$0x1f] %vm490_vm1, %v2366_v61 }
  0x5f   : > { %523 = vst.msk [vmem:[#allocation2 + $0x195] sm:$0x1f] %vm490_vm1, %v2366_v61 }
  0x60   : > { %2095 = vmatmul.msk.bf16.gmra.mxu2 %vm320_vm0, %v304_v39  ;;  %524 = vst.msk [vmem:[#allocation2 + $0x1b5] sm:$0x1f] %vm490_vm1, %v2366_v61 }
  0x61   : > { %2100 = vmatmul.msk.bf16.gmra.mxu3 %vm320_vm0, %v309_v40  ;;  %525 = vst.msk [vmem:[#allocation2 + $0x1d5] sm:$0x1f] %vm490_vm1, %v2366_v61 }
  0x62   : > { %526 = vst.msk [vmem:[#allocation2 + $0x1f5] sm:$0x1f] %vm490_vm1, %v2366_v61 }
  0x63   : > { %527 = vst.msk [vmem:[#allocation2 + $0x215] sm:$0x1f] %vm490_vm1, %v2366_v61 }
  0x64   : > { %528 = vst.msk [vmem:[#allocation2 + $0x235] sm:$0x1f] %vm490_vm1, %v2366_v61 }
  0x65   : > { %529 = vst.msk [vmem:[#allocation2 + $0x255] sm:$0x1f] %vm490_vm1, %v2366_v61 }
  0x66   : > { %530 = vst.msk [vmem:[#allocation2 + $0x275] sm:$0x1f] %vm490_vm1, %v2366_v61 }
  0x6d   : > { %2086 = vmatmul.msk.bf16.gmra.mxu0 %vm320_vm0, %v295_v50  ;;  %2091 = vmatmul.msk.bf16.gmra.mxu1 %vm320_vm0, %v300_v51 }
  0x70   : > { %2096 = vmatmul.msk.bf16.gmra.mxu2 %vm320_vm0, %v305_v52 }
  0x71   : > { %2101 = vmatmul.msk.bf16.gmra.mxu3 %vm320_vm0, %v310_v53 }
  0x7d   : > { %2087 = vmatmul.msk.bf16.gmra.mxu0 %vm320_vm0, %v296_v58  ;;  %2092 = vmatmul.msk.bf16.gmra.mxu1 %vm320_vm0, %v301_v59 }
  0x80   : > { %2097 = vmatmul.msk.bf16.gmra.mxu2 %vm320_vm0, %v306_v60 }
  0x81   : > { %2102 = vmatmul.msk.bf16.gmra.mxu3 %vm320_vm0, %v311_v43 }
  0xba   : > { %v390_v62 = vpop.f32.mrf.mxu0  ;;  %v415_v63 = vpop.f32.mrf.mxu1 }
  0xbb   : > { %531 = vst.msk [vmem:[#allocation2 + $0x5] sm:$0xff] %vm320_vm0, %v390_v62 }
  0xbc   : > { %541 = vst.msk [vmem:[#allocation2 + $0xa5] sm:$0xff] %vm320_vm0, %v415_v63 }
  0xc2   : > { %v392_v2 = vpop.f32.mrf.mxu0  ;;  %v417_v3 = vpop.f32.mrf.mxu1  ;;  %v571_v20 = vld [vmem:[#allocation2] sm:$0xff] }
  0xc3   : > { %v440_v0 = vpop.f32.mrf.mxu2  ;;  %532 = vst.msk [vmem:[#allocation2 + $0xd] sm:$0xff] %vm320_vm0, %v392_v2  ;;  %v581_v21 = vld [vmem:[#allocation2 + $0xa0] sm:$0xff]  ;;  %v2616_v28 = vmul.f32 0.0010283801, %v571_v20 }
  0xc4   : > { %v465_v1 = vpop.f32.mrf.mxu3  ;;  %551 = vst.msk [vmem:[#allocation2 + $0x145] sm:$0xff] %vm320_vm0, %v440_v0  ;;  %v651_v24 = vld [vmem:[#allocation2 + $0x1] sm:$0xff]  ;;  %v2618_v29 = vmul.f32 0.0010283801, %v581_v21 }
  0xc5   : > { %561 = vst.msk [vmem:[#allocation2 + $0x1e5] sm:$0xff] %vm320_vm0, %v465_v1  ;;  %v661_v27 = vld [vmem:[#allocation2 + $0xa1] sm:$0xff]  ;;  %v2621_v33 = vmul.f32 0.007598758, %v651_v24 }
  0xc6   : > { %542 = vst.msk [vmem:[#allocation2 + $0xad] sm:$0xff] %vm320_vm0, %v417_v3  ;;  %v731_v30 = vld [vmem:[#allocation2 + $0x2] sm:$0xff]  ;;  %v2624_v36 = vmul.f32 0.007598758, %v661_v27 }
  0xc7   : > { %4365 = vst [vmem:[#allocation10_spill] sm:$0xff] %v2621_v33  ;;  %v2627_v40 = vmul.f32 0.036000773, %v731_v30  ;;  %v741_v44 = vld [vmem:[#allocation2 + $0xa2] sm:$0xff] }
  0xc8   : > { %4366 = vst [vmem:[#allocation11_spill] sm:$0xff] %v2624_v36  ;;  %v2646_v62 = vmul.f32 0.036000773, %v741_v44 }
  0xc9   : > { %4367 = vst [vmem:[#allocation12_spill] sm:$0xff] %v2627_v40 }
  0xca   : > { %v395_v6 = vpop.f32.mrf.mxu0  ;;  %v420_v7 = vpop.f32.mrf.mxu1  ;;  %v572_v34 = vld [vmem:[#allocation2 + $0x8] sm:$0xff]  ;;  %4374 = vst [vmem:[#allocation19_spill] sm:$0xff] %v2646_v62 }
  0xcb   : > { %v442_v4 = vpop.f32.mrf.mxu2  ;;  %533 = vst.msk [vmem:[#allocation2 + $0x25] sm:$0xff] %vm320_vm0, %v395_v6  ;;  %v591_v31 = vld [vmem:[#allocation2 + $0x140] sm:$0xff]  ;;  %v652_v38 = vld [vmem:[#allocation2 + $0x9] sm:$0xff]  ;;  %v2633_v45 = vmul.f32 0.0010283801, %v572_v34 }
  0xcc   : > { %v467_v5 = vpop.f32.mrf.mxu3  ;;  %552 = vst.msk [vmem:[#allocation2 + $0x14d] sm:$0xff] %vm320_vm0, %v442_v4  ;;  %v671_v32 = vld [vmem:[#allocation2 + $0x141] sm:$0xff]  ;;  %v2629_v41 = vmul.f32 0.0010283801, %v591_v31  ;;  %v732_v43 = vld [vmem:[#allocation2 + $0xa] sm:$0xff] }
  0xcd   : > { %562 = vst.msk [vmem:[#allocation2 + $0x1ed] sm:$0xff] %vm320_vm0, %v467_v5  ;;  %v601_v35 = vld [vmem:[#allocation2 + $0x1e0] sm:$0xff]  ;;  %v582_v37 = vld [vmem:[#allocation2 + $0xa8] sm:$0xff]  ;;  %v2631_v42 = vmul.f32 0.007598758, %v671_v32 }
  0xce   : > { %543 = vst.msk [vmem:[#allocation2 + $0xc5] sm:$0xff] %vm320_vm0, %v420_v7  ;;  %v662_v39 = vld [vmem:[#allocation2 + $0xa9] sm:$0xff]  ;;  %v2635_v46 = vmul.f32 0.0010283801, %v601_v35  ;;  %v2637_v51 = vmul.f32 0.0010283801, %v582_v37 }
  0xcf   : > { %4368 = vst [vmem:[#allocation13_spill] sm:$0xff] %v2629_v41  ;;  %v742_v47 = vld [vmem:[#allocation2 + $0xaa] sm:$0xff]  ;;  %v751_v48 = vld [vmem:[#allocation2 + $0x142] sm:$0xff]  ;;  %v2639_v52 = vmul.f32 0.007598758, %v652_v38 }
  0xd0   : > { %4369 = vst [vmem:[#allocation14_spill] sm:$0xff] %v2631_v42  ;;  %v2641_v53 = vmul.f32 0.007598758, %v662_v39  ;;  %v2644_v58 = vmul.f32 0.036000773, %v732_v43  ;;  %v681_v61 = vld [vmem:[#allocation2 + $0x1e1] sm:$0xff] }
  0xd1   : > { %4370 = vst [vmem:[#allocation15_spill] sm:$0xff] %v2635_v46  ;;  %v2648_v63 = vmul.f32 0.036000773, %v742_v47  ;;  %v2651_v3 = vmul.f32 0.036000773, %v751_v48  ;;  %v761_v37 = vld [vmem:[#allocation2 + $0x1e2] sm:$0xff] }
  0xd2   : > { %v397_v10 = vpop.f32.mrf.mxu0  ;;  %v422_v11 = vpop.f32.mrf.mxu1  ;;  %4371 = vst [vmem:[#allocation16_spill] sm:$0xff] %v2639_v52  ;;  %v573_v59 = vld [vmem:[#allocation2 + $0x20] sm:$0xff] }
  0xd3   : > { %v445_v8 = vpop.f32.mrf.mxu2  ;;  %534 = vst.msk [vmem:[#allocation2 + $0x2d] sm:$0xff] %vm320_vm0, %v397_v10  ;;  %v592_v56 = vld [vmem:[#allocation2 + $0x148] sm:$0xff] }
  0xd4   : > { %v470_v9 = vpop.f32.mrf.mxu3  ;;  %553 = vst.msk [vmem:[#allocation2 + $0x165] sm:$0xff] %vm320_vm0, %v445_v8  ;;  %v602_v57 = vld [vmem:[#allocation2 + $0x1e8] sm:$0xff]  ;;  %v2653_v4 = vmul.f32 0.0010283801, %v592_v56  ;;  %v2658_v8 = vmul.f32 0.0010283801, %v573_v59 }
  0xd5   : > { %563 = vst.msk [vmem:[#allocation2 + $0x205] sm:$0xff] %vm320_vm0, %v470_v9  ;;  %v583_v60 = vld [vmem:[#allocation2 + $0xc0] sm:$0xff]  ;;  %v672_v2 = vld [vmem:[#allocation2 + $0x149] sm:$0xff]  ;;  %v2655_v5 = vmul.f32 0.0010283801, %v602_v57 }
  0xd6   : > { %544 = vst.msk [vmem:[#allocation2 + $0xcd] sm:$0xff] %vm320_vm0, %v422_v11  ;;  %v653_v0 = vld [vmem:[#allocation2 + $0x21] sm:$0xff]  ;;  %v682_v6 = vld [vmem:[#allocation2 + $0x1e9] sm:$0xff]  ;;  %v2660_v9 = vmul.f32 0.0010283801, %v583_v60 }
  0xd7   : > { %4372 = vst [vmem:[#allocation17_spill] sm:$0xff] %v2641_v53  ;;  %v663_v1 = vld [vmem:[#allocation2 + $0xc1] sm:$0xff]  ;;  %v752_v7 = vld [vmem:[#allocation2 + $0x14a] sm:$0xff]  ;;  %v2671_v21 = vmul.f32 0.007598758, %v682_v6 }
  0xd8   : > { %4373 = vst [vmem:[#allocation18_spill] sm:$0xff] %v2644_v58  ;;  %v733_v10 = vld [vmem:[#allocation2 + $0x22] sm:$0xff]  ;;  %v2677_v31 = vmul.f32 0.036000773, %v752_v7  ;;  %v762_v44 = vld [vmem:[#allocation2 + $0x1ea] sm:$0xff] }
  0xd9   : > { %4375 = vst [vmem:[#allocation20_spill] sm:$0xff] %v2648_v63  ;;  %v2703_v6 = vmul.f32 0.036000773, %v761_v37 }
  0xda   : > { %v400_v14 = vpop.f32.mrf.mxu0  ;;  %v425_v15 = vpop.f32.mrf.mxu1  ;;  %4376 = vst [vmem:[#allocation21_spill] sm:$0xff] %v2651_v3  ;;  %v574_v20 = vld [vmem:[#allocation2 + $0x28] sm:$0xff] }
  0xdb   : > { %v447_v12 = vpop.f32.mrf.mxu2  ;;  %535 = vst.msk [vmem:[#allocation2 + $0x45] sm:$0xff] %vm320_vm0, %v400_v14  ;;  %v593_v11 = vld [vmem:[#allocation2 + $0x160] sm:$0xff]  ;;  %v654_v30 = vld [vmem:[#allocation2 + $0x29] sm:$0xff]  ;;  %v2685_v38 = vmul.f32 0.0010283801, %v574_v20 }
  0xdc   : > { %v472_v13 = vpop.f32.mrf.mxu3  ;;  %554 = vst.msk [vmem:[#allocation2 + $0x16d] sm:$0xff] %vm320_vm0, %v447_v12  ;;  %v2663_v12 = vmul.f32 0.007598758, %v653_v0  ;;  %v603_v14 = vld [vmem:[#allocation2 + $0x200] sm:$0xff]  ;;  %v2675_v27 = vmul.f32 0.0010283801, %v593_v11 }
  0xdd   : > { %564 = vst.msk [vmem:[#allocation2 + $0x20d] sm:$0xff] %vm320_vm0, %v472_v13  ;;  %v2665_v13 = vmul.f32 0.007598758, %v663_v1  ;;  %v2680_v32 = vmul.f32 0.0010283801, %v603_v14  ;;  %v664_v34 = vld [vmem:[#allocation2 + $0xc9] sm:$0xff] }
  0xde   : > { %545 = vst.msk [vmem:[#allocation2 + $0xe5] sm:$0xff] %vm320_vm0, %v425_v15  ;;  %v673_v15 = vld [vmem:[#allocation2 + $0x161] sm:$0xff]  ;;  %v734_v39 = vld [vmem:[#allocation2 + $0x2a] sm:$0xff]  ;;  %v2690_v48 = vmul.f32 0.007598758, %v654_v30 }
  0xdf   : > { %4377 = vst [vmem:[#allocation22_spill] sm:$0xff] %v2653_v4  ;;  %v2682_v35 = vmul.f32 0.007598758, %v673_v15  ;;  %v744_v43 = vld [vmem:[#allocation2 + $0xca] sm:$0xff]  ;;  %v2697_v59 = vmul.f32 0.036000773, %v734_v39 }
  0xe0   : > { %4378 = vst [vmem:[#allocation23_spill] sm:$0xff] %v2655_v5  ;;  %v2699_v60 = vmul.f32 0.036000773, %v744_v43  ;;  %v683_v1 = vld [vmem:[#allocation2 + $0x201] sm:$0xff] }
  0xe1   : > { %4379 = vst [vmem:[#allocation24_spill] sm:$0xff] %v2663_v12  ;;  %v763_v63 = vld [vmem:[#allocation2 + $0x202] sm:$0xff] }
  0xe2   : > { %v402_v18 = vpop.f32.mrf.mxu0  ;;  %v427_v19 = vpop.f32.mrf.mxu1  ;;  %4380 = vst [vmem:[#allocation25_spill] sm:$0xff] %v2665_v13  ;;  %v575_v56 = vld [vmem:[#allocation2 + $0x40] sm:$0xff] }
  0xe3   : > { %v450_v16 = vpop.f32.mrf.mxu2  ;;  %536 = vst.msk [vmem:[#allocation2 + $0x4d] sm:$0xff] %vm320_vm0, %v402_v18  ;;  %v655_v0 = vld [vmem:[#allocation2 + $0x41] sm:$0xff]  ;;  %v674_v15 = vld [vmem:[#allocation2 + $0x169] sm:$0xff] }
  0xe4   : > { %v475_v17 = vpop.f32.mrf.mxu3  ;;  %555 = vst.msk [vmem:[#allocation2 + $0x185] sm:$0xff] %vm320_vm0, %v450_v16  ;;  %v2667_v16 = vmul.f32 0.007598758, %v672_v2  ;;  %v604_v57 = vld [vmem:[#allocation2 + $0x208] sm:$0xff] }
  0xe5   : > { %565 = vst.msk [vmem:[#allocation2 + $0x225] sm:$0xff] %vm320_vm0, %v475_v17  ;;  %v2669_v17 = vmul.f32 0.007598758, %v681_v61  ;;  %v585_v61 = vld [vmem:[#allocation2 + $0xe0] sm:$0xff] }
  0xe6   : > { %546 = vst.msk [vmem:[#allocation2 + $0xed] sm:$0xff] %vm320_vm0, %v427_v19  ;;  %v665_v14 = vld [vmem:[#allocation2 + $0xe1] sm:$0xff]  ;;  %v2715_v30 = vmul.f32 0.0010283801, %v585_v61 }
  0xe7   : > { %4381 = vst [vmem:[#allocation26_spill] sm:$0xff] %v2667_v16  ;;  %v735_v37 = vld [vmem:[#allocation2 + $0x42] sm:$0xff]  ;;  %v2720_v43 = vmul.f32 0.007598758, %v665_v14 }
  0xe8   : > { %4382 = vst [vmem:[#allocation27_spill] sm:$0xff] %v2669_v17  ;;  %v745_v61 = vld [vmem:[#allocation2 + $0xe2] sm:$0xff] }
  0xe9   : > { %4383 = vst [vmem:[#allocation28_spill] sm:$0xff] %v2671_v21  ;;  %v2741_v3 = vmul.f32 0.036000773, %v745_v61 }
  0xea   : > { %v405_v25 = vpop.f32.mrf.mxu0  ;;  %v430_v26 = vpop.f32.mrf.mxu1  ;;  %4385 = vst [vmem:[#allocation30_spill] sm:$0xff] %v2675_v27  ;;  %v833_v27 = vld [vmem:[#allocation2 + $0x163] sm:$0xff] }
  0xeb   : > { %v452_v22 = vpop.f32.mrf.mxu2  ;;  %537 = vst.msk [vmem:[#allocation2 + $0x65] sm:$0xff] %vm320_vm0, %v405_v25  ;;  %v595_v39 = vld [vmem:[#allocation2 + $0x180] sm:$0xff] }
  0xec   : > { %v477_v23 = vpop.f32.mrf.mxu3  ;;  %556 = vst.msk [vmem:[#allocation2 + $0x18d] sm:$0xff] %vm320_vm0, %v452_v22  ;;  %v743_v22 = vld [vmem:[#allocation2 + $0xc2] sm:$0xff] }
  0xed   : > { %566 = vst.msk [vmem:[#allocation2 + $0x22d] sm:$0xff] %vm320_vm0, %v477_v23  ;;  %v2673_v23 = vmul.f32 0.036000773, %v733_v10 }
  0xee   : > { %547 = vst.msk [vmem:[#allocation2 + $0x105] sm:$0xff] %vm320_vm0, %v430_v26  ;;  %v584_v26 = vld [vmem:[#allocation2 + $0xc8] sm:$0xff] }
  0xef   : > { %4384 = vst [vmem:[#allocation29_spill] sm:$0xff] %v2673_v23  ;;  %v2688_v47 = vmul.f32 0.0010283801, %v584_v26  ;;  %v754_v26 = vld [vmem:[#allocation2 + $0x16a] sm:$0xff] }
  0xf0   : > { %4386 = vst [vmem:[#allocation31_spill] sm:$0xff] %v2677_v31  ;;  %v586_v31 = vld [vmem:[#allocation2 + $0xe8] sm:$0xff] }
  0xf1   : > { %4387 = vst [vmem:[#allocation32_spill] sm:$0xff] %v2680_v32 }
  0xf2   : > { %v407_v54 = vpop.f32.mrf.mxu0  ;;  %v432_v55 = vpop.f32.mrf.mxu1  ;;  %4388 = vst [vmem:[#allocation33_spill] sm:$0xff] %v2682_v35 }
  0xf3   : > { %v455_v49 = vpop.f32.mrf.mxu2  ;;  %538 = vst.msk [vmem:[#allocation2 + $0x6d] sm:$0xff] %vm320_vm0, %v407_v54  ;;  %v2693_v54 = vmul.f32 0.007598758, %v664_v34  ;;  %v2717_v34 = vmul.f32 0.007598758, %v655_v0  ;;  %v596_v61 = vld [vmem:[#allocation2 + $0x188] sm:$0xff] }
  0xf4   : > { %v480_v50 = vpop.f32.mrf.mxu3  ;;  %557 = vst.msk [vmem:[#allocation2 + $0x1a5] sm:$0xff] %vm320_vm0, %v455_v49  ;;  %v753_v49 = vld [vmem:[#allocation2 + $0x162] sm:$0xff]  ;;  %v2729_v0 = vmul.f32 0.036000773, %v735_v37  ;;  %v756_v62 = vld [vmem:[#allocation2 + $0x18a] sm:$0xff] }
  0xf5   : > { %567 = vst.msk [vmem:[#allocation2 + $0x245] sm:$0xff] %vm320_vm0, %v480_v50  ;;  %v594_v50 = vld [vmem:[#allocation2 + $0x168] sm:$0xff]  ;;  %v2701_v2 = vmul.f32 0.036000773, %v753_v49  ;;  %v2765_v58 = vmul.f32 0.0010283801, %v596_v61 }
  0xf6   : > { %548 = vst.msk [vmem:[#allocation2 + $0x10d] sm:$0xff] %vm320_vm0, %v432_v55  ;;  %v2695_v55 = vmul.f32 0.036000773, %v743_v22  ;;  %v2705_v11 = vmul.f32 0.0010283801, %v594_v50  ;;  %v675_v49 = vld [vmem:[#allocation2 + $0x181] sm:$0xff] }
  0xf7   : > { %4389 = vst [vmem:[#allocation34_spill] sm:$0xff] %v2690_v48  ;;  %v2710_v22 = vmul.f32 0.0010283801, %v575_v56  ;;  %v755_v50 = vld [vmem:[#allocation2 + $0x182] sm:$0xff]  ;;  %v2725_v56 = vmul.f32 0.007598758, %v683_v1 }
  0xf8   : > { %4390 = vst [vmem:[#allocation35_spill] sm:$0xff] %v2693_v54  ;;  %v2735_v14 = vmul.f32 0.007598758, %v675_v49  ;;  %v1155_v23 = vld [vmem:[#allocation2 + $0x186] sm:$0xff] }
  0xf9   : > { %4391 = vst [vmem:[#allocation36_spill] sm:$0xff] %v2695_v55  ;;  %v746_v55 = vld [vmem:[#allocation2 + $0xea] sm:$0xff] }
  0xfa   : > { %v410_v24 = vpop.f32.mrf.mxu0  ;;  %v435_v25 = vpop.f32.mrf.mxu1  ;;  %4392 = vst [vmem:[#allocation37_spill] sm:$0xff] %v2697_v59  ;;  %v676_v40 = vld [vmem:[#allocation2 + $0x189] sm:$0xff] }
  0xfb   : > { %v457_v18 = vpop.f32.mrf.mxu2  ;;  %539 = vst.msk [vmem:[#allocation2 + $0x85] sm:$0xff] %vm320_vm0, %v410_v24  ;;  %v2712_v24 = vmul.f32 0.0010283801, %v604_v57  ;;  %v915_v57 = vld [vmem:[#allocation2 + $0x184] sm:$0xff] }
  0xfc   : > { %v482_v19 = vpop.f32.mrf.mxu3  ;;  %558 = vst.msk [vmem:[#allocation2 + $0x1ad] sm:$0xff] %vm320_vm0, %v457_v18  ;;  %v2707_v18 = vmul.f32 0.036000773, %v762_v44  ;;  %v2722_v44 = vmul.f32 0.007598758, %v674_v15  ;;  %v907_v61 = vld [vmem:[#allocation2 + $0x104] sm:$0xff] }
  0xfd   : > { %568 = vst.msk [vmem:[#allocation2 + $0x24d] sm:$0xff] %vm320_vm0, %v482_v19  ;;  %v2737_v15 = vmul.f32 0.036000773, %v755_v50  ;;  %v685_v50 = vld [vmem:[#allocation2 + $0x221] sm:$0xff]  ;;  %v748_v17 = vld [vmem:[#allocation2 + $0x10a] sm:$0xff] }
  0xfe   : > { %549 = vst.msk [vmem:[#allocation2 + $0x125] sm:$0xff] %vm320_vm0, %v435_v25  ;;  %v684_v25 = vld [vmem:[#allocation2 + $0x209] sm:$0xff]  ;;  %v2757_v59 = vmul.f32 0.007598758, %v685_v50  ;;  %v587_v50 = vld [vmem:[#allocation2 + $0x100] sm:$0xff] }
  0xff   : > { %4393 = vst [vmem:[#allocation38_spill] sm:$0xff] %v2699_v60  ;;  %v1028_v35 = vld [vmem:[#allocation2 + $0x10d] sm:$0xff] }
 0x100   : > { %4394 = vst [vmem:[#allocation39_spill] sm:$0xff] %v2701_v2  ;;  %v2739_v2 = vmul.f32 0.21300554, %v915_v57  ;;  %v2749_v57 = vmul.f32 0.0010283801, %v586_v31  ;;  %v1147_v16 = vld [vmem:[#allocation2 + $0x106] sm:$0xff] }
 0x101   : > { %4395 = vst [vmem:[#allocation40_spill] sm:$0xff] %v2703_v6  ;;  %v576_v6 = vld [vmem:[#allocation2 + $0x48] sm:$0xff]  ;;  %v2761_v31 = vmul.f32 0.036000773, %v746_v55  ;;  %v2809_v13 = vmul.f32 0.26601171, %v1028_v35 }
 0x102   : > { %4396 = vst [vmem:[#allocation41_spill] sm:$0xff] %v2705_v11  ;;  %v412_v19 = vpop.f32.mrf.mxu0  ;;  %v437_v20 = vpop.f32.mrf.mxu1  ;;  %v2747_v49 = vmul.f32 0.0010283801, %v576_v6  ;;  %v667_v55 = vld [vmem:[#allocation2 + $0x101] sm:$0xff]  ;;  %v1148_v42 = vld [vmem:[#allocation2 + $0x10e] sm:$0xff] }
 0x103   : > { %v460_v7 = vpop.f32.mrf.mxu2  ;;  %4397 = vst [vmem:[#allocation42_spill] sm:$0xff] %v2707_v18  ;;  %v1035_v18 = vld [vmem:[#allocation2 + $0x185] sm:$0xff]  ;;  %v2811_v53 = vmul.f32 0.21300554, %v1147_v16 }
 0x104   : > { %v485_v10 = vpop.f32.mrf.mxu3  ;;  %559 = vst.msk [vmem:[#allocation2 + $0x1c5] sm:$0xff] %vm320_vm0, %v460_v7  ;;  %v2727_v7 = vmul.f32 0.007598758, %v684_v25  ;;  %v605_v25 = vld [vmem:[#allocation2 + $0x220] sm:$0xff]  ;;  %v2743_v37 = vmul.f32 0.26601171, %v1035_v18 }
 0x105   : > { %4398 = vst [vmem:[#allocation43_spill] sm:$0xff] %v2712_v24  ;;  %v2751_v60 = vmul.f32 0.0010283801, %v605_v25  ;;  %v2763_v25 = vmul.f32 0.036000773, %v763_v63  ;;  %v598_v36 = vld [vmem:[#allocation2 + $0x1a8] sm:$0xff] }
 0x106   : > { %569 = vst.msk [vmem:[#allocation2 + $0x265] sm:$0xff] %vm320_vm0, %v485_v10  ;;  %v2731_v10 = vmul.f32 0.0010283801, %v595_v39  ;;  %v656_v39 = vld [vmem:[#allocation2 + $0x49] sm:$0xff]  ;;  %v2825_v35 = vmul.f32 0.0010283801, %v598_v36 }
 0x107   : > { %4399 = vst [vmem:[#allocation44_spill] sm:$0xff] %v2717_v34  ;;  %v658_v16 = vld [vmem:[#allocation2 + $0x69] sm:$0xff]  ;;  %v659_v34 = vld [vmem:[#allocation2 + $0x81] sm:$0xff] }
 0x108   : > { %540 = vst.msk [vmem:[#allocation2 + $0x8d] sm:$0xff] %vm320_vm0, %v412_v19  ;;  %v2733_v19 = vmul.f32 0.036000773, %v754_v26  ;;  %v666_v26 = vld [vmem:[#allocation2 + $0xe9] sm:$0xff]  ;;  %v2831_v33 = vmul.f32 0.007598758, %v658_v16 }
 0x109   : > { %4400 = vst [vmem:[#allocation45_spill] sm:$0xff] %v2720_v43  ;;  %v2755_v18 = vmul.f32 0.007598758, %v666_v26  ;;  %v2769_v26 = vmul.f32 0.036000773, %v756_v62  ;;  %v597_v62 = vld [vmem:[#allocation2 + $0x1a0] sm:$0xff] }
 0x10a   : > { %4401 = vst [vmem:[#allocation46_spill] sm:$0xff] %v2722_v44  ;;  %v2793_v44 = vmul.f32 0.0010283801, %v597_v62  ;;  %v757_v62 = vld [vmem:[#allocation2 + $0x1a2] sm:$0xff]  ;;  %v2841_v24 = vmul.f32 0.007598758, %v659_v34 }
 0x10b   : > { %550 = vst.msk [vmem:[#allocation2 + $0x12d] sm:$0xff] %vm320_vm0, %v437_v20  ;;  %v462_v1 = vpop.f32.mrf.mxu2  ;;  %v738_v34 = vld [vmem:[#allocation2 + $0x6a] sm:$0xff] }
 0x10c   : > { %4402 = vst [vmem:[#allocation47_spill] sm:$0xff] %v2725_v56  ;;  %v487_v20 = vpop.f32.mrf.mxu3  ;;  %v2779_v56 = vmul.f32 0.007598758, %v676_v40  ;;  %v578_v40 = vld [vmem:[#allocation2 + $0x68] sm:$0xff] }
 0x10d   : > { %4403 = vst [vmem:[#allocation48_spill] sm:$0xff] %v2727_v7  ;;  %v2805_v43 = vmul.f32 0.0010283801, %v578_v40  ;;  %v657_v40 = vld [vmem:[#allocation2 + $0x61] sm:$0xff]  ;;  %v832_v11 = vld [vmem:[#allocation2 + $0x14b] sm:$0xff] }
 0x10e   : > { %4404 = vst [vmem:[#allocation49_spill] sm:$0xff] %v2729_v0  ;;  %v916_v0 = vld [vmem:[#allocation2 + $0x18c] sm:$0xff]  ;;  %v2829_v12 = vmul.f32 0.007598758, %v657_v40 }
 0x10f   : > { %4405 = vst [vmem:[#allocation50_spill] sm:$0xff] %v2733_v19  ;;  %v736_v19 = vld [vmem:[#allocation2 + $0x4a] sm:$0xff]  ;;  %v2771_v7 = vmul.f32 0.21300554, %v916_v0  ;;  %v2785_v0 = vmul.f32 0.007598758, %v667_v55 }
 0x110   : > { %4406 = vst [vmem:[#allocation51_spill] sm:$0xff] %v2737_v15  ;;  %v2759_v6 = vmul.f32 0.036000773, %v736_v19 }
 0x111   : > { %4407 = vst [vmem:[#allocation52_spill] sm:$0xff] %v2741_v3  ;;  %v2753_v3 = vmul.f32 0.007598758, %v656_v39  ;;  %v1156_v39 = vld [vmem:[#allocation2 + $0x18e] sm:$0xff] }
 0x112   : > { %560 = vst.msk [vmem:[#allocation2 + $0x1cd] sm:$0xff] %vm320_vm0, %v462_v1  ;;  %v764_v1 = vld [vmem:[#allocation2 + $0x20a] sm:$0xff]  ;;  %v2777_v63 = vmul.f32 0.21300554, %v1156_v39 }
 0x113   : > { %570 = vst.msk [vmem:[#allocation2 + $0x26d] sm:$0xff] %vm320_vm0, %v487_v20  ;;  %v1036_v20 = vld [vmem:[#allocation2 + $0x18d] sm:$0xff]  ;;  %v2767_v15 = vmul.f32 0.036000773, %v764_v1  ;;  %v2781_v1 = vmul.f32 0.0010283801, %v587_v50 }
 0x114   : > { %4408 = vst [vmem:[#allocation53_spill] sm:$0xff] %v2751_v60  ;;  %v2773_v19 = vmul.f32 0.26601171, %v1036_v20  ;;  %v677_v20 = vld [vmem:[#allocation2 + $0x1a1] sm:$0xff]  ;;  %v908_v50 = vld [vmem:[#allocation2 + $0x10c] sm:$0xff] }
 0x115   : > { %4409 = vst [vmem:[#allocation54_spill] sm:$0xff] %v2753_v3  ;;  %v606_v39 = vld [vmem:[#allocation2 + $0x228] sm:$0xff]  ;;  %v2797_v55 = vmul.f32 0.007598758, %v677_v20  ;;  %v2807_v54 = vmul.f32 0.21300554, %v908_v50 }
 0x116   : > { %4410 = vst [vmem:[#allocation55_spill] sm:$0xff] %v2755_v18  ;;  %v2803_v18 = vmul.f32 0.036000773, %v748_v17  ;;  %v2813_v20 = vmul.f32 0.21300554, %v1148_v42  ;;  %v599_v42 = vld [vmem:[#allocation2 + $0x1c0] sm:$0xff] }
 0x117   : > { %4411 = vst [vmem:[#allocation56_spill] sm:$0xff] %v2757_v59  ;;  %v765_v59 = vld [vmem:[#allocation2 + $0x222] sm:$0xff]  ;;  %v2833_v36 = vmul.f32 0.0010283801, %v599_v42 }
 0x118   : > { %4412 = vst [vmem:[#allocation57_spill] sm:$0xff] %v2759_v6  ;;  %v2775_v6 = vmul.f32 0.21300554, %v1155_v23  ;;  %v577_v23 = vld [vmem:[#allocation2 + $0x60] sm:$0xff]  ;;  %v590_v48 = vld [vmem:[#allocation2 + $0x128] sm:$0xff] }
 0x119   : > { %4413 = vst [vmem:[#allocation58_spill] sm:$0xff] %v2761_v31  ;;  %v747_v31 = vld [vmem:[#allocation2 + $0x102] sm:$0xff]  ;;  %v2839_v60 = vmul.f32 0.0010283801, %v590_v48 }
 0x11a   : > { %4414 = vst [vmem:[#allocation59_spill] sm:$0xff] %v2763_v25  ;;  %v1027_v25 = vld [vmem:[#allocation2 + $0x105] sm:$0xff] }
 0x11b   : > { %4415 = vst [vmem:[#allocation60_spill] sm:$0xff] %v2767_v15  ;;  %v2783_v15 = vmul.f32 0.036000773, %v765_v59  ;;  %v2791_v21 = vmul.f32 0.26601171, %v1027_v25  ;;  %v607_v59 = vld [vmem:[#allocation2 + $0x240] sm:$0xff] }
 0x11c   : > { %4416 = vst [vmem:[#allocation61_spill] sm:$0xff] %v2769_v26  ;;  %v2787_v26 = vmul.f32 0.036000773, %v747_v31  ;;  %v668_v31 = vld [vmem:[#allocation2 + $0x109] sm:$0xff]  ;;  %v2815_v3 = vmul.f32 0.0010283801, %v607_v59 }
 0x11d   : > { %4417 = vst [vmem:[#allocation62_spill] sm:$0xff] %v2775_v6  ;;  %v2789_v6 = vmul.f32 0.21300554, %v907_v61  ;;  %v2799_v61 = vmul.f32 0.0010283801, %v606_v39  ;;  %v608_v39 = vld [vmem:[#allocation2 + $0x248] sm:$0xff] }
 0x11e   : > { %4418 = vst [vmem:[#allocation63_spill] sm:$0xff] %v2777_v63  ;;  %v588_v63 = vld [vmem:[#allocation2 + $0x108] sm:$0xff] }
 0x11f   : > { %4419 = vst [vmem:[#allocation64_spill] sm:$0xff] %v2779_v56  ;;  %v2801_v25 = vmul.f32 0.0010283801, %v588_v63  ;;  %v2817_v63 = vmul.f32 0.007598758, %v668_v31  ;;  %v580_v59 = vld [vmem:[#allocation2 + $0x88] sm:$0xff] }
 0x120   : > { %4420 = vst [vmem:[#allocation65_spill] sm:$0xff] %v2783_v15  ;;  %v2795_v15 = vmul.f32 0.0010283801, %v577_v23  ;;  %v579_v23 = vld [vmem:[#allocation2 + $0x80] sm:$0xff]  ;;  %v678_v31 = vld [vmem:[#allocation2 + $0x1a9] sm:$0xff] }
 0x121   : > { %4421 = vst [vmem:[#allocation66_spill] sm:$0xff] %v2787_v26  ;;  %v2819_v17 = vmul.f32 0.0010283801, %v579_v23  ;;  %v2827_v26 = vmul.f32 0.0010283801, %v608_v39  ;;  %v660_v23 = vld [vmem:[#allocation2 + $0x89] sm:$0xff] }
 0x122   : > { %4422 = vst [vmem:[#allocation67_spill] sm:$0xff] %v2793_v44  ;;  %v670_v52 = vld [vmem:[#allocation2 + $0x129] sm:$0xff]  ;;  %v689_v39 = vld [vmem:[#allocation2 + $0x261] sm:$0xff]  ;;  %v2843_v40 = vmul.f32 0.007598758, %v660_v23 }
 0x123   : > { %4423 = vst [vmem:[#allocation68_spill] sm:$0xff] %v2797_v55  ;;  %v589_v55 = vld [vmem:[#allocation2 + $0x120] sm:$0xff]  ;;  %v2847_v32 = vmul.f32 0.007598758, %v670_v52  ;;  %v600_v16 = vld [vmem:[#allocation2 + $0x1c8] sm:$0xff] }
 0x124   : > { %4424 = vst [vmem:[#allocation69_spill] sm:$0xff] %v2799_v61  ;;  %v2823_v50 = vmul.f32 0.0010283801, %v589_v55  ;;  %v687_v55 = vld [vmem:[#allocation2 + $0x241] sm:$0xff]  ;;  %v688_v61 = vld [vmem:[#allocation2 + $0x249] sm:$0xff] }
 0x125   : > { %4425 = vst [vmem:[#allocation70_spill] sm:$0xff] %v2803_v18  ;;  %v2821_v18 = vmul.f32 0.036000773, %v757_v62  ;;  %v679_v62 = vld [vmem:[#allocation2 + $0x1c1] sm:$0xff]  ;;  %v680_v5 = vld [vmem:[#allocation2 + $0x1c9] sm:$0xff] }
 0x126   : > { %4426 = vst [vmem:[#allocation71_spill] sm:$0xff] %v2811_v53  ;;  %v669_v53 = vld [vmem:[#allocation2 + $0x121] sm:$0xff]  ;;  %v2851_v42 = vmul.f32 0.007598758, %v679_v62  ;;  %v2855_v48 = vmul.f32 0.007598758, %v687_v55 }
 0x127   : > { %4427 = vst [vmem:[#allocation72_spill] sm:$0xff] %v2813_v20  ;;  %v609_v20 = vld [vmem:[#allocation2 + $0x260] sm:$0xff]  ;;  %v690_v23 = vld [vmem:[#allocation2 + $0x269] sm:$0xff] }
 0x128   : > { %4428 = vst [vmem:[#allocation73_spill] sm:$0xff] %v2815_v3  ;;  %v2835_v3 = vmul.f32 0.0010283801, %v609_v20  ;;  %v737_v20 = vld [vmem:[#allocation2 + $0x62] sm:$0xff]  ;;  %v750_v62 = vld [vmem:[#allocation2 + $0x12a] sm:$0xff] }
 0x129   : > { %4429 = vst [vmem:[#allocation74_spill] sm:$0xff] %v2817_v63  ;;  %v739_v52 = vld [vmem:[#allocation2 + $0x82] sm:$0xff]  ;;  %v758_v55 = vld [vmem:[#allocation2 + $0x1aa] sm:$0xff] }
 0x12a   : > { %4430 = vst [vmem:[#allocation75_spill] sm:$0xff] %v2821_v18  ;;  %v686_v18 = vld [vmem:[#allocation2 + $0x229] sm:$0xff] }
 0x12b   : > { %4431 = vst [vmem:[#allocation76_spill] sm:$0xff] %v2825_v35  ;;  %v770_v46 = vld [vmem:[#allocation2 + $0x26a] sm:$0xff] }
 0x12c   : > { %4432 = vst [vmem:[#allocation77_spill] sm:$0xff] %v2827_v26  ;;  %v2837_v26 = vmul.f32 0.0010283801, %v580_v59  ;;  %v2853_v59 = vmul.f32 0.007598758, %v686_v18  ;;  %v831_v44 = vld [vmem:[#allocation2 + $0x143] sm:$0xff] }
 0x12d   : > { %4433 = vst [vmem:[#allocation78_spill] sm:$0xff] %v2829_v12  ;;  %v2845_v12 = vmul.f32 0.007598758, %v669_v53  ;;  %v2859_v53 = vmul.f32 0.007598758, %v689_v39  ;;  %v768_v39 = vld [vmem:[#allocation2 + $0x24a] sm:$0xff] }
 0x12e   : > { %4434 = vst [vmem:[#allocation79_spill] sm:$0xff] %v2831_v33  ;;  %v2849_v33 = vmul.f32 0.007598758, %v678_v31  ;;  %v740_v31 = vld [vmem:[#allocation2 + $0x8a] sm:$0xff]  ;;  %v2867_v18 = vmul.f32 0.007598758, %v680_v5 }
 0x12f   : > { %4435 = vst [vmem:[#allocation80_spill] sm:$0xff] %v2833_v36  ;;  %v811_v5 = vld [vmem:[#allocation2 + $0x3] sm:$0xff] }
 0x130   : > { %4436 = vst [vmem:[#allocation81_spill] sm:$0xff] %v2835_v3  ;;  %v610_v3 = vld [vmem:[#allocation2 + $0x268] sm:$0xff] }
 0x131   : > { %4437 = vst [vmem:[#allocation82_spill] sm:$0xff] %v2839_v60 }
 0x132   : > { %4438 = vst [vmem:[#allocation83_spill] sm:$0xff] %v2841_v24  ;;  %v749_v24 = vld [vmem:[#allocation2 + $0x122] sm:$0xff] }
 0x133   : > { %4439 = vst [vmem:[#allocation84_spill] sm:$0xff] %v2843_v40  ;;  %v2857_v40 = vmul.f32 0.007598758, %v688_v61  ;;  %v766_v61 = vld [vmem:[#allocation2 + $0x22a] sm:$0xff] }
 0x134   : > { %4440 = vst [vmem:[#allocation85_spill] sm:$0xff] %v2845_v12  ;;  %v760_v12 = vld [vmem:[#allocation2 + $0x1ca] sm:$0xff]  ;;  %v2887_v35 = vmul.f32 0.036000773, %v766_v61 }
 0x135   : > { %4441 = vst [vmem:[#allocation86_spill] sm:$0xff] %v2847_v32  ;;  %v2861_v32 = vmul.f32 0.0010283801, %v600_v16  ;;  %v2871_v16 = vmul.f32 0.036000773, %v738_v34  ;;  %v824_v61 = vld [vmem:[#allocation2 + $0xcb] sm:$0xff] }
 0x136   : > { %4442 = vst [vmem:[#allocation87_spill] sm:$0xff] %v2849_v33  ;;  %v2865_v33 = vmul.f32 0.0010283801, %v610_v3  ;;  %v2877_v3 = vmul.f32 0.036000773, %v749_v24 }
 0x137   : > { %4443 = vst [vmem:[#allocation88_spill] sm:$0xff] %v2851_v42  ;;  %v2863_v42 = vmul.f32 0.036000773, %v737_v20  ;;  %v2875_v20 = vmul.f32 0.036000773, %v740_v31 }
 0x138   : > { %4444 = vst [vmem:[#allocation89_spill] sm:$0xff] %v2853_v59  ;;  %v2869_v59 = vmul.f32 0.007598758, %v690_v23  ;;  %v2885_v36 = vmul.f32 0.036000773, %v760_v12  ;;  %v822_v12 = vld [vmem:[#allocation2 + $0xab] sm:$0xff] }
 0x139   : > { %4445 = vst [vmem:[#allocation90_spill] sm:$0xff] %v2855_v48  ;;  %v759_v48 = vld [vmem:[#allocation2 + $0x1c2] sm:$0xff]  ;;  %v2891_v31 = vmul.f32 0.036000773, %v768_v39  ;;  %v826_v39 = vld [vmem:[#allocation2 + $0xeb] sm:$0xff] }
 0x13a   : > { %4446 = vst [vmem:[#allocation91_spill] sm:$0xff] %v2857_v40  ;;  %v767_v40 = vld [vmem:[#allocation2 + $0x242] sm:$0xff]  ;;  %v2883_v23 = vmul.f32 0.036000773, %v759_v48  ;;  %v818_v48 = vld [vmem:[#allocation2 + $0x6b] sm:$0xff] }
 0x13b   : > { %4447 = vst [vmem:[#allocation92_spill] sm:$0xff] %v2859_v53  ;;  %v769_v53 = vld [vmem:[#allocation2 + $0x262] sm:$0xff]  ;;  %v2889_v34 = vmul.f32 0.036000773, %v767_v40  ;;  %v2919_v60 = vmul.f32 0.10936069, %v822_v12 }
 0x13c   : > { %4448 = vst [vmem:[#allocation93_spill] sm:$0xff] %v2861_v32  ;;  %v2873_v32 = vmul.f32 0.036000773, %v739_v52  ;;  %v814_v52 = vld [vmem:[#allocation2 + $0x2b] sm:$0xff]  ;;  %v2893_v24 = vmul.f32 0.036000773, %v769_v53 }
 0x13d   : > { %4449 = vst [vmem:[#allocation94_spill] sm:$0xff] %v2863_v42  ;;  %v2879_v42 = vmul.f32 0.036000773, %v750_v62  ;;  %v816_v62 = vld [vmem:[#allocation2 + $0x4b] sm:$0xff]  ;;  %v827_v40 = vld [vmem:[#allocation2 + $0x103] sm:$0xff] }
 0x13e   : > { %4450 = vst [vmem:[#allocation95_spill] sm:$0xff] %v2865_v33  ;;  %v813_v33 = vld [vmem:[#allocation2 + $0x23] sm:$0xff]  ;;  %v2907_v4 = vmul.f32 0.10936069, %v816_v62 }
 0x13f   : > { %4451 = vst [vmem:[#allocation96_spill] sm:$0xff] %v2867_v18  ;;  %v2881_v18 = vmul.f32 0.036000773, %v758_v55  ;;  %v817_v55 = vld [vmem:[#allocation2 + $0x63] sm:$0xff]  ;;  %v2901_v53 = vmul.f32 0.10936069, %v813_v33 }
 0x140   : > { %4452 = vst [vmem:[#allocation97_spill] sm:$0xff] %v2869_v59  ;;  %v812_v59 = vld [vmem:[#allocation2 + $0xb] sm:$0xff] }
 0x141   : > { %4453 = vst [vmem:[#allocation98_spill] sm:$0xff] %v2871_v16  ;;  %v834_v33 = vld [vmem:[#allocation2 + $0x16b] sm:$0xff] }
 0x142   : > { %4454 = vst [vmem:[#allocation99_spill] sm:$0xff] %v2873_v32  ;;  %v2903_v32 = vmul.f32 0.10936069, %v814_v52 }
 0x143   : > { %4455 = vst [vmem:[#allocation100_spill] sm:$0xff] %v2875_v20  ;;  %v820_v20 = vld [vmem:[#allocation2 + $0x8b] sm:$0xff] }
 0x144   : > { %4456 = vst [vmem:[#allocation101_spill] sm:$0xff] %v2877_v3  ;;  %v815_v3 = vld [vmem:[#allocation2 + $0x43] sm:$0xff]  ;;  %v2915_v41 = vmul.f32 0.10936069, %v820_v20  ;;  %v2929_v20 = vmul.f32 0.10936069, %v827_v40 }
 0x145   : > { %4457 = vst [vmem:[#allocation102_spill] sm:$0xff] %v2879_v42  ;;  %v2895_v42 = vmul.f32 0.036000773, %v770_v46  ;;  %v829_v46 = vld [vmem:[#allocation2 + $0x123] sm:$0xff]  ;;  %v2905_v16 = vmul.f32 0.10936069, %v815_v3 }
 0x146   : > { %4458 = vst [vmem:[#allocation103_spill] sm:$0xff] %v2881_v18  ;;  %v821_v18 = vld [vmem:[#allocation2 + $0xa3] sm:$0xff]  ;;  %v2933_v12 = vmul.f32 0.10936069, %v829_v46  ;;  %v2943_v40 = vmul.f32 0.10936069, %v834_v33 }
 0x147   : > { %4459 = vst [vmem:[#allocation104_spill] sm:$0xff] %v2883_v23  ;;  %v819_v23 = vld [vmem:[#allocation2 + $0x83] sm:$0xff]  ;;  %v2917_v52 = vmul.f32 0.10936069, %v821_v18 }
 0x148   : > { %4460 = vst [vmem:[#allocation105_spill] sm:$0xff] %v2885_v36  ;;  %v823_v36 = vld [vmem:[#allocation2 + $0xc3] sm:$0xff] }
 0x149   : > { %4461 = vst [vmem:[#allocation106_spill] sm:$0xff] %v2887_v35  ;;  %v2897_v35 = vmul.f32 0.10936069, %v811_v5  ;;  %v2909_v5 = vmul.f32 0.10936069, %v817_v55  ;;  %v837_v3 = vld [vmem:[#allocation2 + $0x1a3] sm:$0xff] }
 0x14a   : > { %4462 = vst [vmem:[#allocation107_spill] sm:$0xff] %v2889_v34  ;;  %v825_v34 = vld [vmem:[#allocation2 + $0xe3] sm:$0xff]  ;;  %v2921_v62 = vmul.f32 0.10936069, %v823_v36  ;;  %v2923_v55 = vmul.f32 0.10936069, %v824_v61 }
 0x14b   : > { %4463 = vst [vmem:[#allocation108_spill] sm:$0xff] %v2891_v31  ;;  %v2899_v31 = vmul.f32 0.10936069, %v812_v59  ;;  %v835_v59 = vld [vmem:[#allocation2 + $0x183] sm:$0xff]  ;;  %v846_v61 = vld [vmem:[#allocation2 + $0x22b] sm:$0xff] }
 0x14c   : > { %4464 = vst [vmem:[#allocation109_spill] sm:$0xff] %v2893_v24  ;;  %v828_v24 = vld [vmem:[#allocation2 + $0x10b] sm:$0xff]  ;;  %v843_v18 = vld [vmem:[#allocation2 + $0x203] sm:$0xff]  ;;  %v2949_v46 = vmul.f32 0.10936069, %v837_v3 }
 0x14d   : > { %4465 = vst [vmem:[#allocation110_spill] sm:$0xff] %v2895_v42  ;;  %v830_v42 = vld [vmem:[#allocation2 + $0x12b] sm:$0xff]  ;;  %v2961_v33 = vmul.f32 0.10936069, %v843_v18 }
 0x14e   : > { %4466 = vst [vmem:[#allocation111_spill] sm:$0xff] %v2897_v35  ;;  %v2911_v35 = vmul.f32 0.10936069, %v818_v48  ;;  %v840_v48 = vld [vmem:[#allocation2 + $0x1cb] sm:$0xff]  ;;  %v2935_v36 = vmul.f32 0.10936069, %v830_v42 }
 0x14f   : > { %4467 = vst [vmem:[#allocation112_spill] sm:$0xff] %v2899_v31  ;;  %v836_v31 = vld [vmem:[#allocation2 + $0x18b] sm:$0xff] }
 0x150   : > { %4468 = vst [vmem:[#allocation113_spill] sm:$0xff] %v2901_v53  ;;  %v2913_v53 = vmul.f32 0.10936069, %v819_v23  ;;  %v2927_v23 = vmul.f32 0.10936069, %v826_v39  ;;  %v848_v39 = vld [vmem:[#allocation2 + $0x24b] sm:$0xff] }
 0x151   : > { %4469 = vst [vmem:[#allocation114_spill] sm:$0xff] %v2903_v32  ;;  %v839_v32 = vld [vmem:[#allocation2 + $0x1c3] sm:$0xff] }
 0x152   : > { %4470 = vst [vmem:[#allocation115_spill] sm:$0xff] %v2905_v16  ;;  %v838_v16 = vld [vmem:[#allocation2 + $0x1ab] sm:$0xff] }
 0x153   : > { %4471 = vst [vmem:[#allocation116_spill] sm:$0xff] %v2907_v4  ;;  %v2925_v4 = vmul.f32 0.10936069, %v825_v34  ;;  %v2941_v34 = vmul.f32 0.10936069, %v833_v27 }
 0x154   : > { %4472 = vst [vmem:[#allocation117_spill] sm:$0xff] %v2909_v5  ;;  %v842_v5 = vld [vmem:[#allocation2 + $0x1eb] sm:$0xff]  ;;  %v2951_v42 = vmul.f32 0.10936069, %v838_v16 }
 0x155   : > { %4473 = vst [vmem:[#allocation118_spill] sm:$0xff] %v2911_v35  ;;  %v841_v35 = vld [vmem:[#allocation2 + $0x1e3] sm:$0xff]  ;;  %v2959_v27 = vmul.f32 0.10936069, %v842_v5  ;;  %v892_v16 = vld [vmem:[#allocation2 + $0xc] sm:$0xff] }
 0x156   : > { %4474 = vst [vmem:[#allocation119_spill] sm:$0xff] %v2913_v53  ;;  %v2931_v53 = vmul.f32 0.10936069, %v828_v24  ;;  %v849_v24 = vld [vmem:[#allocation2 + $0x263] sm:$0xff]  ;;  %v896_v5 = vld [vmem:[#allocation2 + $0x4c] sm:$0xff] }
 0x157   : > { %4475 = vst [vmem:[#allocation120_spill] sm:$0xff] %v2915_v41  ;;  %v845_v41 = vld [vmem:[#allocation2 + $0x223] sm:$0xff] }
 0x158   : > { %4476 = vst [vmem:[#allocation121_spill] sm:$0xff] %v2917_v52  ;;  %v844_v52 = vld [vmem:[#allocation2 + $0x20b] sm:$0xff] }
 0x159   : > { %4477 = vst [vmem:[#allocation122_spill] sm:$0xff] %v2919_v60  ;;  %v2939_v60 = vmul.f32 0.10936069, %v832_v11  ;;  %v2957_v11 = vmul.f32 0.10936069, %v841_v35  ;;  %v850_v35 = vld [vmem:[#allocation2 + $0x26b] sm:$0xff] }
 0x15a   : > { %4478 = vst [vmem:[#allocation123_spill] sm:$0xff] %v2921_v62  ;;  %v2937_v62 = vmul.f32 0.10936069, %v831_v44  ;;  %v891_v44 = vld [vmem:[#allocation2 + $0x4] sm:$0xff] }
 0x15b   : > { %4479 = vst [vmem:[#allocation124_spill] sm:$0xff] %v2923_v55  ;;  %v847_v55 = vld [vmem:[#allocation2 + $0x243] sm:$0xff]  ;;  %v931_v18 = vmul.f32 0.21300554, %v891_v44  ;;  %v2983_v44 = vadd.f32 %v2807_v54, %v2801_v25  ;;  %v906_v54 = vld [vmem:[#allocation2 + $0xec] sm:$0xff] }
 0x15c   : > { %4480 = vst [vmem:[#allocation125_spill] sm:$0xff] %v2927_v23  ;;  %v2947_v23 = vmul.f32 0.10936069, %v836_v31  ;;  %v2965_v31 = vmul.f32 0.10936069, %v845_v41  ;;  %v910_v25 = vld [vmem:[#allocation2 + $0x12c] sm:$0xff] }
 0x15d   : > { %4481 = vst [vmem:[#allocation126_spill] sm:$0xff] %v2929_v20  ;;  %v2945_v20 = vmul.f32 0.10936069, %v835_v59  ;;  %v2963_v59 = vmul.f32 0.10936069, %v844_v52  ;;  %v898_v52 = vld [vmem:[#allocation2 + $0x6c] sm:$0xff] }
 0x15e   : > { %4482 = vst [vmem:[#allocation127_spill] sm:$0xff] %v2935_v36  ;;  %v2953_v36 = vmul.f32 0.10936069, %v839_v32  ;;  %v2969_v3 = vmul.f32 0.10936069, %v847_v55 }
 0x15f   : > { %4483 = vst [vmem:[#allocation128_spill] sm:$0xff] %v2937_v62  ;;  %v2955_v62 = vmul.f32 0.10936069, %v840_v48  ;;  %v2971_v32 = vmul.f32 0.10936069, %v848_v39  ;;  %v894_v48 = vld [vmem:[#allocation2 + $0x2c] sm:$0xff] }
 0x160   : > { %4484 = vst [vmem:[#allocation129_spill] sm:$0xff] %v2947_v23  ;;  %v2967_v23 = vmul.f32 0.10936069, %v846_v61  ;;  %v932_v41 = vmul.f32 0.21300554, %v892_v16  ;;  %v903_v16 = vld [vmem:[#allocation2 + $0xc4] sm:$0xff] }
 0x161   : > { %4485 = vst [vmem:[#allocation130_spill] sm:$0xff] %v2951_v42  ;;  %v934_v61 = vmul.f32 0.21300554, %v894_v48  ;;  %v2975_v55 = vmul.f32 0.10936069, %v850_v35  ;;  %v904_v48 = vld [vmem:[#allocation2 + $0xcc] sm:$0xff] }
 0x162   : > { %4486 = vst [vmem:[#allocation131_spill] sm:$0xff] %v2953_v36  ;;  %v893_v36 = vld [vmem:[#allocation2 + $0x24] sm:$0xff]  ;;  %v936_v39 = vmul.f32 0.21300554, %v896_v5  ;;  %v938_v42 = vmul.f32 0.21300554, %v898_v52 }
 0x163   : > { %4487 = vst [vmem:[#allocation132_spill] sm:$0xff] %v2955_v62  ;;  %v895_v62 = vld [vmem:[#allocation2 + $0x44] sm:$0xff] }
 0x164   : > { %4488 = vst [vmem:[#allocation133_spill] sm:$0xff] %v2957_v11  ;;  %v2973_v11 = vmul.f32 0.10936069, %v849_v24  ;;  %v902_v24 = vld [vmem:[#allocation2 + $0xac] sm:$0xff]  ;;  %v905_v35 = vld [vmem:[#allocation2 + $0xe4] sm:$0xff] }
 0x165   : > { %4489 = vst [vmem:[#allocation134_spill] sm:$0xff] %v2959_v27  ;;  %v901_v27 = vld [vmem:[#allocation2 + $0xa4] sm:$0xff] }
 0x166   : > { %4490 = vst [vmem:[#allocation135_spill] sm:$0xff] %v2961_v33  ;;  %v897_v33 = vld [vmem:[#allocation2 + $0x64] sm:$0xff] }
 0x167   : > { %4491 = vst [vmem:[#allocation136_spill] sm:$0xff] %v2963_v59  ;;  %v899_v59 = vld [vmem:[#allocation2 + $0x84] sm:$0xff] }
 0x168   : > { %4492 = vst [vmem:[#allocation137_spill] sm:$0xff] %v2965_v31  ;;  %v933_v31 = vmul.f32 0.21300554, %v893_v36  ;;  %v2987_v36 = vadd.f32 %v2739_v2, %v2731_v10  ;;  %v939_v5 = vmul.f32 0.21300554, %v899_v59  ;;  %v911_v52 = vld [vmem:[#allocation2 + $0x144] sm:$0xff] }
 0x169   : > { %4493 = vst [vmem:[#allocation138_spill] sm:$0xff] %v2967_v23  ;;  %v935_v23 = vmul.f32 0.21300554, %v895_v62  ;;  %v909_v62 = vld [vmem:[#allocation2 + $0x124] sm:$0xff] }
 0x16a   : > { %4494 = vst [vmem:[#allocation139_spill] sm:$0xff] %v2969_v3  ;;  %v900_v3 = vld [vmem:[#allocation2 + $0x8c] sm:$0xff]  ;;  %v3000_v10 = vadd.f32 %v933_v31, %v2658_v8  ;;  %v917_v59 = vld [vmem:[#allocation2 + $0x1a4] sm:$0xff]  ;;  %v3017_v8 = vadd.f32 %v2809_v13, %v2817_v63  ;;  %v944_v13 = vmul.f32 0.21300554, %v904_v48 }
 0x16b   : > { %4495 = vst [vmem:[#allocation140_spill] sm:$0xff] %v2971_v32  ;;  %v2979_v32 = vadd.f32 %v2789_v6, %v2781_v1  ;;  %v2990_v6 = vadd.f32 %v931_v18, %v2616_v28  ;;  %v2993_v1 = vadd.f32 %v932_v41, %v2633_v45  ;;  %v940_v2 = vmul.f32 0.21300554, %v900_v3  ;;  %v912_v45 = vld [vmem:[#allocation2 + $0x14c] sm:$0xff]  ;;  %v913_v18 = vld [vmem:[#allocation2 + $0x164] sm:$0xff] }
 0x16c   : > { %4496 = vst [vmem:[#allocation141_spill] sm:$0xff] %v2973_v11  ;;  %v937_v11 = vmul.f32 0.21300554, %v897_v33  ;;  %v2997_v33 = vadd.f32 %v2771_v7, %v2765_v58  ;;  %v3006_v28 = vadd.f32 %v935_v23, %v2710_v22  ;;  %v914_v41 = vld [vmem:[#allocation2 + $0x16c] sm:$0xff]  ;;  %v3009_v58 = vadd.f32 %v936_v39, %v2747_v49  ;;  %v919_v31 = vld [vmem:[#allocation2 + $0x1c4] sm:$0xff] }
 0x16d   : > { %4497 = vst [vmem:[#allocation142_spill] sm:$0xff] %v2979_v32  ;;  %v3013_v7 = vadd.f32 %v2791_v21, %v2785_v0  ;;  %v920_v22 = vld [vmem:[#allocation2 + $0x1cc] sm:$0xff]  ;;  %v942_v23 = vmul.f32 0.21300554, %v902_v24  ;;  %v3027_v49 = vadd.f32 %v2743_v37, %v2735_v14  ;;  %v921_v21 = vld [vmem:[#allocation2 + $0x1e4] sm:$0xff]  ;;  %v3034_v24 = vadd.f32 %v2773_v19, %v2779_v56 }
 0x16e   : > { %4498 = vst [vmem:[#allocation143_spill] sm:$0xff] %v2983_v44  ;;  %v941_v44 = vmul.f32 0.21300554, %v901_v27  ;;  %v3020_v3 = vadd.f32 %v937_v11, %v2795_v15  ;;  %v3023_v27 = vadd.f32 %v938_v42, %v2805_v43  ;;  %v922_v0 = vld [vmem:[#allocation2 + $0x1ec] sm:$0xff]  ;;  %v943_v39 = vmul.f32 0.21300554, %v903_v16 }
 0x16f   : > { %4499 = vst [vmem:[#allocation144_spill] sm:$0xff] %v2987_v36  ;;  %v3003_v36 = vadd.f32 %v934_v61, %v2685_v38  ;;  %v918_v38 = vld [vmem:[#allocation2 + $0x1ac] sm:$0xff]  ;;  %v923_v61 = vld [vmem:[#allocation2 + $0x204] sm:$0xff]  ;;  %v945_v42 = vmul.f32 0.21300554, %v905_v35  ;;  %v3037_v14 = vadd.f32 %v940_v2, %v2837_v26  ;;  %v3043_v35 = vadd.f32 %v942_v23, %v2637_v51 }
 0x170   : > { %4500 = vst [vmem:[#allocation145_spill] sm:$0xff] %v2997_v33  ;;  %v924_v15 = vld [vmem:[#allocation2 + $0x20c] sm:$0xff]  ;;  %v925_v11 = vld [vmem:[#allocation2 + $0x224] sm:$0xff]  ;;  %v949_v63 = vmul.f32 0.21300554, %v909_v62  ;;  %v3046_v2 = vadd.f32 %v943_v39, %v2660_v9 }
 0x171   : > { %4501 = vst [vmem:[#allocation146_spill] sm:$0xff] %v3009_v58  ;;  %v926_v43 = vld [vmem:[#allocation2 + $0x22c] sm:$0xff]  ;;  %v927_v37 = vld [vmem:[#allocation2 + $0x244] sm:$0xff]  ;;  %v950_v48 = vmul.f32 0.21300554, %v910_v25 }
 0x172   : > { %4502 = vst [vmem:[#allocation147_spill] sm:$0xff] %v3013_v7  ;;  %v946_v7 = vmul.f32 0.21300554, %v906_v54  ;;  %v929_v16 = vld [vmem:[#allocation2 + $0x264] sm:$0xff]  ;;  %v951_v33 = vmul.f32 0.21300554, %v911_v52 }
 0x173   : > { %4503 = vst [vmem:[#allocation148_spill] sm:$0xff] %v3017_v8  ;;  %v3030_v8 = vadd.f32 %v939_v5, %v2819_v17  ;;  %v952_v17 = vmul.f32 0.21300554, %v912_v45  ;;  %v3040_v5 = vadd.f32 %v941_v44, %v2618_v29  ;;  %v930_v19 = vld [vmem:[#allocation2 + $0x26c] sm:$0xff]  ;;  %v954_v56 = vmul.f32 0.21300554, %v914_v41 }
 0x174   : > { %4504 = vst [vmem:[#allocation149_spill] sm:$0xff] %v3020_v3  ;;  %v957_v32 = vmul.f32 0.21300554, %v917_v59  ;;  %v958_v62 = vmul.f32 0.21300554, %v918_v38  ;;  %v3049_v45 = vadd.f32 %v944_v13, %v2688_v47  ;;  %v3052_v59 = vadd.f32 %v945_v42, %v2715_v30  ;;  %v4517_v23 = vld [vmem:[#allocation82_spill] sm:$0xff] }
 0x175   : > { %4505 = vst [vmem:[#allocation150_spill] sm:$0xff] %v3023_v27  ;;  %v959_v54 = vmul.f32 0.21300554, %v919_v31  ;;  %v960_v26 = vmul.f32 0.21300554, %v920_v22  ;;  %v3055_v31 = vadd.f32 %v946_v7, %v2749_v57  ;;  %v3058_v22 = vadd.f32 %v949_v63, %v2823_v50  ;;  %v4519_v47 = vld [vmem:[#allocation13_spill] sm:$0xff] }
 0x176   : > { %4506 = vst [vmem:[#allocation151_spill] sm:$0xff] %v3027_v49  ;;  %v928_v49 = vld [vmem:[#allocation2 + $0x24c] sm:$0xff]  ;;  %v962_v25 = vmul.f32 0.21300554, %v922_v0  ;;  %v963_v52 = vmul.f32 0.21300554, %v923_v61  ;;  %v3064_v0 = vadd.f32 %v951_v33, %v4519_v47 }
 0x177   : > { %4507 = vst [vmem:[#allocation152_spill] sm:$0xff] %v3030_v8  ;;  %v964_v29 = vmul.f32 0.21300554, %v924_v15  ;;  %v965_v44 = vmul.f32 0.21300554, %v925_v11  ;;  %v1011_v61 = vld [vmem:[#allocation2 + $0x5] sm:$0xff] }
 0x178   : > { %4508 = vst [vmem:[#allocation153_spill] sm:$0xff] %v3034_v24  ;;  %v953_v24 = vmul.f32 0.21300554, %v913_v18  ;;  %v966_v18 = vmul.f32 0.21300554, %v926_v43  ;;  %v1012_v39 = vld [vmem:[#allocation2 + $0xd] sm:$0xff] }
 0x179   : > { %4509 = vst [vmem:[#allocation154_spill] sm:$0xff] %v3037_v14  ;;  %v961_v14 = vmul.f32 0.21300554, %v921_v21  ;;  %v967_v51 = vmul.f32 0.21300554, %v927_v37  ;;  %v3061_v21 = vadd.f32 %v950_v48, %v4517_v23  ;;  %v1013_v30 = vld [vmem:[#allocation2 + $0x25] sm:$0xff] }
 0x17a   : > { %4510 = vst [vmem:[#allocation155_spill] sm:$0xff] %v3040_v5  ;;  %v968_v41 = vmul.f32 0.21300554, %v928_v49  ;;  %v969_v38 = vmul.f32 0.21300554, %v929_v16  ;;  %v4521_v13 = vld [vmem:[#allocation22_spill] sm:$0xff] }
 0x17b   : > { %4511 = vst [vmem:[#allocation156_spill] sm:$0xff] %v3043_v35  ;;  %v970_v9 = vmul.f32 0.21300554, %v930_v19  ;;  %v3067_v15 = vadd.f32 %v952_v17, %v4521_v13  ;;  %v4523_v49 = vld [vmem:[#allocation30_spill] sm:$0xff]  ;;  %v4525_v57 = vld [vmem:[#allocation41_spill] sm:$0xff]  ;;  %v4527_v63 = vld [vmem:[#allocation67_spill] sm:$0xff] }
 0x17c   : > { %4512 = vst [vmem:[#allocation157_spill] sm:$0xff] %v3046_v2  ;;  %v3070_v11 = vadd.f32 %v953_v24, %v4523_v49  ;;  %v3073_v7 = vadd.f32 %v954_v56, %v4525_v57  ;;  %v3076_v50 = vadd.f32 %v957_v32, %v4527_v63  ;;  %v1014_v43 = vld [vmem:[#allocation2 + $0x2d] sm:$0xff]  ;;  %v1015_v42 = vld [vmem:[#allocation2 + $0x45] sm:$0xff]  ;;  %v4529_v37 = vld [vmem:[#allocation76_spill] sm:$0xff]  ;;  %v1051_v32 = vmul.f32 0.26601171, %v1011_v61 }
 0x17d   : > { %4513 = vst [vmem:[#allocation158_spill] sm:$0xff] %v3049_v45  ;;  %v3079_v33 = vadd.f32 %v958_v62, %v4529_v37  ;;  %v4531_v16 = vld [vmem:[#allocation80_spill] sm:$0xff]  ;;  %v4533_v19 = vld [vmem:[#allocation93_spill] sm:$0xff]  ;;  %v4535_v23 = vld [vmem:[#allocation15_spill] sm:$0xff]  ;;  %v1052_v57 = vmul.f32 0.26601171, %v1012_v39 }
 0x17e   : > { %4514 = vst [vmem:[#allocation159_spill] sm:$0xff] %v3052_v59  ;;  %v3082_v48 = vadd.f32 %v959_v54, %v4531_v16  ;;  %v3085_v17 = vadd.f32 %v960_v26, %v4533_v19  ;;  %v3088_v24 = vadd.f32 %v961_v14, %v4535_v23  ;;  %v1016_v47 = vld [vmem:[#allocation2 + $0x4d] sm:$0xff]  ;;  %v1017_v56 = vld [vmem:[#allocation2 + $0x65] sm:$0xff]  ;;  %v1053_v63 = vmul.f32 0.26601171, %v1013_v30  ;;  %v4578_v35 = vld [vmem:[#allocation84_spill] sm:$0xff] }
 0x17f   : > { %4515 = vst [vmem:[#allocation160_spill] sm:$0xff] %v3055_v31  ;;  %v4537_v13 = vld [vmem:[#allocation23_spill] sm:$0xff]  ;;  %v1019_v26 = vld [vmem:[#allocation2 + $0x85] sm:$0xff]  ;;  %v1054_v19 = vmul.f32 0.26601171, %v1014_v43 }
 0x180   : > { %4516 = vst [vmem:[#allocation161_spill] sm:$0xff] %v3058_v22  ;;  %v3091_v49 = vadd.f32 %v962_v25, %v4537_v13  ;;  %v4541_v37 = vld [vmem:[#allocation43_spill] sm:$0xff]  ;;  %v4543_v14 = vld [vmem:[#allocation53_spill] sm:$0xff] }
 0x181   : > { %4518 = vst [vmem:[#allocation82_spill] sm:$0xff] %v3061_v21  ;;  %v3097_v54 = vadd.f32 %v964_v29, %v4541_v37  ;;  %v1018_v16 = vld [vmem:[#allocation2 + $0x6d] sm:$0xff]  ;;  %v3100_v23 = vadd.f32 %v965_v44, %v4543_v14  ;;  %v4547_v25 = vld [vmem:[#allocation73_spill] sm:$0xff] }
 0x182   : > { %4520 = vst [vmem:[#allocation13_spill] sm:$0xff] %v3064_v0  ;;  %v3106_v61 = vadd.f32 %v967_v51, %v4547_v25  ;;  %v1020_v39 = vld [vmem:[#allocation2 + $0x8d] sm:$0xff]  ;;  %v1021_v30 = vld [vmem:[#allocation2 + $0xa5] sm:$0xff] }
 0x183   : > { %4522 = vst [vmem:[#allocation22_spill] sm:$0xff] %v3067_v15  ;;  %v1029_v13 = vld [vmem:[#allocation2 + $0x125] sm:$0xff]  ;;  %v1026_v51 = vld [vmem:[#allocation2 + $0xed] sm:$0xff] }
 0x184   : > { %4524 = vst [vmem:[#allocation30_spill] sm:$0xff] %v3070_v11  ;;  %v4549_v29 = vld [vmem:[#allocation77_spill] sm:$0xff]  ;;  %v1030_v25 = vld [vmem:[#allocation2 + $0x12d] sm:$0xff]  ;;  %v1066_v31 = vmul.f32 0.26601171, %v1026_v51 }
 0x185   : > { %4526 = vst [vmem:[#allocation41_spill] sm:$0xff] %v3073_v7  ;;  %v3109_v37 = vadd.f32 %v968_v41, %v4549_v29  ;;  %v1023_v14 = vld [vmem:[#allocation2 + $0xc5] sm:$0xff]  ;;  %v4558_v29 = vld [vmem:[#allocation24_spill] sm:$0xff]  ;;  %v1040_v11 = vld [vmem:[#allocation2 + $0x1cd] sm:$0xff]  ;;  %v1070_v59 = vmul.f32 0.26601171, %v1030_v25 }
 0x186   : > { %4528 = vst [vmem:[#allocation67_spill] sm:$0xff] %v3076_v50  ;;  %v4539_v50 = vld [vmem:[#allocation32_spill] sm:$0xff]  ;;  %v4569_v0 = vld [vmem:[#allocation70_spill] sm:$0xff]  ;;  %v4730_v27 = vld [vmem:[#allocation121_spill] sm:$0xff] }
 0x187   : > { %4530 = vst [vmem:[#allocation76_spill] sm:$0xff] %v3079_v33  ;;  %v3094_v62 = vadd.f32 %v963_v52, %v4539_v50  ;;  %v1022_v52 = vld [vmem:[#allocation2 + $0xad] sm:$0xff]  ;;  %v1056_v50 = vmul.f32 0.26601171, %v1016_v47  ;;  %v4562_v33 = vld [vmem:[#allocation44_spill] sm:$0xff]  ;;  %v1045_v22 = vld [vmem:[#allocation2 + $0x225] sm:$0xff] }
 0x188   : > { %4532 = vst [vmem:[#allocation80_spill] sm:$0xff] %v3082_v48 }
 0x189   : > { %4534 = vst [vmem:[#allocation93_spill] sm:$0xff] %v3085_v17  ;;  %v1055_v17 = vmul.f32 0.26601171, %v1015_v42  ;;  %v4553_v42 = vld [vmem:[#allocation95_spill] sm:$0xff] }
 0x18a   : > { %4536 = vst [vmem:[#allocation15_spill] sm:$0xff] %v3088_v24  ;;  %v4545_v24 = vld [vmem:[#allocation69_spill] sm:$0xff]  ;;  %v3115_v44 = vadd.f32 %v970_v9, %v4553_v42  ;;  %v1032_v9 = vld [vmem:[#allocation2 + $0x14d] sm:$0xff] }
 0x18b   : > { %4538 = vst [vmem:[#allocation23_spill] sm:$0xff] %v3091_v49  ;;  %v3103_v48 = vadd.f32 %v966_v18, %v4545_v24  ;;  %v1024_v18 = vld [vmem:[#allocation2 + $0xcd] sm:$0xff]  ;;  %v1025_v24 = vld [vmem:[#allocation2 + $0xe5] sm:$0xff]  ;;  %v4556_v49 = vld [vmem:[#allocation16_spill] sm:$0xff]  ;;  %v3130_v7 = vadd.f32 %v1055_v17, %v4562_v33  ;;  %v1062_v17 = vmul.f32 0.26601171, %v1022_v52 }
 0x18c   : > { %4540 = vst [vmem:[#allocation32_spill] sm:$0xff] %v3094_v62  ;;  %v4555_v62 = vld [vmem:[#allocation10_spill] sm:$0xff]  ;;  %v3121_v41 = vadd.f32 %v1052_v57, %v4556_v49  ;;  %v1072_v52 = vmul.f32 0.26601171, %v1032_v9  ;;  %v4582_v9 = vld [vmem:[#allocation17_spill] sm:$0xff] }
 0x18d   : > { %4542 = vst [vmem:[#allocation43_spill] sm:$0xff] %v3097_v54  ;;  %v4551_v54 = vld [vmem:[#allocation81_spill] sm:$0xff]  ;;  %v3118_v47 = vadd.f32 %v1051_v32, %v4555_v62  ;;  %v4565_v32 = vld [vmem:[#allocation71_spill] sm:$0xff]  ;;  %v3159_v8 = vadd.f32 %v1062_v17, %v4582_v9 }
 0x18e   : > { %4544 = vst [vmem:[#allocation53_spill] sm:$0xff] %v3100_v23  ;;  %v3112_v43 = vadd.f32 %v969_v38, %v4551_v54  ;;  %v1058_v23 = vmul.f32 0.26601171, %v1018_v16  ;;  %v3124_v38 = vadd.f32 %v1053_v63, %v4558_v29  ;;  %v1037_v54 = vld [vmem:[#allocation2 + $0x1a5] sm:$0xff]  ;;  %v1038_v57 = vld [vmem:[#allocation2 + $0x1ad] sm:$0xff] }
 0x18f   : > { %4546 = vst [vmem:[#allocation69_spill] sm:$0xff] %v3103_v48  ;;  %v1057_v48 = vmul.f32 0.26601171, %v1017_v56  ;;  %v1033_v42 = vld [vmem:[#allocation2 + $0x165] sm:$0xff]  ;;  %v1060_v63 = vmul.f32 0.26601171, %v1020_v39 }
 0x190   : > { %4548 = vst [vmem:[#allocation73_spill] sm:$0xff] %v3106_v61  ;;  %v1031_v61 = vld [vmem:[#allocation2 + $0x145] sm:$0xff]  ;;  %v1061_v29 = vmul.f32 0.26601171, %v1021_v30  ;;  %v1046_v39 = vld [vmem:[#allocation2 + $0x22d] sm:$0xff] }
 0x191   : > { %4550 = vst [vmem:[#allocation77_spill] sm:$0xff] %v3109_v37  ;;  %v4560_v37 = vld [vmem:[#allocation34_spill] sm:$0xff]  ;;  %v1065_v30 = vmul.f32 0.26601171, %v1025_v24  ;;  %v1071_v45 = vmul.f32 0.26601171, %v1031_v61  ;;  %v3153_v24 = vadd.f32 %v1060_v63, %v4578_v35 }
 0x192   : > { %4552 = vst [vmem:[#allocation81_spill] sm:$0xff] %v3112_v43  ;;  %v1059_v43 = vmul.f32 0.26601171, %v1019_v26  ;;  %v3127_v56 = vadd.f32 %v1054_v19, %v4560_v37  ;;  %v4564_v16 = vld [vmem:[#allocation66_spill] sm:$0xff]  ;;  %v4570_v26 = vld [vmem:[#allocation72_spill] sm:$0xff]  ;;  %v4592_v17 = vld [vmem:[#allocation85_spill] sm:$0xff] }
 0x193   : > { %4554 = vst [vmem:[#allocation95_spill] sm:$0xff] %v3115_v44  ;;  %v1034_v44 = vld [vmem:[#allocation2 + $0x16d] sm:$0xff]  ;;  %v3134_v62 = vadd.f32 %v4565_v32, %v4564_v16  ;;  %v3141_v21 = vadd.f32 %v4570_v26, %v4569_v0  ;;  %v1041_v19 = vld [vmem:[#allocation2 + $0x1e5] sm:$0xff]  ;;  %v1064_v37 = vmul.f32 0.26601171, %v1024_v18 }
 0x194   : > { %4557 = vst [vmem:[#allocation10_spill] sm:$0xff] %v3121_v41  ;;  %v1039_v41 = vld [vmem:[#allocation2 + $0x1c5] sm:$0xff]  ;;  %v1048_v26 = vld [vmem:[#allocation2 + $0x24d] sm:$0xff]  ;;  %v1077_v2 = vmul.f32 0.26601171, %v1037_v54 }
 0x195   : > { %4559 = vst [vmem:[#allocation16_spill] sm:$0xff] %v3124_v38  ;;  %v4567_v38 = vld [vmem:[#allocation54_spill] sm:$0xff]  ;;  %v1079_v51 = vmul.f32 0.26601171, %v1039_v41  ;;  %v1081_v5 = vmul.f32 0.26601171, %v1041_v19 }
 0x196   : > { %4561 = vst [vmem:[#allocation24_spill] sm:$0xff] %v3127_v56  ;;  %v3137_v15 = vadd.f32 %v1056_v50, %v4567_v38  ;;  %v1042_v56 = vld [vmem:[#allocation2 + $0x1ed] sm:$0xff]  ;;  %v1043_v33 = vld [vmem:[#allocation2 + $0x205] sm:$0xff]  ;;  %v1069_v50 = vmul.f32 0.26601171, %v1029_v13 }
 0x197   : > { %4563 = vst [vmem:[#allocation44_spill] sm:$0xff] %v3130_v7  ;;  %v1063_v7 = vmul.f32 0.26601171, %v1023_v14  ;;  %v4572_v16 = vld [vmem:[#allocation78_spill] sm:$0xff]  ;;  %v4576_v14 = vld [vmem:[#allocation83_spill] sm:$0xff] }
 0x198   : > { %4566 = vst [vmem:[#allocation66_spill] sm:$0xff] %v3134_v62  ;;  %v3144_v32 = vadd.f32 %v1057_v48, %v4572_v16  ;;  %v1044_v62 = vld [vmem:[#allocation2 + $0x20d] sm:$0xff]  ;;  %v1047_v0 = vld [vmem:[#allocation2 + $0x245] sm:$0xff]  ;;  %v3150_v18 = vadd.f32 %v1059_v43, %v4576_v14  ;;  %v1073_v16 = vmul.f32 0.26601171, %v1033_v42 }
 0x199   : > { %4568 = vst [vmem:[#allocation71_spill] sm:$0xff] %v3137_v15  ;;  %v4574_v15 = vld [vmem:[#allocation79_spill] sm:$0xff]  ;;  %v1078_v13 = vmul.f32 0.26601171, %v1038_v57  ;;  %v1082_v25 = vmul.f32 0.26601171, %v1042_v56 }
 0x19a   : > { %4571 = vst [vmem:[#allocation70_spill] sm:$0xff] %v3141_v21  ;;  %v3147_v38 = vadd.f32 %v1058_v23, %v4574_v15  ;;  %v1049_v21 = vld [vmem:[#allocation2 + $0x265] sm:$0xff]  ;;  %v1050_v48 = vld [vmem:[#allocation2 + $0x26d] sm:$0xff]  ;;  %v1080_v23 = vmul.f32 0.26601171, %v1040_v11 }
 0x19b   : > { %4573 = vst [vmem:[#allocation72_spill] sm:$0xff] %v3144_v32  ;;  %v1074_v32 = vmul.f32 0.26601171, %v1034_v44  ;;  %v1083_v61 = vmul.f32 0.26601171, %v1043_v33  ;;  %v4584_v44 = vld [vmem:[#allocation25_spill] sm:$0xff] }
 0x19c   : > { %4575 = vst [vmem:[#allocation78_spill] sm:$0xff] %v3147_v38  ;;  %v4580_v38 = vld [vmem:[#allocation11_spill] sm:$0xff]  ;;  %v1084_v43 = vmul.f32 0.26601171, %v1044_v62  ;;  %v1085_v14 = vmul.f32 0.26601171, %v1045_v22  ;;  %v3162_v54 = vadd.f32 %v1063_v7, %v4584_v44  ;;  %v3174_v62 = vadd.f32 %v1069_v50, %v4592_v17 }
 0x19d   : > { %4577 = vst [vmem:[#allocation83_spill] sm:$0xff] %v3150_v18  ;;  %v3156_v15 = vadd.f32 %v1061_v29, %v4580_v38  ;;  %v1086_v42 = vmul.f32 0.26601171, %v1046_v39  ;;  %v1087_v63 = vmul.f32 0.26601171, %v1047_v0  ;;  %v4586_v41 = vld [vmem:[#allocation35_spill] sm:$0xff] }
 0x19e   : > { %4579 = vst [vmem:[#allocation162_spill] sm:$0xff] %v3153_v24  ;;  %v1088_v24 = vmul.f32 0.26601171, %v1048_v26  ;;  %v1089_v57 = vmul.f32 0.26601171, %v1049_v21  ;;  %v3165_v11 = vadd.f32 %v1064_v37, %v4586_v41  ;;  %v4588_v29 = vld [vmem:[#allocation45_spill] sm:$0xff] }
 0x19f   : > { %4581 = vst [vmem:[#allocation11_spill] sm:$0xff] %v3156_v15  ;;  %v1090_v38 = vmul.f32 0.26601171, %v1050_v48  ;;  %v3168_v19 = vadd.f32 %v1065_v30, %v4588_v29  ;;  %v4590_v56 = vld [vmem:[#allocation55_spill] sm:$0xff]  ;;  %v4594_v22 = vld [vmem:[#allocation86_spill] sm:$0xff]  ;;  %v4600_v37 = vld [vmem:[#allocation33_spill] sm:$0xff] }
 0x1a0   : > { %4583 = vst [vmem:[#allocation163_spill] sm:$0xff] %v3159_v8  ;;  %v3171_v33 = vadd.f32 %v1066_v31, %v4590_v56  ;;  %v3177_v39 = vadd.f32 %v1070_v59, %v4594_v22  ;;  %v4596_v7 = vld [vmem:[#allocation14_spill] sm:$0xff]  ;;  %v3186_v48 = vadd.f32 %v1073_v16, %v4600_v37  ;;  %v4604_v50 = vld [vmem:[#allocation68_spill] sm:$0xff]  ;;  %v4606_v59 = vld [vmem:[#allocation87_spill] sm:$0xff] }
 0x1a1   : > { %4585 = vst [vmem:[#allocation25_spill] sm:$0xff] %v3162_v54  ;;  %v3180_v0 = vadd.f32 %v1071_v45, %v4596_v7  ;;  %v4598_v21 = vld [vmem:[#allocation26_spill] sm:$0xff]  ;;  %v3192_v17 = vadd.f32 %v1077_v2, %v4604_v50  ;;  %v4608_v45 = vld [vmem:[#allocation88_spill] sm:$0xff]  ;;  %v4612_v37 = vld [vmem:[#allocation27_spill] sm:$0xff] }
 0x1a2   : > { %4587 = vst [vmem:[#allocation164_spill] sm:$0xff] %v3165_v11  ;;  %v3183_v26 = vadd.f32 %v1072_v52, %v4598_v21  ;;  %v1131_v30 = vld [vmem:[#allocation2 + $0x6] sm:$0xff]  ;;  %v1132_v44 = vld [vmem:[#allocation2 + $0xe] sm:$0xff]  ;;  %v3198_v7 = vadd.f32 %v1079_v51, %v4608_v45  ;;  %v4614_v21 = vld [vmem:[#allocation28_spill] sm:$0xff] }
 0x1a3   : > { %4589 = vst [vmem:[#allocation45_spill] sm:$0xff] %v3168_v19  ;;  %v1133_v29 = vld [vmem:[#allocation2 + $0x26] sm:$0xff]  ;;  %v1134_v52 = vld [vmem:[#allocation2 + $0x2e] sm:$0xff] }
 0x1a4   : > { %4591 = vst [vmem:[#allocation165_spill] sm:$0xff] %v3171_v33  ;;  %v4602_v31 = vld [vmem:[#allocation46_spill] sm:$0xff]  ;;  %v4658_v35 = vld [vmem:[#allocation19_spill] sm:$0xff] }
 0x1a5   : > { %4593 = vst [vmem:[#allocation85_spill] sm:$0xff] %v3174_v62  ;;  %v3189_v33 = vadd.f32 %v1074_v32, %v4602_v31  ;;  %v3207_v32 = vadd.f32 %v1082_v25, %v4614_v21  ;;  %v1136_v50 = vld [vmem:[#allocation2 + $0x4e] sm:$0xff]  ;;  %v1139_v45 = vld [vmem:[#allocation2 + $0x86] sm:$0xff]  ;;  %v4638_v62 = vld [vmem:[#allocation12_spill] sm:$0xff] }
 0x1a6   : > { %4595 = vst [vmem:[#allocation166_spill] sm:$0xff] %v3177_v39  ;;  %v3195_v39 = vadd.f32 %v1078_v13, %v4606_v59  ;;  %v1137_v13 = vld [vmem:[#allocation2 + $0x66] sm:$0xff]  ;;  %v1171_v59 = vmul.f32 0.21300554, %v1131_v30 }
 0x1a7   : > { %4597 = vst [vmem:[#allocation14_spill] sm:$0xff] %v3180_v0  ;;  %v4610_v0 = vld [vmem:[#allocation96_spill] sm:$0xff]  ;;  %v1177_v31 = vmul.f32 0.21300554, %v1137_v13  ;;  %v1157_v19 = vld [vmem:[#allocation2 + $0x1a6] sm:$0xff] }
 0x1a8   : > { %4599 = vst [vmem:[#allocation167_spill] sm:$0xff] %v3183_v26  ;;  %v1135_v26 = vld [vmem:[#allocation2 + $0x46] sm:$0xff]  ;;  %v3201_v16 = vadd.f32 %v1080_v23, %v4610_v0  ;;  %v1172_v23 = vmul.f32 0.21300554, %v1132_v44  ;;  %v4620_v0 = vld [vmem:[#allocation56_spill] sm:$0xff]  ;;  %v3242_v22 = vadd.f32 %v1171_v59, %v4638_v62  ;;  %v1162_v59 = vld [vmem:[#allocation2 + $0x1ee] sm:$0xff] }
 0x1a9   : > { %4601 = vst [vmem:[#allocation33_spill] sm:$0xff] %v3186_v48  ;;  %v3204_v48 = vadd.f32 %v1081_v5, %v4612_v37  ;;  %v3216_v5 = vadd.f32 %v1085_v14, %v4620_v0  ;;  %v4622_v37 = vld [vmem:[#allocation89_spill] sm:$0xff]  ;;  %v1176_v0 = vmul.f32 0.21300554, %v1136_v50 }
 0x1aa   : > { %4603 = vst [vmem:[#allocation168_spill] sm:$0xff] %v3189_v33  ;;  %v4616_v33 = vld [vmem:[#allocation47_spill] sm:$0xff]  ;;  %v3219_v25 = vadd.f32 %v1086_v42, %v4622_v37  ;;  %v1143_v44 = vld [vmem:[#allocation2 + $0xc6] sm:$0xff] }
 0x1ab   : > { %4605 = vst [vmem:[#allocation68_spill] sm:$0xff] %v3192_v17  ;;  %v3210_v2 = vadd.f32 %v1083_v61, %v4616_v33  ;;  %v4618_v17 = vld [vmem:[#allocation48_spill] sm:$0xff]  ;;  %v1142_v61 = vld [vmem:[#allocation2 + $0xae] sm:$0xff]  ;;  %v1174_v33 = vmul.f32 0.21300554, %v1134_v52  ;;  %v1145_v14 = vld [vmem:[#allocation2 + $0xe6] sm:$0xff] }
 0x1ac   : > { %4607 = vst [vmem:[#allocation169_spill] sm:$0xff] %v3195_v39  ;;  %v1138_v39 = vld [vmem:[#allocation2 + $0x6e] sm:$0xff]  ;;  %v3213_v51 = vadd.f32 %v1084_v43, %v4618_v17  ;;  %v4628_v17 = vld [vmem:[#allocation92_spill] sm:$0xff]  ;;  %v4630_v42 = vld [vmem:[#allocation97_spill] sm:$0xff] }
 0x1ad   : > { %4609 = vst [vmem:[#allocation88_spill] sm:$0xff] %v3198_v7  ;;  %v1140_v7 = vld [vmem:[#allocation2 + $0x8e] sm:$0xff]  ;;  %v3228_v30 = vadd.f32 %v1089_v57, %v4628_v17  ;;  %v1178_v50 = vmul.f32 0.21300554, %v1138_v39  ;;  %v1161_v62 = vld [vmem:[#allocation2 + $0x1e6] sm:$0xff] }
 0x1ae   : > { %4611 = vst [vmem:[#allocation170_spill] sm:$0xff] %v3201_v16  ;;  %v1173_v16 = vmul.f32 0.21300554, %v1133_v29  ;;  %v4626_v43 = vld [vmem:[#allocation91_spill] sm:$0xff]  ;;  %v1180_v56 = vmul.f32 0.21300554, %v1140_v7 }
 0x1af   : > { %4613 = vst [vmem:[#allocation27_spill] sm:$0xff] %v3204_v48  ;;  %v4624_v48 = vld [vmem:[#allocation90_spill] sm:$0xff]  ;;  %v1185_v7 = vmul.f32 0.21300554, %v1145_v14 }
 0x1b0   : > { %4615 = vst [vmem:[#allocation171_spill] sm:$0xff] %v3207_v32  ;;  %v1141_v32 = vld [vmem:[#allocation2 + $0xa6] sm:$0xff]  ;;  %v3222_v21 = vadd.f32 %v1087_v63, %v4624_v48  ;;  %v1144_v29 = vld [vmem:[#allocation2 + $0xce] sm:$0xff] }
 0x1b1   : > { %4617 = vst [vmem:[#allocation47_spill] sm:$0xff] %v3210_v2  ;;  %v1175_v2 = vmul.f32 0.21300554, %v1135_v26  ;;  %v1146_v37 = vld [vmem:[#allocation2 + $0xee] sm:$0xff]  ;;  %v1151_v26 = vld [vmem:[#allocation2 + $0x146] sm:$0xff] }
 0x1b2   : > { %4619 = vst [vmem:[#allocation172_spill] sm:$0xff] %v3213_v51  ;;  %v3225_v51 = vadd.f32 %v1088_v24, %v4626_v43  ;;  %v1150_v52 = vld [vmem:[#allocation2 + $0x12e] sm:$0xff]  ;;  %v4635_v24 = vld [vmem:[#allocation61_spill] sm:$0xff]  ;;  %v1186_v41 = vmul.f32 0.21300554, %v1146_v37 }
 0x1b3   : > { %4621 = vst [vmem:[#allocation56_spill] sm:$0xff] %v3216_v5  ;;  %v1149_v5 = vld [vmem:[#allocation2 + $0x126] sm:$0xff]  ;;  %v4632_v63 = vld [vmem:[#allocation51_spill] sm:$0xff]  ;;  %v1190_v8 = vmul.f32 0.21300554, %v1150_v52 }
 0x1b4   : > { %4623 = vst [vmem:[#allocation173_spill] sm:$0xff] %v3219_v25  ;;  %v3231_v25 = vadd.f32 %v1090_v38, %v4630_v42  ;;  %v4633_v48 = vld [vmem:[#allocation62_spill] sm:$0xff]  ;;  %v4642_v42 = vld [vmem:[#allocation29_spill] sm:$0xff]  ;;  %v1197_v37 = vmul.f32 0.21300554, %v1157_v19 }
 0x1b5   : > { %4625 = vst [vmem:[#allocation90_spill] sm:$0xff] %v3222_v21  ;;  %v3235_v21 = vadd.f32 %v4633_v48, %v4632_v63  ;;  %v1152_v17 = vld [vmem:[#allocation2 + $0x14e] sm:$0xff]  ;;  %v3248_v13 = vadd.f32 %v1173_v16, %v4642_v42  ;;  %v1159_v48 = vld [vmem:[#allocation2 + $0x1c6] sm:$0xff]  ;;  %v1201_v52 = vmul.f32 0.21300554, %v1161_v62 }
 0x1b6   : > { %4627 = vst [vmem:[#allocation174_spill] sm:$0xff] %v3225_v51  ;;  %v4636_v51 = vld [vmem:[#allocation63_spill] sm:$0xff]  ;;  %v4640_v38 = vld [vmem:[#allocation18_spill] sm:$0xff] }
 0x1b7   : > { %4629 = vst [vmem:[#allocation92_spill] sm:$0xff] %v3228_v30  ;;  %v3239_v57 = vadd.f32 %v4636_v51, %v4635_v24  ;;  %v1153_v30 = vld [vmem:[#allocation2 + $0x166] sm:$0xff]  ;;  %v1154_v43 = vld [vmem:[#allocation2 + $0x16e] sm:$0xff] }
 0x1b8   : > { %4631 = vst [vmem:[#allocation175_spill] sm:$0xff] %v3231_v25  ;;  %v3245_v25 = vadd.f32 %v1172_v23, %v4640_v38  ;;  %v1158_v63 = vld [vmem:[#allocation2 + $0x1ae] sm:$0xff]  ;;  %v4644_v51 = vld [vmem:[#allocation37_spill] sm:$0xff]  ;;  %v1182_v23 = vmul.f32 0.21300554, %v1142_v61 }
 0x1b9   : > { %4634 = vst [vmem:[#allocation51_spill] sm:$0xff] %v3235_v21  ;;  %v1179_v21 = vmul.f32 0.21300554, %v1139_v45  ;;  %v3251_v24 = vadd.f32 %v1174_v33, %v4644_v51  ;;  %v1160_v39 = vld [vmem:[#allocation2 + $0x1ce] sm:$0xff]  ;;  %v1183_v38 = vmul.f32 0.21300554, %v1143_v44 }
 0x1ba   : > { %4637 = vst [vmem:[#allocation62_spill] sm:$0xff] %v3239_v57  ;;  %v4646_v57 = vld [vmem:[#allocation49_spill] sm:$0xff]  ;;  %v1184_v45 = vmul.f32 0.21300554, %v1144_v29  ;;  %v4650_v33 = vld [vmem:[#allocation94_spill] sm:$0xff]  ;;  %v4654_v29 = vld [vmem:[#allocation99_spill] sm:$0xff] }
 0x1bb   : > { %4639 = vst [vmem:[#allocation61_spill] sm:$0xff] %v3242_v22  ;;  %v3254_v11 = vadd.f32 %v1175_v2, %v4646_v57  ;;  %v1181_v22 = vmul.f32 0.21300554, %v1141_v32  ;;  %v1163_v42 = vld [vmem:[#allocation2 + $0x206] sm:$0xff]  ;;  %v3260_v51 = vadd.f32 %v1177_v31, %v4650_v33  ;;  %v1166_v2 = vld [vmem:[#allocation2 + $0x22e] sm:$0xff]  ;;  %v3266_v14 = vadd.f32 %v1179_v21, %v4654_v29 }
 0x1bc   : > { %4641 = vst [vmem:[#allocation63_spill] sm:$0xff] %v3245_v25  ;;  %v4648_v25 = vld [vmem:[#allocation57_spill] sm:$0xff]  ;;  %v1191_v32 = vmul.f32 0.21300554, %v1151_v26  ;;  %v4652_v61 = vld [vmem:[#allocation98_spill] sm:$0xff] }
 0x1bd   : > { %4643 = vst [vmem:[#allocation12_spill] sm:$0xff] %v3248_v13  ;;  %v3257_v16 = vadd.f32 %v1176_v0, %v4648_v25  ;;  %v1164_v13 = vld [vmem:[#allocation2 + $0x20e] sm:$0xff]  ;;  %v1165_v54 = vld [vmem:[#allocation2 + $0x226] sm:$0xff]  ;;  %v3263_v44 = vadd.f32 %v1178_v50, %v4652_v61  ;;  %v1193_v15 = vmul.f32 0.21300554, %v1153_v30  ;;  %v3272_v50 = vadd.f32 %v1181_v22, %v4658_v35  ;;  %v4660_v30 = vld [vmem:[#allocation20_spill] sm:$0xff] }
 0x1be   : > { %4645 = vst [vmem:[#allocation18_spill] sm:$0xff] %v3251_v24  ;;  %v1167_v57 = vld [vmem:[#allocation2 + $0x246] sm:$0xff]  ;;  %v1189_v24 = vmul.f32 0.21300554, %v1149_v5  ;;  %v1170_v0 = vld [vmem:[#allocation2 + $0x26e] sm:$0xff] }
 0x1bf   : > { %4647 = vst [vmem:[#allocation29_spill] sm:$0xff] %v3254_v11  ;;  %v1168_v11 = vld [vmem:[#allocation2 + $0x24e] sm:$0xff]  ;;  %v1169_v25 = vld [vmem:[#allocation2 + $0x266] sm:$0xff]  ;;  %v1194_v9 = vmul.f32 0.21300554, %v1154_v43  ;;  %v3275_v43 = vadd.f32 %v1182_v23, %v4660_v30 }
 0x1c0   : > { %4649 = vst [vmem:[#allocation37_spill] sm:$0xff] %v3257_v16  ;;  %v1192_v16 = vmul.f32 0.21300554, %v1152_v17  ;;  %v1198_v31 = vmul.f32 0.21300554, %v1158_v63  ;;  %v4662_v63 = vld [vmem:[#allocation36_spill] sm:$0xff] }
 0x1c1   : > { %4651 = vst [vmem:[#allocation49_spill] sm:$0xff] %v3260_v51  ;;  %v1199_v33 = vmul.f32 0.21300554, %v1159_v48  ;;  %v4656_v51 = vld [vmem:[#allocation100_spill] sm:$0xff]  ;;  %v1200_v5 = vmul.f32 0.21300554, %v1160_v39  ;;  %v3278_v48 = vadd.f32 %v1183_v38, %v4662_v63 }
 0x1c2   : > { %4653 = vst [vmem:[#allocation57_spill] sm:$0xff] %v3263_v44  ;;  %v3269_v18 = vadd.f32 %v1180_v56, %v4656_v51  ;;  %v1202_v26 = vmul.f32 0.21300554, %v1162_v59  ;;  %v1203_v61 = vmul.f32 0.21300554, %v1163_v42  ;;  %v4664_v39 = vld [vmem:[#allocation38_spill] sm:$0xff] }
 0x1c3   : > { %4655 = vst [vmem:[#allocation94_spill] sm:$0xff] %v3266_v14  ;;  %v1204_v44 = vmul.f32 0.21300554, %v1164_v13  ;;  %v1205_v17 = vmul.f32 0.21300554, %v1165_v54  ;;  %v3281_v62 = vadd.f32 %v1184_v45, %v4664_v39  ;;  %v4666_v59 = vld [vmem:[#allocation52_spill] sm:$0xff] }
 0x1c4   : > { %4657 = vst [vmem:[#allocation98_spill] sm:$0xff] %v3269_v18  ;;  %v1206_v21 = vmul.f32 0.21300554, %v1166_v2  ;;  %v1207_v29 = vmul.f32 0.21300554, %v1167_v57  ;;  %v3284_v35 = vadd.f32 %v1185_v7, %v4666_v59  ;;  %v4668_v22 = vld [vmem:[#allocation58_spill] sm:$0xff] }
 0x1c5   : > { %4659 = vst [vmem:[#allocation99_spill] sm:$0xff] %v3272_v50  ;;  %v1208_v19 = vmul.f32 0.21300554, %v1168_v11  ;;  %v1209_v56 = vmul.f32 0.21300554, %v1169_v25  ;;  %v3287_v13 = vadd.f32 %v1186_v41, %v4668_v22  ;;  %v4670_v54 = vld [vmem:[#allocation101_spill] sm:$0xff] }
 0x1c6   : > { %4661 = vst [vmem:[#allocation100_spill] sm:$0xff] %v3275_v43  ;;  %v1210_v51 = vmul.f32 0.21300554, %v1170_v0  ;;  %v3290_v23 = vadd.f32 %v1189_v24, %v4670_v54  ;;  %v4672_v42 = vld [vmem:[#allocation102_spill] sm:$0xff]  ;;  %v4674_v11 = vld [vmem:[#allocation21_spill] sm:$0xff]  ;;  %v4676_v45 = vld [vmem:[#allocation31_spill] sm:$0xff] }
 0x1c7   : > { %4663 = vst [vmem:[#allocation19_spill] sm:$0xff] %v3278_v48  ;;  %v3293_v2 = vadd.f32 %v1190_v8, %v4672_v42  ;;  %v3296_v38 = vadd.f32 %v1191_v32, %v4674_v11  ;;  %v1251_v57 = vld [vmem:[#allocation2 + $0x7] sm:$0xff]  ;;  %v1252_v25 = vld [vmem:[#allocation2 + $0xf] sm:$0xff]  ;;  %v3299_v30 = vadd.f32 %v1192_v16, %v4676_v45  ;;  %v4686_v42 = vld [vmem:[#allocation104_spill] sm:$0xff] }
 0x1c8   : > { %4665 = vst [vmem:[#allocation20_spill] sm:$0xff] %v3281_v62  ;;  %v1253_v0 = vld [vmem:[#allocation2 + $0x27] sm:$0xff]  ;;  %v4678_v7 = vld [vmem:[#allocation39_spill] sm:$0xff]  ;;  %v3314_v11 = vadd.f32 %v1199_v33, %v4686_v42  ;;  %v4690_v45 = vld [vmem:[#allocation40_spill] sm:$0xff] }
 0x1c9   : > { %4667 = vst [vmem:[#allocation36_spill] sm:$0xff] %v3284_v35  ;;  %v3302_v63 = vadd.f32 %v1193_v15, %v4678_v7  ;;  %v4680_v41 = vld [vmem:[#allocation50_spill] sm:$0xff]  ;;  %v4682_v24 = vld [vmem:[#allocation75_spill] sm:$0xff]  ;;  %v3320_v15 = vadd.f32 %v1201_v52, %v4690_v45  ;;  %v4696_v33 = vld [vmem:[#allocation60_spill] sm:$0xff] }
 0x1ca   : > { %4669 = vst [vmem:[#allocation38_spill] sm:$0xff] %v3287_v13  ;;  %v3305_v39 = vadd.f32 %v1194_v9, %v4680_v41  ;;  %v3308_v59 = vadd.f32 %v1197_v37, %v4682_v24  ;;  %v1254_v8 = vld [vmem:[#allocation2 + $0x2f] sm:$0xff]  ;;  %v1255_v22 = vld [vmem:[#allocation2 + $0x47] sm:$0xff]  ;;  %v3329_v42 = vadd.f32 %v1204_v44, %v4696_v33  ;;  %v4704_v33 = vld [vmem:[#allocation108_spill] sm:$0xff] }
 0x1cb   : > { %4671 = vst [vmem:[#allocation52_spill] sm:$0xff] %v3290_v23  ;;  %v4684_v54 = vld [vmem:[#allocation103_spill] sm:$0xff]  ;;  %v1257_v9 = vld [vmem:[#allocation2 + $0x67] sm:$0xff]  ;;  %v1294_v52 = vmul.f32 0.10936069, %v1254_v8 }
 0x1cc   : > { %4673 = vst [vmem:[#allocation58_spill] sm:$0xff] %v3293_v2  ;;  %v3311_v32 = vadd.f32 %v1198_v31, %v4684_v54  ;;  %v1256_v7 = vld [vmem:[#allocation2 + $0x4f] sm:$0xff]  ;;  %v1259_v24 = vld [vmem:[#allocation2 + $0x87] sm:$0xff]  ;;  %v1293_v31 = vmul.f32 0.10936069, %v1253_v0  ;;  %v4712_v2 = vld [vmem:[#allocation112_spill] sm:$0xff] }
 0x1cd   : > { %4675 = vst [vmem:[#allocation101_spill] sm:$0xff] %v3296_v38  ;;  %v4688_v38 = vld [vmem:[#allocation105_spill] sm:$0xff]  ;;  %v1258_v41 = vld [vmem:[#allocation2 + $0x6f] sm:$0xff]  ;;  %v1295_v45 = vmul.f32 0.10936069, %v1255_v22 }
 0x1ce   : > { %4677 = vst [vmem:[#allocation102_spill] sm:$0xff] %v3299_v30  ;;  %v3317_v16 = vadd.f32 %v1200_v5, %v4688_v38  ;;  %v4694_v54 = vld [vmem:[#allocation59_spill] sm:$0xff]  ;;  %v1261_v38 = vld [vmem:[#allocation2 + $0xa7] sm:$0xff] }
 0x1cf   : > { %4679 = vst [vmem:[#allocation21_spill] sm:$0xff] %v3302_v63  ;;  %v1292_v63 = vmul.f32 0.10936069, %v1252_v25  ;;  %v1260_v5 = vld [vmem:[#allocation2 + $0x8f] sm:$0xff]  ;;  %v1263_v0 = vld [vmem:[#allocation2 + $0xc7] sm:$0xff] }
 0x1d0   : > { %4681 = vst [vmem:[#allocation31_spill] sm:$0xff] %v3305_v39  ;;  %v4692_v39 = vld [vmem:[#allocation42_spill] sm:$0xff]  ;;  %v4706_v8 = vld [vmem:[#allocation109_spill] sm:$0xff]  ;;  %v4718_v23 = vld [vmem:[#allocation115_spill] sm:$0xff] }
 0x1d1   : > { %4683 = vst [vmem:[#allocation39_spill] sm:$0xff] %v3308_v59  ;;  %v3323_v37 = vadd.f32 %v1202_v26, %v4692_v39  ;;  %v1291_v59 = vmul.f32 0.10936069, %v1251_v57  ;;  %v4702_v39 = vld [vmem:[#allocation107_spill] sm:$0xff]  ;;  %v3344_v22 = vadd.f32 %v1209_v56, %v4706_v8  ;;  %v1275_v8 = vld [vmem:[#allocation2 + $0x187] sm:$0xff]  ;;  %v3362_v13 = vadd.f32 %v1295_v45, %v4718_v23 }
 0x1d2   : > { %4685 = vst [vmem:[#allocation50_spill] sm:$0xff] %v3311_v32  ;;  %v3326_v32 = vadd.f32 %v1203_v61, %v4694_v54  ;;  %v3338_v57 = vadd.f32 %v1207_v29, %v4702_v39  ;;  %v1262_v25 = vld [vmem:[#allocation2 + $0xaf] sm:$0xff]  ;;  %v1296_v54 = vmul.f32 0.10936069, %v1256_v7  ;;  %v1297_v29 = vmul.f32 0.10936069, %v1257_v9 }
 0x1d3   : > { %4687 = vst [vmem:[#allocation75_spill] sm:$0xff] %v3314_v11  ;;  %v4700_v11 = vld [vmem:[#allocation106_spill] sm:$0xff]  ;;  %v4710_v7 = vld [vmem:[#allocation111_spill] sm:$0xff] }
 0x1d4   : > { %4689 = vst [vmem:[#allocation103_spill] sm:$0xff] %v3317_v16  ;;  %v3335_v26 = vadd.f32 %v1206_v21, %v4700_v11  ;;  %v1264_v61 = vld [vmem:[#allocation2 + $0xcf] sm:$0xff]  ;;  %v1265_v21 = vld [vmem:[#allocation2 + $0xe7] sm:$0xff]  ;;  %v3350_v30 = vadd.f32 %v1291_v59, %v4710_v7 }
 0x1d5   : > { %4691 = vst [vmem:[#allocation104_spill] sm:$0xff] %v3320_v15  ;;  %v4698_v15 = vld [vmem:[#allocation65_spill] sm:$0xff]  ;;  %v1268_v44 = vld [vmem:[#allocation2 + $0x10f] sm:$0xff] }
 0x1d6   : > { %4693 = vst [vmem:[#allocation105_spill] sm:$0xff] %v3323_v37  ;;  %v3332_v16 = vadd.f32 %v1205_v17, %v4698_v15  ;;  %v4708_v17 = vld [vmem:[#allocation110_spill] sm:$0xff]  ;;  %v1298_v37 = vmul.f32 0.10936069, %v1258_v41  ;;  %v1308_v48 = vmul.f32 0.10936069, %v1268_v44 }
 0x1d7   : > { %4695 = vst [vmem:[#allocation40_spill] sm:$0xff] %v3326_v32  ;;  %v1267_v32 = vld [vmem:[#allocation2 + $0x107] sm:$0xff]  ;;  %v3347_v15 = vadd.f32 %v1210_v51, %v4708_v17  ;;  %v1266_v11 = vld [vmem:[#allocation2 + $0xef] sm:$0xff]  ;;  %v4728_v44 = vld [vmem:[#allocation120_spill] sm:$0xff] }
 0x1d8   : > { %4697 = vst [vmem:[#allocation42_spill] sm:$0xff] %v3329_v42  ;;  %v3341_v42 = vadd.f32 %v1208_v19, %v4704_v33  ;;  %v1270_v39 = vld [vmem:[#allocation2 + $0x12f] sm:$0xff]  ;;  %v3353_v19 = vadd.f32 %v1292_v63, %v4712_v2  ;;  %v4714_v33 = vld [vmem:[#allocation113_spill] sm:$0xff]  ;;  %v1302_v2 = vmul.f32 0.10936069, %v1262_v25 }
 0x1d9   : > { %4699 = vst [vmem:[#allocation59_spill] sm:$0xff] %v3332_v16  ;;  %v1272_v16 = vld [vmem:[#allocation2 + $0x14f] sm:$0xff]  ;;  %v3356_v56 = vadd.f32 %v1293_v31, %v4714_v33  ;;  %v1273_v51 = vld [vmem:[#allocation2 + $0x167] sm:$0xff]  ;;  %v1303_v63 = vmul.f32 0.10936069, %v1263_v0 }
 0x1da   : > { %4701 = vst [vmem:[#allocation60_spill] sm:$0xff] %v3335_v26  ;;  %v1269_v26 = vld [vmem:[#allocation2 + $0x127] sm:$0xff]  ;;  %v1274_v17 = vld [vmem:[#allocation2 + $0x16f] sm:$0xff]  ;;  %v1306_v62 = vmul.f32 0.10936069, %v1266_v11 }
 0x1db   : > { %4703 = vst [vmem:[#allocation65_spill] sm:$0xff] %v3338_v57  ;;  %v1271_v57 = vld [vmem:[#allocation2 + $0x147] sm:$0xff]  ;;  %v1276_v41 = vld [vmem:[#allocation2 + $0x18f] sm:$0xff]  ;;  %v1310_v43 = vmul.f32 0.10936069, %v1270_v39 }
 0x1dc   : > { %4705 = vst [vmem:[#allocation106_spill] sm:$0xff] %v3341_v42  ;;  %v4716_v42 = vld [vmem:[#allocation114_spill] sm:$0xff]  ;;  %v1311_v50 = vmul.f32 0.10936069, %v1271_v57  ;;  %v1313_v18 = vmul.f32 0.10936069, %v1273_v51 }
 0x1dd   : > { %4707 = vst [vmem:[#allocation107_spill] sm:$0xff] %v3344_v22  ;;  %v1300_v22 = vmul.f32 0.10936069, %v1260_v5  ;;  %v3359_v9 = vadd.f32 %v1294_v52, %v4716_v42  ;;  %v1277_v59 = vld [vmem:[#allocation2 + $0x1a7] sm:$0xff]  ;;  %v1278_v7 = vld [vmem:[#allocation2 + $0x1af] sm:$0xff] }
 0x1de   : > { %4709 = vst [vmem:[#allocation108_spill] sm:$0xff] %v3347_v15  ;;  %v1299_v15 = vmul.f32 0.10936069, %v1259_v24  ;;  %v1279_v33 = vld [vmem:[#allocation2 + $0x1c7] sm:$0xff]  ;;  %v1304_v24 = vmul.f32 0.10936069, %v1264_v61 }
 0x1df   : > { %4711 = vst [vmem:[#allocation109_spill] sm:$0xff] %v3350_v30  ;;  %v1301_v30 = vmul.f32 0.10936069, %v1261_v38  ;;  %v1281_v35 = vld [vmem:[#allocation2 + $0x1e7] sm:$0xff]  ;;  %v1305_v5 = vmul.f32 0.10936069, %v1265_v21 }
 0x1e0   : > { %4713 = vst [vmem:[#allocation110_spill] sm:$0xff] %v3353_v19  ;;  %v4720_v19 = vld [vmem:[#allocation116_spill] sm:$0xff]  ;;  %v4722_v42 = vld [vmem:[#allocation117_spill] sm:$0xff]  ;;  %v1282_v23 = vld [vmem:[#allocation2 + $0x1ef] sm:$0xff]  ;;  %v1309_v38 = vmul.f32 0.10936069, %v1269_v26  ;;  %v3377_v26 = vadd.f32 %v1300_v22, %v4728_v44 }
 0x1e1   : > { %4715 = vst [vmem:[#allocation111_spill] sm:$0xff] %v3356_v56  ;;  %v3365_v31 = vadd.f32 %v1296_v54, %v4720_v19  ;;  %v1280_v56 = vld [vmem:[#allocation2 + $0x1cf] sm:$0xff]  ;;  %v3368_v52 = vadd.f32 %v1297_v29, %v4722_v42  ;;  %v1283_v45 = vld [vmem:[#allocation2 + $0x207] sm:$0xff]  ;;  %v1312_v61 = vmul.f32 0.10936069, %v1272_v16  ;;  %v3380_v3 = vadd.f32 %v1301_v30, %v4730_v27 }
 0x1e2   : > { %4717 = vst [vmem:[#allocation112_spill] sm:$0xff] %v3359_v9  ;;  %v1307_v9 = vmul.f32 0.10936069, %v1267_v32  ;;  %v4724_v25 = vld [vmem:[#allocation118_spill] sm:$0xff]  ;;  %v4726_v21 = vld [vmem:[#allocation119_spill] sm:$0xff] }
 0x1e3   : > { %4719 = vst [vmem:[#allocation113_spill] sm:$0xff] %v3362_v13  ;;  %v1284_v13 = vld [vmem:[#allocation2 + $0x20f] sm:$0xff]  ;;  %v3371_v0 = vadd.f32 %v1298_v37, %v4724_v25  ;;  %v1285_v54 = vld [vmem:[#allocation2 + $0x227] sm:$0xff]  ;;  %v3374_v11 = vadd.f32 %v1299_v15, %v4726_v21  ;;  %v1314_v14 = vmul.f32 0.10936069, %v1274_v17 }
 0x1e4   : > { %4721 = vst [vmem:[#allocation114_spill] sm:$0xff] %v3365_v31  ;;  %v1286_v19 = vld [vmem:[#allocation2 + $0x22f] sm:$0xff]  ;;  %v1287_v31 = vld [vmem:[#allocation2 + $0x247] sm:$0xff]  ;;  %v1315_v32 = vmul.f32 0.10936069, %v1275_v8 }
 0x1e5   : > { %4723 = vst [vmem:[#allocation115_spill] sm:$0xff] %v3368_v52  ;;  %v1288_v29 = vld [vmem:[#allocation2 + $0x24f] sm:$0xff]  ;;  %v1289_v42 = vld [vmem:[#allocation2 + $0x267] sm:$0xff]  ;;  %v1316_v37 = vmul.f32 0.10936069, %v1276_v41 }
 0x1e6   : > { %4725 = vst [vmem:[#allocation116_spill] sm:$0xff] %v3371_v0  ;;  %v1290_v52 = vld [vmem:[#allocation2 + $0x26f] sm:$0xff]  ;;  %v1317_v25 = vmul.f32 0.10936069, %v1277_v59  ;;  %v1318_v0 = vmul.f32 0.10936069, %v1278_v7 }
 0x1e7   : > { %4727 = vst [vmem:[#allocation117_spill] sm:$0xff] %v3374_v11  ;;  %v1319_v57 = vmul.f32 0.10936069, %v1279_v33  ;;  %v1320_v16 = vmul.f32 0.10936069, %v1280_v56  ;;  %v4732_v15 = vld [vmem:[#allocation122_spill] sm:$0xff] }
 0x1e8   : > { %4729 = vst [vmem:[#allocation118_spill] sm:$0xff] %v3377_v26  ;;  %v1321_v39 = vmul.f32 0.10936069, %v1281_v35  ;;  %v3383_v21 = vadd.f32 %v1302_v2, %v4732_v15  ;;  %v1322_v11 = vmul.f32 0.10936069, %v1282_v23  ;;  %v4734_v17 = vld [vmem:[#allocation123_spill] sm:$0xff]  ;;  %v3392_v35 = vadd.f32 %v1305_v5, %v2925_v4 }
 0x1e9   : > { %4731 = vst [vmem:[#allocation119_spill] sm:$0xff] %v3380_v3  ;;  %v1323_v58 = vmul.f32 0.10936069, %v1283_v45  ;;  %v1324_v51 = vmul.f32 0.10936069, %v1284_v13  ;;  %v3386_v8 = vadd.f32 %v1303_v63, %v4734_v17  ;;  %v4736_v59 = vld [vmem:[#allocation124_spill] sm:$0xff]  ;;  %v3401_v63 = vadd.f32 %v1308_v48, %v2931_v53 }
 0x1ea   : > { %4733 = vst [vmem:[#allocation120_spill] sm:$0xff] %v3383_v21  ;;  %v1325_v22 = vmul.f32 0.10936069, %v1285_v54  ;;  %v1326_v44 = vmul.f32 0.10936069, %v1286_v19  ;;  %v3389_v7 = vadd.f32 %v1304_v24, %v4736_v59  ;;  %v4739_v56 = vld [vmem:[#allocation125_spill] sm:$0xff]  ;;  %v3413_v4 = vadd.f32 %v1312_v61, %v2939_v60 }
 0x1eb   : > { %4735 = vst [vmem:[#allocation121_spill] sm:$0xff] %v3386_v8  ;;  %v1327_v41 = vmul.f32 0.10936069, %v1287_v31  ;;  %v1328_v27 = vmul.f32 0.10936069, %v1288_v29  ;;  %v3395_v2 = vadd.f32 %v1306_v62, %v4739_v56  ;;  %v4741_v23 = vld [vmem:[#allocation126_spill] sm:$0xff]  ;;  %v3404_v31 = vadd.f32 %v1309_v38, %v2933_v12 }
 0x1ec   : > { %4737 = vst [vmem:[#allocation122_spill] sm:$0xff] %v3389_v7  ;;  %v1329_v30 = vmul.f32 0.10936069, %v1289_v42  ;;  %v1330_v33 = vmul.f32 0.10936069, %v1290_v52  ;;  %v3398_v13 = vadd.f32 %v1307_v9, %v4741_v23  ;;  %v4745_v24 = vld [vmem:[#allocation127_spill] sm:$0xff]  ;;  %v3416_v62 = vadd.f32 %v1313_v18, %v2941_v34 }
 0x1ed   : > { %4738 = vst [vmem:[#allocation123_spill] sm:$0xff] %v3392_v35  ;;  %v3407_v45 = vadd.f32 %v1310_v43, %v4745_v24  ;;  %v4747_v54 = vld [vmem:[#allocation128_spill] sm:$0xff]  ;;  %v3419_v9 = vadd.f32 %v1314_v14, %v2943_v40  ;;  %v3422_v53 = vadd.f32 %v1315_v32, %v2945_v20  ;;  %v4753_v12 = vld [vmem:[#allocation129_spill] sm:$0xff]  ;;  %v3428_v43 = vadd.f32 %v1317_v25, %v2949_v46  ;;  %v4758_v60 = vld [vmem:[#allocation131_spill] sm:$0xff] }
 0x1ee   : > { %4740 = vst [vmem:[#allocation124_spill] sm:$0xff] %v3395_v2  ;;  %v3410_v52 = vadd.f32 %v1311_v50, %v4747_v54  ;;  %v3425_v48 = vadd.f32 %v1316_v37, %v4753_v12  ;;  %v4756_v50 = vld [vmem:[#allocation130_spill] sm:$0xff]  ;;  %v3434_v38 = vadd.f32 %v1319_v57, %v4758_v60  ;;  %v4760_v34 = vld [vmem:[#allocation132_spill] sm:$0xff]  ;;  %v4762_v40 = vld [vmem:[#allocation133_spill] sm:$0xff]  ;;  %v3467_v60 = vadd.f32 %v1330_v33, %v2975_v55 }
 0x1ef   : > { %4742 = vst [vmem:[#allocation125_spill] sm:$0xff] %v3398_v13  ;;  %v3431_v5 = vadd.f32 %v1318_v0, %v4756_v50  ;;  %v3437_v18 = vadd.f32 %v1320_v16, %v4760_v34  ;;  %v3440_v14 = vadd.f32 %v1321_v39, %v4762_v40  ;;  %v1371_v20 = vld [vmem:[#allocation2 + $0x10] sm:$0xff]  ;;  %v4764_v19 = vld [vmem:[#allocation134_spill] sm:$0xff]  ;;  %v4768_v46 = vld [vmem:[#allocation136_spill] sm:$0xff] }
 0x1f0   : > { %4743 = vst [vmem:[#allocation126_spill] sm:$0xff] %v3401_v63  ;;  %v3443_v61 = vadd.f32 %v1322_v11, %v4764_v19  ;;  %v4766_v29 = vld [vmem:[#allocation135_spill] sm:$0xff]  ;;  %v3449_v32 = vadd.f32 %v1324_v51, %v4768_v46  ;;  %v2191_v25 = vld [vmem:[#allocation2 + $0x8] sm:$0xff]  ;;  %v4770_v15 = vld [vmem:[#allocation137_spill] sm:$0xff] }
 0x1f1   : > { %4744 = vst [vmem:[#allocation176_spill] sm:$0xff] %v3404_v31  ;;  %v3446_v42 = vadd.f32 %v1323_v58, %v4766_v29  ;;  %v1372_v0 = vld [vmem:[#allocation2 + $0x30] sm:$0xff]  ;;  %v1391_v57 = vmul.f32 0.036000773, %v2191_v25  ;;  %v3452_v16 = vadd.f32 %v1325_v22, %v4770_v15  ;;  %v4772_v17 = vld [vmem:[#allocation138_spill] sm:$0xff]  ;;  %v4776_v11 = vld [vmem:[#allocation140_spill] sm:$0xff]  ;;  %v3471_v15 = vadd.f32 %v3118_v47, %v4556_v49 }
 0x1f2   : > { %4746 = vst [vmem:[#allocation127_spill] sm:$0xff] %v3407_v45  ;;  %v1373_v37 = vld [vmem:[#allocation2 + $0x50] sm:$0xff]  ;;  %v3455_v39 = vadd.f32 %v1326_v44, %v4772_v17  ;;  %v3461_v23 = vadd.f32 %v1328_v27, %v4776_v11  ;;  %v4778_v12 = vld [vmem:[#allocation141_spill] sm:$0xff]  ;;  %v1392_v44 = vmul.f32 0.036000773, %v1371_v20  ;;  %v2192_v40 = vld [vmem:[#allocation2 + $0x28] sm:$0xff] }
 0x1f3   : > { %4748 = vst [vmem:[#allocation128_spill] sm:$0xff] %v3410_v52  ;;  %v4774_v59 = vld [vmem:[#allocation139_spill] sm:$0xff]  ;;  %v3464_v50 = vadd.f32 %v1329_v30, %v4778_v12  ;;  %v1393_v19 = vmul.f32 0.036000773, %v2192_v40  ;;  %v1394_v29 = vmul.f32 0.036000773, %v1372_v0  ;;  %v3474_v20 = vadd.f32 %v1391_v57, %v2990_v6 }
 0x1f4   : > { %4749 = vst [vmem:[#allocation177_spill] sm:$0xff] %v3413_v4  ;;  %v3458_v56 = vadd.f32 %v1327_v41, %v4774_v59  ;;  %v1374_v58 = vld [vmem:[#allocation2 + $0x70] sm:$0xff]  ;;  %v2193_v46 = vld [vmem:[#allocation2 + $0x48] sm:$0xff]  ;;  %v1396_v25 = vmul.f32 0.036000773, %v1373_v37  ;;  %v3477_v37 = vadd.f32 %v1392_v44, %v2993_v1  ;;  %v4784_v4 = vld [vmem:[#allocation152_spill] sm:$0xff] }
 0x1f5   : > { %4750 = vst [vmem:[#allocation178_spill] sm:$0xff] %v3416_v62  ;;  %v1375_v24 = vld [vmem:[#allocation2 + $0x90] sm:$0xff]  ;;  %v1395_v27 = vmul.f32 0.036000773, %v2193_v46  ;;  %v2194_v59 = vld [vmem:[#allocation2 + $0x68] sm:$0xff]  ;;  %v4834_v8 = vld [vmem:[#allocation53_spill] sm:$0xff] }
 0x1f6   : > { %4751 = vst [vmem:[#allocation179_spill] sm:$0xff] %v3419_v9  ;;  %v1376_v51 = vld [vmem:[#allocation2 + $0xb0] sm:$0xff]  ;;  %v1397_v11 = vmul.f32 0.036000773, %v2194_v59  ;;  %v1398_v55 = vmul.f32 0.036000773, %v1374_v58 }
 0x1f7   : > { %4752 = vst [vmem:[#allocation180_spill] sm:$0xff] %v3422_v53  ;;  %v1379_v54 = vld [vmem:[#allocation2 + $0x110] sm:$0xff]  ;;  %v2195_v33 = vld [vmem:[#allocation2 + $0x88] sm:$0xff]  ;;  %v1402_v46 = vmul.f32 0.036000773, %v1376_v51  ;;  %v3483_v51 = vadd.f32 %v1394_v29, %v3003_v36  ;;  %v4836_v3 = vld [vmem:[#allocation69_spill] sm:$0xff] }
 0x1f8   : > { %4754 = vst [vmem:[#allocation129_spill] sm:$0xff] %v3425_v48  ;;  %v1377_v22 = vld [vmem:[#allocation2 + $0xd0] sm:$0xff]  ;;  %v1399_v12 = vmul.f32 0.036000773, %v2195_v33  ;;  %v2196_v0 = vld [vmem:[#allocation2 + $0xa8] sm:$0xff]  ;;  %v3480_v33 = vadd.f32 %v1393_v19, %v3000_v10 }
 0x1f9   : > { %4755 = vst [vmem:[#allocation181_spill] sm:$0xff] %v3428_v43  ;;  %v1378_v34 = vld [vmem:[#allocation2 + $0xf0] sm:$0xff]  ;;  %v2198_v59 = vld [vmem:[#allocation2 + $0xe8] sm:$0xff] }
 0x1fa   : > { %4757 = vst [vmem:[#allocation130_spill] sm:$0xff] %v3431_v5  ;;  %v1380_v41 = vld [vmem:[#allocation2 + $0x130] sm:$0xff]  ;;  %v1405_v58 = vmul.f32 0.036000773, %v2198_v59  ;;  %v1406_v57 = vmul.f32 0.036000773, %v1378_v34  ;;  %v3486_v59 = vadd.f32 %v1395_v27, %v3006_v28 }
 0x1fb   : > { %4759 = vst [vmem:[#allocation131_spill] sm:$0xff] %v3434_v38  ;;  %v1381_v17 = vld [vmem:[#allocation2 + $0x150] sm:$0xff]  ;;  %v2203_v29 = vld [vmem:[#allocation2 + $0x188] sm:$0xff] }
 0x1fc   : > { %4761 = vst [vmem:[#allocation132_spill] sm:$0xff] %v3437_v18  ;;  %v1382_v30 = vld [vmem:[#allocation2 + $0x170] sm:$0xff]  ;;  %v1412_v19 = vmul.f32 0.036000773, %v1381_v17  ;;  %v1415_v38 = vmul.f32 0.036000773, %v2203_v29  ;;  %v3498_v29 = vadd.f32 %v1399_v12, %v4784_v4 }
 0x1fd   : > { %4763 = vst [vmem:[#allocation133_spill] sm:$0xff] %v3440_v14  ;;  %v1383_v40 = vld [vmem:[#allocation2 + $0x190] sm:$0xff]  ;;  %v2202_v14 = vld [vmem:[#allocation2 + $0x168] sm:$0xff]  ;;  %v1414_v18 = vmul.f32 0.036000773, %v1382_v30  ;;  %v4790_v4 = vld [vmem:[#allocation157_spill] sm:$0xff] }
 0x1fe   : > { %4765 = vst [vmem:[#allocation134_spill] sm:$0xff] %v3443_v61  ;;  %v1384_v49 = vld [vmem:[#allocation2 + $0x1b0] sm:$0xff]  ;;  %v1410_v61 = vmul.f32 0.036000773, %v1380_v41  ;;  %v1413_v34 = vmul.f32 0.036000773, %v2202_v14 }
 0x1ff   : > { %4767 = vst [vmem:[#allocation135_spill] sm:$0xff] %v3446_v42  ;;  %v1385_v47 = vld [vmem:[#allocation2 + $0x1d0] sm:$0xff]  ;;  %v1416_v5 = vmul.f32 0.036000773, %v1383_v40  ;;  %v2204_v43 = vld [vmem:[#allocation2 + $0x1a8] sm:$0xff]  ;;  %v4782_v41 = vld [vmem:[#allocation149_spill] sm:$0xff] }
 0x200   : > { %4769 = vst [vmem:[#allocation136_spill] sm:$0xff] %v3449_v32  ;;  %v1386_v6 = vld [vmem:[#allocation2 + $0x1f0] sm:$0xff]  ;;  %v1408_v32 = vmul.f32 0.036000773, %v1379_v54  ;;  %v3492_v48 = vadd.f32 %v1397_v11, %v4782_v41  ;;  %v2205_v28 = vld [vmem:[#allocation2 + $0x1c8] sm:$0xff] }
 0x201   : > { %4771 = vst [vmem:[#allocation137_spill] sm:$0xff] %v3452_v16  ;;  %v2199_v16 = vld [vmem:[#allocation2 + $0x108] sm:$0xff]  ;;  %v1387_v1 = vld [vmem:[#allocation2 + $0x210] sm:$0xff]  ;;  %v1419_v27 = vmul.f32 0.036000773, %v2205_v28 }
 0x202   : > { %4773 = vst [vmem:[#allocation138_spill] sm:$0xff] %v3455_v39  ;;  %v1404_v39 = vmul.f32 0.036000773, %v1377_v22  ;;  %v1388_v44 = vld [vmem:[#allocation2 + $0x230] sm:$0xff]  ;;  %v1420_v53 = vmul.f32 0.036000773, %v1385_v47 }
 0x203   : > { %4775 = vst [vmem:[#allocation139_spill] sm:$0xff] %v3458_v56  ;;  %v1389_v10 = vld [vmem:[#allocation2 + $0x250] sm:$0xff]  ;;  %v4783_v17 = vld [vmem:[#allocation150_spill] sm:$0xff]  ;;  %v1424_v40 = vmul.f32 0.036000773, %v1387_v1 }
 0x204   : > { %4777 = vst [vmem:[#allocation140_spill] sm:$0xff] %v3461_v23  ;;  %v2197_v23 = vld [vmem:[#allocation2 + $0xc8] sm:$0xff]  ;;  %v1390_v36 = vld [vmem:[#allocation2 + $0x270] sm:$0xff]  ;;  %v3495_v9 = vadd.f32 %v1398_v55, %v4783_v17  ;;  %v1426_v11 = vmul.f32 0.036000773, %v1388_v44 }
 0x205   : > { %4779 = vst [vmem:[#allocation141_spill] sm:$0xff] %v3464_v50  ;;  %v1401_v50 = vmul.f32 0.036000773, %v2196_v0  ;;  %v1403_v56 = vmul.f32 0.036000773, %v2197_v23  ;;  %v2200_v0 = vld [vmem:[#allocation2 + $0x128] sm:$0xff] }
 0x206   : > { %4780 = vst [vmem:[#allocation182_spill] sm:$0xff] %v3467_v60  ;;  %v1400_v60 = vmul.f32 0.036000773, %v1375_v24  ;;  %v1407_v24 = vmul.f32 0.036000773, %v2199_v16  ;;  %v2201_v23 = vld [vmem:[#allocation2 + $0x148] sm:$0xff]  ;;  %v3579_v26 = vadd.f32 %v1426_v11, %v4836_v3 }
 0x207   : > { %v1409_v42 = vmul.f32 0.036000773, %v2200_v0  ;;  %v1411_v22 = vmul.f32 0.036000773, %v2201_v23  ;;  %v4781_v16 = vld [vmem:[#allocation146_spill] sm:$0xff]  ;;  %v4786_v31 = vld [vmem:[#allocation155_spill] sm:$0xff]  ;;  %v3510_v12 = vadd.f32 %v1403_v56, %v4790_v4 }
 0x208   : > { %v3489_v54 = vadd.f32 %v1396_v25, %v4781_v16  ;;  %v1417_v0 = vmul.f32 0.036000773, %v2204_v43  ;;  %v1418_v23 = vmul.f32 0.036000773, %v1384_v49  ;;  %v2206_v14 = vld [vmem:[#allocation2 + $0x1e8] sm:$0xff]  ;;  %v1476_v13 = vld [vmem:[#allocation2 + $0xb1] sm:$0xff] }
 0x209   : > { %v1421_v30 = vmul.f32 0.036000773, %v2206_v14  ;;  %v1422_v25 = vmul.f32 0.036000773, %v1386_v6  ;;  %v2207_v16 = vld [vmem:[#allocation2 + $0x208] sm:$0xff]  ;;  %v3504_v14 = vadd.f32 %v1401_v50, %v4786_v31  ;;  %4791 = vst [vmem:[#allocation150_spill] sm:$0xff] %v3510_v12 }
 0x20a   : > { %v1423_v62 = vmul.f32 0.036000773, %v2207_v16  ;;  %v2208_v43 = vld [vmem:[#allocation2 + $0x228] sm:$0xff]  ;;  %v1428_v45 = vmul.f32 0.036000773, %v1389_v10  ;;  %v4788_v16 = vld [vmem:[#allocation156_spill] sm:$0xff] }
 0x20b   : > { %v1425_v52 = vmul.f32 0.036000773, %v2208_v43  ;;  %v4785_v41 = vld [vmem:[#allocation154_spill] sm:$0xff]  ;;  %4787 = vst [vmem:[#allocation146_spill] sm:$0xff] %v3504_v14  ;;  %v1430_v6 = vmul.f32 0.036000773, %v1390_v36  ;;  %v3507_v63 = vadd.f32 %v1402_v46, %v4788_v16 }
 0x20c   : > { %v3501_v49 = vadd.f32 %v1400_v60, %v4785_v41  ;;  %v2209_v28 = vld [vmem:[#allocation2 + $0x248] sm:$0xff]  ;;  %v4794_v60 = vld [vmem:[#allocation159_spill] sm:$0xff]  ;;  %v4796_v41 = vld [vmem:[#allocation160_spill] sm:$0xff] }
 0x20d   : > { %v1427_v47 = vmul.f32 0.036000773, %v2209_v28  ;;  %v2210_v55 = vld [vmem:[#allocation2 + $0x268] sm:$0xff]  ;;  %4789 = vst [vmem:[#allocation149_spill] sm:$0xff] %v3507_v63  ;;  %v3516_v43 = vadd.f32 %v1405_v58, %v4794_v60  ;;  %v3519_v10 = vadd.f32 %v1406_v57, %v4796_v41  ;;  %v4800_v31 = vld [vmem:[#allocation143_spill] sm:$0xff]  ;;  %v4802_v46 = vld [vmem:[#allocation161_spill] sm:$0xff]  ;;  %v3576_v21 = vadd.f32 %v1425_v52, %v4834_v8 }
 0x20e   : > { %v1429_v17 = vmul.f32 0.036000773, %v2210_v55  ;;  %v4792_v1 = vld [vmem:[#allocation158_spill] sm:$0xff]  ;;  %v3525_v50 = vadd.f32 %v1408_v32, %v4800_v31  ;;  %v3528_v36 = vadd.f32 %v1409_v42, %v4802_v46  ;;  %v4814_v32 = vld [vmem:[#allocation144_spill] sm:$0xff]  ;;  %v4816_v42 = vld [vmem:[#allocation145_spill] sm:$0xff] }
 0x20f   : > { %v3513_v44 = vadd.f32 %v1404_v39, %v4792_v1  ;;  %4795 = vst [vmem:[#allocation154_spill] sm:$0xff] %v3516_v43  ;;  %v4798_v28 = vld [vmem:[#allocation142_spill] sm:$0xff]  ;;  %v4806_v39 = vld [vmem:[#allocation13_spill] sm:$0xff]  ;;  %v3549_v31 = vadd.f32 %v1416_v5, %v4816_v42  ;;  %v1472_v46 = vld [vmem:[#allocation2 + $0x31] sm:$0xff] }
 0x210   : > { %4797 = vst [vmem:[#allocation155_spill] sm:$0xff] %v3519_v10  ;;  %v3522_v55 = vadd.f32 %v1407_v24, %v4798_v28  ;;  %v4804_v56 = vld [vmem:[#allocation82_spill] sm:$0xff]  ;;  %v3534_v4 = vadd.f32 %v1411_v22, %v4806_v39  ;;  %v4812_v24 = vld [vmem:[#allocation41_spill] sm:$0xff]  ;;  %v3546_v28 = vadd.f32 %v1415_v38, %v4814_v32  ;;  %v4818_v22 = vld [vmem:[#allocation67_spill] sm:$0xff]  ;;  %v1492_v11 = vmul.f32 0.007598758, %v1472_v46 }
 0x211   : > { %4793 = vst [vmem:[#allocation152_spill] sm:$0xff] %v3513_v44  ;;  %v3531_v16 = vadd.f32 %v1410_v61, %v4804_v56  ;;  %v4808_v58 = vld [vmem:[#allocation22_spill] sm:$0xff]  ;;  %v3543_v41 = vadd.f32 %v1414_v18, %v4812_v24  ;;  %v1471_v61 = vld [vmem:[#allocation2 + $0x11] sm:$0xff]  ;;  %v3552_v39 = vadd.f32 %v1417_v0, %v4818_v22  ;;  %v4824_v18 = vld [vmem:[#allocation93_spill] sm:$0xff] }
 0x212   : > { %4799 = vst [vmem:[#allocation156_spill] sm:$0xff] %v3522_v55  ;;  %v3537_v1 = vadd.f32 %v1412_v19, %v4808_v58  ;;  %v4810_v57 = vld [vmem:[#allocation30_spill] sm:$0xff]  ;;  %v1473_v56 = vld [vmem:[#allocation2 + $0x51] sm:$0xff]  ;;  %v3561_v24 = vadd.f32 %v1420_v53, %v4824_v18  ;;  %v1491_v3 = vmul.f32 0.007598758, %v1471_v61 }
 0x213   : > { %4801 = vst [vmem:[#allocation157_spill] sm:$0xff] %v3525_v50  ;;  %v3540_v60 = vadd.f32 %v1413_v34, %v4810_v57  ;;  %v4820_v19 = vld [vmem:[#allocation76_spill] sm:$0xff]  ;;  %v4826_v42 = vld [vmem:[#allocation15_spill] sm:$0xff] }
 0x214   : > { %4803 = vst [vmem:[#allocation158_spill] sm:$0xff] %v3528_v36  ;;  %v3555_v58 = vadd.f32 %v1418_v23, %v4820_v19  ;;  %v4822_v34 = vld [vmem:[#allocation80_spill] sm:$0xff]  ;;  %v3564_v2 = vadd.f32 %v1421_v30, %v4826_v42  ;;  %v4828_v35 = vld [vmem:[#allocation23_spill] sm:$0xff]  ;;  %v4838_v30 = vld [vmem:[#allocation73_spill] sm:$0xff] }
 0x215   : > { %4805 = vst [vmem:[#allocation159_spill] sm:$0xff] %v3531_v16  ;;  %v3558_v57 = vadd.f32 %v1419_v27, %v4822_v34  ;;  %v1474_v38 = vld [vmem:[#allocation2 + $0x71] sm:$0xff]  ;;  %v3567_v7 = vadd.f32 %v1422_v25, %v4828_v35  ;;  %v3582_v42 = vadd.f32 %v1427_v47, %v4838_v30  ;;  %v4840_v35 = vld [vmem:[#allocation77_spill] sm:$0xff] }
 0x216   : > { %4807 = vst [vmem:[#allocation160_spill] sm:$0xff] %v3534_v4  ;;  %v1475_v32 = vld [vmem:[#allocation2 + $0x91] sm:$0xff]  ;;  %v3585_v25 = vadd.f32 %v1428_v45, %v4840_v35  ;;  %v1494_v45 = vmul.f32 0.007598758, %v1474_v38  ;;  %v4890_v4 = vld [vmem:[#allocation46_spill] sm:$0xff] }
 0x217   : > { %4809 = vst [vmem:[#allocation142_spill] sm:$0xff] %v3537_v1  ;;  %v1479_v5 = vld [vmem:[#allocation2 + $0x111] sm:$0xff]  ;;  %v1495_v35 = vmul.f32 0.007598758, %v1475_v32  ;;  %v4885_v1 = vld [vmem:[#allocation26_spill] sm:$0xff] }
 0x218   : > { %4811 = vst [vmem:[#allocation143_spill] sm:$0xff] %v3540_v60  ;;  %v4830_v0 = vld [vmem:[#allocation32_spill] sm:$0xff]  ;;  %v4832_v23 = vld [vmem:[#allocation43_spill] sm:$0xff]  ;;  %v4880_v60 = vld [vmem:[#allocation86_spill] sm:$0xff] }
 0x219   : > { %4813 = vst [vmem:[#allocation161_spill] sm:$0xff] %v3543_v41  ;;  %v3570_v22 = vadd.f32 %v1423_v62, %v4830_v0  ;;  %v3573_v19 = vadd.f32 %v1424_v40, %v4832_v23  ;;  %v1477_v27 = vld [vmem:[#allocation2 + $0xd1] sm:$0xff]  ;;  %v4842_v23 = vld [vmem:[#allocation81_spill] sm:$0xff] }
 0x21a   : > { %4815 = vst [vmem:[#allocation82_spill] sm:$0xff] %v3546_v28  ;;  %v1478_v34 = vld [vmem:[#allocation2 + $0xf1] sm:$0xff] }
 0x21b   : > { %4817 = vst [vmem:[#allocation13_spill] sm:$0xff] %v3549_v31  ;;  %v1480_v53 = vld [vmem:[#allocation2 + $0x131] sm:$0xff] }
 0x21c   : > { %4819 = vst [vmem:[#allocation22_spill] sm:$0xff] %v3552_v39  ;;  %v1483_v18 = vld [vmem:[#allocation2 + $0x191] sm:$0xff]  ;;  %v1500_v61 = vmul.f32 0.007598758, %v1480_v53 }
 0x21d   : > { %4821 = vst [vmem:[#allocation30_spill] sm:$0xff] %v3555_v58  ;;  %v1481_v62 = vld [vmem:[#allocation2 + $0x151] sm:$0xff]  ;;  %v4850_v58 = vld [vmem:[#allocation10_spill] sm:$0xff]  ;;  %v1503_v38 = vmul.f32 0.007598758, %v1483_v18 }
 0x21e   : > { %4823 = vst [vmem:[#allocation41_spill] sm:$0xff] %v3558_v57  ;;  %v1482_v0 = vld [vmem:[#allocation2 + $0x171] sm:$0xff]  ;;  %v1499_v57 = vmul.f32 0.007598758, %v1479_v5  ;;  %v1501_v46 = vmul.f32 0.007598758, %v1481_v62  ;;  %v3602_v39 = vadd.f32 %v1491_v3, %v4850_v58 }
 0x21f   : > { %4825 = vst [vmem:[#allocation144_spill] sm:$0xff] %v3561_v24  ;;  %v1484_v40 = vld [vmem:[#allocation2 + $0x1b1] sm:$0xff]  ;;  %v4855_v58 = vld [vmem:[#allocation78_spill] sm:$0xff] }
 0x220   : > { %4827 = vst [vmem:[#allocation145_spill] sm:$0xff] %v3564_v2  ;;  %v1485_v8 = vld [vmem:[#allocation2 + $0x1d1] sm:$0xff]  ;;  %v1504_v32 = vmul.f32 0.007598758, %v1484_v40 }
 0x221   : > { %4829 = vst [vmem:[#allocation67_spill] sm:$0xff] %v3567_v7  ;;  %v1486_v52 = vld [vmem:[#allocation2 + $0x1f1] sm:$0xff] }
 0x222   : > { %4831 = vst [vmem:[#allocation76_spill] sm:$0xff] %v3570_v22  ;;  %v4844_v22 = vld [vmem:[#allocation95_spill] sm:$0xff]  ;;  %v4847_v2 = vld [vmem:[#allocation16_spill] sm:$0xff] }
 0x223   : > { %4833 = vst [vmem:[#allocation80_spill] sm:$0xff] %v3573_v19  ;;  %v3588_v19 = vadd.f32 %v1429_v17, %v4842_v23  ;;  %v3591_v7 = vadd.f32 %v1430_v6, %v4844_v22  ;;  %v1489_v47 = vld [vmem:[#allocation2 + $0x251] sm:$0xff]  ;;  %v1496_v17 = vmul.f32 0.007598758, %v1476_v13  ;;  %v1497_v23 = vmul.f32 0.007598758, %v1477_v27 }
 0x224   : > { %4835 = vst [vmem:[#allocation93_spill] sm:$0xff] %v3576_v21  ;;  %v1487_v21 = vld [vmem:[#allocation2 + $0x211] sm:$0xff]  ;;  %v4848_v6 = vld [vmem:[#allocation54_spill] sm:$0xff]  ;;  %v1506_v13 = vmul.f32 0.007598758, %v1486_v52 }
 0x225   : > { %4837 = vst [vmem:[#allocation15_spill] sm:$0xff] %v3579_v26  ;;  %v1488_v26 = vld [vmem:[#allocation2 + $0x231] sm:$0xff]  ;;  %v1507_v27 = vmul.f32 0.007598758, %v1487_v21  ;;  %v4860_v21 = vld [vmem:[#allocation17_spill] sm:$0xff] }
 0x226   : > { %4839 = vst [vmem:[#allocation23_spill] sm:$0xff] %v3582_v42  ;;  %v1490_v30 = vld [vmem:[#allocation2 + $0x271] sm:$0xff]  ;;  %v1493_v42 = vmul.f32 0.007598758, %v1473_v56  ;;  %v1502_v56 = vmul.f32 0.007598758, %v1482_v0  ;;  %v3615_v0 = vadd.f32 %v1494_v45, %v4855_v58 }
 0x227   : > { %4841 = vst [vmem:[#allocation32_spill] sm:$0xff] %v3585_v25  ;;  %v4846_v25 = vld [vmem:[#allocation34_spill] sm:$0xff]  ;;  %v4849_v22 = vld [vmem:[#allocation44_spill] sm:$0xff]  ;;  %v1510_v5 = vmul.f32 0.007598758, %v1490_v30  ;;  %v4853_v53 = vld [vmem:[#allocation79_spill] sm:$0xff] }
 0x228   : > { %4843 = vst [vmem:[#allocation43_spill] sm:$0xff] %v3588_v19  ;;  %v3595_v24 = vadd.f32 %v4847_v2, %v4846_v25  ;;  %v1498_v19 = vmul.f32 0.007598758, %v1478_v34  ;;  %v4851_v31 = vld [vmem:[#allocation24_spill] sm:$0xff]  ;;  %v1505_v2 = vmul.f32 0.007598758, %v1485_v8 }
 0x229   : > { %4845 = vst [vmem:[#allocation53_spill] sm:$0xff] %v3591_v7  ;;  %v3599_v7 = vadd.f32 %v4849_v22, %v4848_v6  ;;  %v3605_v28 = vadd.f32 %v1492_v11, %v4851_v31  ;;  %v4852_v34 = vld [vmem:[#allocation71_spill] sm:$0xff]  ;;  %v1508_v6 = vmul.f32 0.007598758, %v1488_v26  ;;  %v1509_v22 = vmul.f32 0.007598758, %v1489_v47 }
 0x22a   : > { %v3608_v25 = vadd.f32 %v1493_v42, %v4852_v34  ;;  %v4854_v62 = vld [vmem:[#allocation72_spill] sm:$0xff]  ;;  %v4857_v40 = vld [vmem:[#allocation83_spill] sm:$0xff]  ;;  %v4858_v8 = vld [vmem:[#allocation162_spill] sm:$0xff] }
 0x22b   : > { %v3612_v41 = vadd.f32 %v4854_v62, %v4853_v53  ;;  %v4856_v18 = vld [vmem:[#allocation84_spill] sm:$0xff]  ;;  %v3622_v52 = vadd.f32 %v1495_v35, %v4858_v8  ;;  %v4861_v42 = vld [vmem:[#allocation11_spill] sm:$0xff]  ;;  %v4866_v30 = vld [vmem:[#allocation25_spill] sm:$0xff] }
 0x22c   : > { %v3619_v31 = vadd.f32 %v4857_v40, %v4856_v18  ;;  %v3626_v3 = vadd.f32 %v4861_v42, %v4860_v21  ;;  %v4863_v26 = vld [vmem:[#allocation163_spill] sm:$0xff]  ;;  %v4868_v45 = vld [vmem:[#allocation164_spill] sm:$0xff]  ;;  %v4871_v58 = vld [vmem:[#allocation45_spill] sm:$0xff] }
 0x22d   : > { %4859 = vst [vmem:[#allocation69_spill] sm:$0xff] %v3622_v52  ;;  %v3629_v11 = vadd.f32 %v1496_v17, %v4863_v26  ;;  %v4865_v47 = vld [vmem:[#allocation35_spill] sm:$0xff]  ;;  %v3636_v53 = vadd.f32 %v1497_v23, %v4868_v45  ;;  %v4873_v35 = vld [vmem:[#allocation165_spill] sm:$0xff]  ;;  %v4875_v8 = vld [vmem:[#allocation74_spill] sm:$0xff] }
 0x22e   : > { %4862 = vst [vmem:[#allocation73_spill] sm:$0xff] %v3626_v3  ;;  %v3633_v34 = vadd.f32 %v4866_v30, %v4865_v47  ;;  %v4870_v62 = vld [vmem:[#allocation55_spill] sm:$0xff]  ;;  %v3643_v40 = vadd.f32 %v1498_v19, %v4873_v35  ;;  %v4878_v17 = vld [vmem:[#allocation148_spill] sm:$0xff]  ;;  %v4881_v47 = vld [vmem:[#allocation85_spill] sm:$0xff] }
 0x22f   : > { %4864 = vst [vmem:[#allocation77_spill] sm:$0xff] %v3629_v11  ;;  %v3640_v18 = vadd.f32 %v4871_v58, %v4870_v62  ;;  %v4876_v21 = vld [vmem:[#allocation147_spill] sm:$0xff]  ;;  %v3650_v26 = vadd.f32 %v1499_v57, %v4878_v17  ;;  %v3654_v30 = vadd.f32 %v4881_v47, %v4880_v60  ;;  %v4883_v23 = vld [vmem:[#allocation166_spill] sm:$0xff]  ;;  %v4893_v57 = vld [vmem:[#allocation168_spill] sm:$0xff] }
 0x230   : > { %4867 = vst [vmem:[#allocation81_spill] sm:$0xff] %v3633_v34  ;;  %v3647_v42 = vadd.f32 %v4876_v21, %v4875_v8  ;;  %v3657_v45 = vadd.f32 %v1500_v61, %v4883_v23  ;;  %v4886_v62 = vld [vmem:[#allocation14_spill] sm:$0xff]  ;;  %v4888_v19 = vld [vmem:[#allocation167_spill] sm:$0xff]  ;;  %v4891_v8 = vld [vmem:[#allocation33_spill] sm:$0xff]  ;;  %v3671_v17 = vadd.f32 %v1502_v56, %v4893_v57 }
 0x231   : > { %4869 = vst [vmem:[#allocation95_spill] sm:$0xff] %v3636_v53  ;;  %v3661_v58 = vadd.f32 %v4886_v62, %v4885_v1  ;;  %v3664_v35 = vadd.f32 %v1501_v46, %v4888_v19  ;;  %v3668_v21 = vadd.f32 %v4891_v8, %v4890_v4  ;;  %v4895_v16 = vld [vmem:[#allocation64_spill] sm:$0xff]  ;;  %v4896_v60 = vld [vmem:[#allocation151_spill] sm:$0xff]  ;;  %v4898_v61 = vld [vmem:[#allocation153_spill] sm:$0xff] }
 0x232   : > { %4872 = vst [vmem:[#allocation34_spill] sm:$0xff] %v3640_v18  ;;  %v3675_v47 = vadd.f32 %v4896_v60, %v4895_v16  ;;  %v3678_v23 = vadd.f32 %v1503_v38, %v4898_v61  ;;  %v4901_v1 = vld [vmem:[#allocation68_spill] sm:$0xff]  ;;  %v4903_v46 = vld [vmem:[#allocation169_spill] sm:$0xff]  ;;  %v4908_v56 = vld [vmem:[#allocation170_spill] sm:$0xff] }
 0x233   : > { %4874 = vst [vmem:[#allocation16_spill] sm:$0xff] %v3643_v40  ;;  %v3685_v19 = vadd.f32 %v1504_v32, %v4903_v46  ;;  %v4906_v4 = vld [vmem:[#allocation88_spill] sm:$0xff]  ;;  %v3692_v57 = vadd.f32 %v1505_v2, %v4908_v56  ;;  %v4911_v16 = vld [vmem:[#allocation27_spill] sm:$0xff]  ;;  %v4944_v53 = vld [vmem:[#allocation29_spill] sm:$0xff] }
 0x234   : > { %4877 = vst [vmem:[#allocation54_spill] sm:$0xff] %v3647_v42  ;;  %v1551_v38 = vld [vmem:[#allocation2 + $0x12] sm:$0xff]  ;;  %v2224_v12 = vld [vmem:[#allocation2 + $0x1aa] sm:$0xff] }
 0x235   : > { %4879 = vst [vmem:[#allocation44_spill] sm:$0xff] %v3650_v26  ;;  %v4913_v61 = vld [vmem:[#allocation171_spill] sm:$0xff]  ;;  %v4918_v32 = vld [vmem:[#allocation172_spill] sm:$0xff]  ;;  %v4952_v3 = vld [vmem:[#allocation94_spill] sm:$0xff] }
 0x236   : > { %4882 = vst [vmem:[#allocation10_spill] sm:$0xff] %v3654_v30  ;;  %v3706_v46 = vadd.f32 %v1507_v27, %v4918_v32  ;;  %v1552_v2 = vld [vmem:[#allocation2 + $0x32] sm:$0xff] }
 0x237   : > { %4884 = vst [vmem:[#allocation24_spill] sm:$0xff] %v3657_v45  ;;  %v4900_v45 = vld [vmem:[#allocation87_spill] sm:$0xff]  ;;  %v4931_v27 = vld [vmem:[#allocation92_spill] sm:$0xff] }
 0x238   : > { %4887 = vst [vmem:[#allocation71_spill] sm:$0xff] %v3661_v58  ;;  %v3682_v62 = vadd.f32 %v4901_v1, %v4900_v45  ;;  %v4915_v45 = vld [vmem:[#allocation48_spill] sm:$0xff]  ;;  %v4916_v1 = vld [vmem:[#allocation47_spill] sm:$0xff] }
 0x239   : > { %4889 = vst [vmem:[#allocation79_spill] sm:$0xff] %v3664_v35  ;;  %v4905_v35 = vld [vmem:[#allocation96_spill] sm:$0xff]  ;;  %v2214_v58 = vld [vmem:[#allocation2 + $0x6a] sm:$0xff] }
 0x23a   : > { %4892 = vst [vmem:[#allocation72_spill] sm:$0xff] %v3668_v21  ;;  %v3689_v8 = vadd.f32 %v4906_v4, %v4905_v35  ;;  %v4920_v35 = vld [vmem:[#allocation89_spill] sm:$0xff]  ;;  %v4921_v4 = vld [vmem:[#allocation56_spill] sm:$0xff] }
 0x23b   : > { %4894 = vst [vmem:[#allocation78_spill] sm:$0xff] %v3671_v17  ;;  %v4910_v17 = vld [vmem:[#allocation28_spill] sm:$0xff] }
 0x23c   : > { %4897 = vst [vmem:[#allocation84_spill] sm:$0xff] %v3675_v47  ;;  %v3696_v60 = vadd.f32 %v4911_v16, %v4910_v17  ;;  %v1553_v56 = vld [vmem:[#allocation2 + $0x52] sm:$0xff]  ;;  %v4923_v17 = vld [vmem:[#allocation173_spill] sm:$0xff]  ;;  %v1572_v47 = vmul.f32 0.0010283801, %v1551_v38 }
 0x23d   : > { %4899 = vst [vmem:[#allocation83_spill] sm:$0xff] %v3678_v23  ;;  %v3699_v23 = vadd.f32 %v1506_v13, %v4913_v61  ;;  %v3713_v16 = vadd.f32 %v1508_v6, %v4923_v17  ;;  %v4926_v13 = vld [vmem:[#allocation90_spill] sm:$0xff]  ;;  %v1558_v6 = vld [vmem:[#allocation2 + $0xf2] sm:$0xff]  ;;  %v1576_v21 = vmul.f32 0.0010283801, %v1553_v56 }
 0x23e   : > { %4902 = vst [vmem:[#allocation162_spill] sm:$0xff] %v3682_v62  ;;  %v3703_v62 = vadd.f32 %v4916_v1, %v4915_v45  ;;  %v4930_v1 = vld [vmem:[#allocation97_spill] sm:$0xff]  ;;  %v2211_v17 = vld [vmem:[#allocation2 + $0xa] sm:$0xff]  ;;  %v4940_v40 = vld [vmem:[#allocation12_spill] sm:$0xff] }
 0x23f   : > { %4904 = vst [vmem:[#allocation17_spill] sm:$0xff] %v3685_v19  ;;  %v3724_v32 = vadd.f32 %v4931_v27, %v4930_v1  ;;  %v3731_v1 = vadd.f32 %v3471_v15, %v3474_v20  ;;  %v1561_v27 = vld [vmem:[#allocation2 + $0x152] sm:$0xff] }
 0x240   : > { %4907 = vst [vmem:[#allocation11_spill] sm:$0xff] %v3689_v8  ;;  %v3710_v8 = vadd.f32 %v4921_v4, %v4920_v35  ;;  %v1556_v35 = vld [vmem:[#allocation2 + $0xb2] sm:$0xff] }
 0x241   : > { %4909 = vst [vmem:[#allocation163_spill] sm:$0xff] %v3692_v57  ;;  %v1554_v57 = vld [vmem:[#allocation2 + $0x72] sm:$0xff] }
 0x242   : > { %4912 = vst [vmem:[#allocation35_spill] sm:$0xff] %v3696_v60  ;;  %v4925_v60 = vld [vmem:[#allocation91_spill] sm:$0xff] }
 0x243   : > { %4914 = vst [vmem:[#allocation25_spill] sm:$0xff] %v3699_v23  ;;  %v3717_v61 = vadd.f32 %v4926_v13, %v4925_v60  ;;  %v4928_v23 = vld [vmem:[#allocation174_spill] sm:$0xff]  ;;  %v1557_v4 = vld [vmem:[#allocation2 + $0xd2] sm:$0xff] }
 0x244   : > { %4917 = vst [vmem:[#allocation164_spill] sm:$0xff] %v3703_v62  ;;  %v3720_v45 = vadd.f32 %v1509_v22, %v4928_v23  ;;  %v4933_v62 = vld [vmem:[#allocation175_spill] sm:$0xff]  ;;  %v1574_v22 = vmul.f32 0.0010283801, %v1552_v2  ;;  %v1584_v55 = vmul.f32 0.0010283801, %v1557_v4 }
 0x245   : > { %4919 = vst [vmem:[#allocation55_spill] sm:$0xff] %v3706_v46  ;;  %v1555_v46 = vld [vmem:[#allocation2 + $0x92] sm:$0xff]  ;;  %v3727_v19 = vadd.f32 %v1510_v5, %v4933_v62  ;;  %v2212_v60 = vld [vmem:[#allocation2 + $0x2a] sm:$0xff]  ;;  %v1577_v5 = vmul.f32 0.0010283801, %v2214_v58 }
 0x246   : > { %4922 = vst [vmem:[#allocation45_spill] sm:$0xff] %v3710_v8  ;;  %v1559_v8 = vld [vmem:[#allocation2 + $0x112] sm:$0xff]  ;;  %v1573_v13 = vmul.f32 0.0010283801, %v2212_v60  ;;  %v2213_v23 = vld [vmem:[#allocation2 + $0x4a] sm:$0xff] }
 0x247   : > { %4924 = vst [vmem:[#allocation165_spill] sm:$0xff] %v3713_v16  ;;  %v1571_v16 = vmul.f32 0.0010283801, %v2211_v17  ;;  %v1578_v62 = vmul.f32 0.0010283801, %v1554_v57  ;;  %v4936_v17 = vld [vmem:[#allocation61_spill] sm:$0xff] }
 0x248   : > { %4927 = vst [vmem:[#allocation74_spill] sm:$0xff] %v3717_v61  ;;  %v1560_v61 = vld [vmem:[#allocation2 + $0x132] sm:$0xff]  ;;  %v1580_v36 = vmul.f32 0.0010283801, %v1555_v46  ;;  %v2216_v2 = vld [vmem:[#allocation2 + $0xaa] sm:$0xff] }
 0x249   : > { %4929 = vst [vmem:[#allocation147_spill] sm:$0xff] %v3720_v45  ;;  %v1575_v45 = vmul.f32 0.0010283801, %v2213_v23  ;;  %v3734_v38 = vadd.f32 %v1571_v16, %v4936_v17  ;;  %v1563_v60 = vld [vmem:[#allocation2 + $0x192] sm:$0xff]  ;;  %v1581_v26 = vmul.f32 0.0010283801, %v2216_v2 }
 0x24a   : > { %4932 = vst [vmem:[#allocation148_spill] sm:$0xff] %v3724_v32  ;;  %v1562_v32 = vld [vmem:[#allocation2 + $0x172] sm:$0xff]  ;;  %v1582_v23 = vmul.f32 0.0010283801, %v1556_v35  ;;  %v2218_v58 = vld [vmem:[#allocation2 + $0xea] sm:$0xff] }
 0x24b   : > { %4934 = vst [vmem:[#allocation86_spill] sm:$0xff] %v3727_v19  ;;  %v2215_v19 = vld [vmem:[#allocation2 + $0x8a] sm:$0xff]  ;;  %v1564_v15 = vld [vmem:[#allocation2 + $0x1b2] sm:$0xff]  ;;  %v1585_v57 = vmul.f32 0.0010283801, %v2218_v58  ;;  %v3746_v58 = vadd.f32 %v1575_v45, %v4944_v53 }
 0x24c   : > { %4935 = vst [vmem:[#allocation85_spill] sm:$0xff] %v3731_v1  ;;  %v1579_v30 = vmul.f32 0.0010283801, %v2215_v19  ;;  %v4938_v56 = vld [vmem:[#allocation63_spill] sm:$0xff]  ;;  %v3740_v19 = vadd.f32 %v1573_v13, %v4940_v40  ;;  %v1586_v17 = vmul.f32 0.0010283801, %v1558_v6 }
 0x24d   : > { %4937 = vst [vmem:[#allocation166_spill] sm:$0xff] %v3734_v38  ;;  %v3737_v50 = vadd.f32 %v1572_v47, %v4938_v56  ;;  %v1565_v20 = vld [vmem:[#allocation2 + $0x1d2] sm:$0xff]  ;;  %v2217_v1 = vld [vmem:[#allocation2 + $0xca] sm:$0xff]  ;;  %v1588_v10 = vmul.f32 0.0010283801, %v1559_v8 }
 0x24e   : > { %v1583_v42 = vmul.f32 0.0010283801, %v2217_v1  ;;  %4941 = vst [vmem:[#allocation14_spill] sm:$0xff] %v3740_v19  ;;  %v1566_v16 = vld [vmem:[#allocation2 + $0x1f2] sm:$0xff]  ;;  %v2219_v38 = vld [vmem:[#allocation2 + $0x10a] sm:$0xff] }
 0x24f   : > { %4939 = vst [vmem:[#allocation26_spill] sm:$0xff] %v3737_v50  ;;  %v1587_v46 = vmul.f32 0.0010283801, %v2219_v38  ;;  %v4942_v2 = vld [vmem:[#allocation18_spill] sm:$0xff]  ;;  %v1567_v47 = vld [vmem:[#allocation2 + $0x212] sm:$0xff]  ;;  %v4946_v38 = vld [vmem:[#allocation37_spill] sm:$0xff] }
 0x250   : > { %v3743_v35 = vadd.f32 %v1574_v22, %v4942_v2  ;;  %v1568_v56 = vld [vmem:[#allocation2 + $0x232] sm:$0xff]  ;;  %v2220_v50 = vld [vmem:[#allocation2 + $0x12a] sm:$0xff]  ;;  %v1590_v43 = vmul.f32 0.0010283801, %v1560_v61  ;;  %4945 = vst [vmem:[#allocation46_spill] sm:$0xff] %v3746_v58  ;;  %v3749_v8 = vadd.f32 %v1576_v21, %v4946_v38  ;;  %v4948_v61 = vld [vmem:[#allocation49_spill] sm:$0xff] }
 0x251   : > { %v1589_v18 = vmul.f32 0.0010283801, %v2220_v50  ;;  %v2221_v1 = vld [vmem:[#allocation2 + $0x14a] sm:$0xff]  ;;  %v1569_v40 = vld [vmem:[#allocation2 + $0x252] sm:$0xff]  ;;  %v1592_v13 = vmul.f32 0.0010283801, %v1561_v27  ;;  %v3752_v11 = vadd.f32 %v1577_v5, %v4948_v61 }
 0x252   : > { %4943 = vst [vmem:[#allocation167_spill] sm:$0xff] %v3743_v35  ;;  %v1591_v4 = vmul.f32 0.0010283801, %v2221_v1  ;;  %v2222_v19 = vld [vmem:[#allocation2 + $0x16a] sm:$0xff]  ;;  %v1594_v44 = vmul.f32 0.0010283801, %v1562_v32 }
 0x253   : > { %v1593_v6 = vmul.f32 0.0010283801, %v2222_v19  ;;  %4947 = vst [vmem:[#allocation33_spill] sm:$0xff] %v3749_v8  ;;  %v1570_v22 = vld [vmem:[#allocation2 + $0x272] sm:$0xff]  ;;  %v2223_v2 = vld [vmem:[#allocation2 + $0x18a] sm:$0xff]  ;;  %v4950_v27 = vld [vmem:[#allocation57_spill] sm:$0xff] }
 0x254   : > { %v1595_v35 = vmul.f32 0.0010283801, %v2223_v2  ;;  %v1596_v34 = vmul.f32 0.0010283801, %v1563_v60  ;;  %v1597_v50 = vmul.f32 0.0010283801, %v2224_v12  ;;  %v3755_v63 = vadd.f32 %v1578_v62, %v4950_v27 }
 0x255   : > { %4949 = vst [vmem:[#allocation168_spill] sm:$0xff] %v3752_v11  ;;  %v1598_v1 = vmul.f32 0.0010283801, %v1564_v15  ;;  %v2225_v53 = vld [vmem:[#allocation2 + $0x1ca] sm:$0xff]  ;;  %v1600_v58 = vmul.f32 0.0010283801, %v1565_v20  ;;  %v3758_v2 = vadd.f32 %v1579_v30, %v4952_v3 }
 0x256   : > { %v1599_v45 = vmul.f32 0.0010283801, %v2225_v53  ;;  %4951 = vst [vmem:[#allocation64_spill] sm:$0xff] %v3755_v63  ;;  %v2226_v32 = vld [vmem:[#allocation2 + $0x1ea] sm:$0xff]  ;;  %v1602_v21 = vmul.f32 0.0010283801, %v1566_v16 }
 0x257   : > { %v1601_v19 = vmul.f32 0.0010283801, %v2226_v32  ;;  %v2227_v38 = vld [vmem:[#allocation2 + $0x20a] sm:$0xff]  ;;  %v1604_v60 = vmul.f32 0.0010283801, %v1567_v47  ;;  %v4957_v47 = vld [vmem:[#allocation20_spill] sm:$0xff] }
 0x258   : > { %v1603_v8 = vmul.f32 0.0010283801, %v2227_v38  ;;  %v2228_v12 = vld [vmem:[#allocation2 + $0x22a] sm:$0xff]  ;;  %v1606_v5 = vmul.f32 0.0010283801, %v1568_v56  ;;  %v4955_v38 = vld [vmem:[#allocation100_spill] sm:$0xff]  ;;  %v3773_v56 = vadd.f32 %v1584_v55, %v4957_v47 }
 0x259   : > { %v1605_v14 = vmul.f32 0.0010283801, %v2228_v12  ;;  %v4953_v61 = vld [vmem:[#allocation98_spill] sm:$0xff]  ;;  %v1608_v11 = vmul.f32 0.0010283801, %v1569_v40  ;;  %v4954_v63 = vld [vmem:[#allocation99_spill] sm:$0xff]  ;;  %v3767_v52 = vadd.f32 %v1582_v23, %v4955_v38 }
 0x25a   : > { %v3761_v15 = vadd.f32 %v1580_v36, %v4953_v61  ;;  %v2229_v53 = vld [vmem:[#allocation2 + $0x24a] sm:$0xff]  ;;  %v3764_v32 = vadd.f32 %v1581_v26, %v4954_v63  ;;  %v1610_v16 = vmul.f32 0.0010283801, %v1570_v22  ;;  %v4958_v36 = vld [vmem:[#allocation36_spill] sm:$0xff]  ;;  %v4964_v55 = vld [vmem:[#allocation101_spill] sm:$0xff] }
 0x25b   : > { %v1607_v20 = vmul.f32 0.0010283801, %v2229_v53  ;;  %v2230_v62 = vld [vmem:[#allocation2 + $0x26a] sm:$0xff]  ;;  %v3776_v12 = vadd.f32 %v1585_v57, %v4958_v36  ;;  %v4962_v23 = vld [vmem:[#allocation52_spill] sm:$0xff] }
 0x25c   : > { %v1609_v27 = vmul.f32 0.0010283801, %v2230_v62  ;;  %v4956_v3 = vld [vmem:[#allocation19_spill] sm:$0xff]  ;;  %v4959_v61 = vld [vmem:[#allocation38_spill] sm:$0xff]  ;;  %v3788_v22 = vadd.f32 %v1589_v18, %v4962_v23 }
 0x25d   : > { %v3770_v30 = vadd.f32 %v1583_v42, %v4956_v3  ;;  %v3779_v40 = vadd.f32 %v1586_v17, %v4959_v61  ;;  %v4960_v53 = vld [vmem:[#allocation66_spill] sm:$0xff]  ;;  %v3794_v3 = vadd.f32 %v1591_v4, %v4964_v55  ;;  %v4966_v17 = vld [vmem:[#allocation21_spill] sm:$0xff] }
 0x25e   : > { %v3782_v62 = vadd.f32 %v1587_v46, %v4960_v53  ;;  %v4961_v63 = vld [vmem:[#allocation70_spill] sm:$0xff]  ;;  %v3800_v36 = vadd.f32 %v1593_v6, %v4966_v17  ;;  %v4967_v46 = vld [vmem:[#allocation31_spill] sm:$0xff] }
 0x25f   : > { %v3785_v26 = vadd.f32 %v1588_v10, %v4961_v63  ;;  %v4963_v42 = vld [vmem:[#allocation58_spill] sm:$0xff]  ;;  %v3803_v61 = vadd.f32 %v1594_v44, %v4967_v46  ;;  %v4968_v10 = vld [vmem:[#allocation51_spill] sm:$0xff]  ;;  %v4974_v44 = vld [vmem:[#allocation104_spill] sm:$0xff] }
 0x260   : > { %v3791_v38 = vadd.f32 %v1590_v43, %v4963_v42  ;;  %v4965_v57 = vld [vmem:[#allocation102_spill] sm:$0xff]  ;;  %v3806_v53 = vadd.f32 %v1595_v35, %v4968_v10  ;;  %v4970_v43 = vld [vmem:[#allocation39_spill] sm:$0xff]  ;;  %v3824_v17 = vadd.f32 %v1601_v19, %v4974_v44  ;;  %v4975_v35 = vld [vmem:[#allocation105_spill] sm:$0xff] }
 0x261   : > { %v3797_v47 = vadd.f32 %v1592_v13, %v4965_v57  ;;  %v4969_v18 = vld [vmem:[#allocation62_spill] sm:$0xff]  ;;  %v3812_v23 = vadd.f32 %v1597_v50, %v4970_v43  ;;  %v4972_v13 = vld [vmem:[#allocation75_spill] sm:$0xff]  ;;  %v3827_v46 = vadd.f32 %v1602_v21, %v4975_v35 }
 0x262   : > { %v3809_v63 = vadd.f32 %v1596_v34, %v4969_v18  ;;  %v4971_v4 = vld [vmem:[#allocation50_spill] sm:$0xff]  ;;  %v3818_v55 = vadd.f32 %v1599_v45, %v4972_v13  ;;  %v4973_v6 = vld [vmem:[#allocation103_spill] sm:$0xff]  ;;  %v4976_v34 = vld [vmem:[#allocation40_spill] sm:$0xff] }
 0x263   : > { %v3815_v42 = vadd.f32 %v1598_v1, %v4971_v4  ;;  %v3821_v57 = vadd.f32 %v1600_v58, %v4973_v6  ;;  %v3830_v10 = vadd.f32 %v1603_v8, %v4976_v34  ;;  %v4977_v50 = vld [vmem:[#allocation42_spill] sm:$0xff]  ;;  %v4978_v1 = vld [vmem:[#allocation59_spill] sm:$0xff]  ;;  %v4979_v45 = vld [vmem:[#allocation60_spill] sm:$0xff] }
 0x264   : > { %v3833_v18 = vadd.f32 %v1604_v60, %v4977_v50  ;;  %v3836_v43 = vadd.f32 %v1605_v14, %v4978_v1  ;;  %v3839_v4 = vadd.f32 %v1606_v5, %v4979_v45  ;;  %v4980_v58 = vld [vmem:[#allocation65_spill] sm:$0xff]  ;;  %v4981_v19 = vld [vmem:[#allocation106_spill] sm:$0xff]  ;;  %v4982_v21 = vld [vmem:[#allocation107_spill] sm:$0xff]  ;;  %v3855_v60 = vadd.f32 %v3602_v39, %v3477_v37 }
 0x265   : > { %v3842_v13 = vadd.f32 %v1607_v20, %v4980_v58  ;;  %v3845_v6 = vadd.f32 %v1608_v11, %v4981_v19  ;;  %v3848_v44 = vadd.f32 %v1609_v27, %v4982_v21  ;;  %v4983_v8 = vld [vmem:[#allocation108_spill] sm:$0xff]  ;;  %v3859_v14 = vadd.f32 %v3595_v24, %v3480_v33  ;;  %v4986_v39 = vld [vmem:[#allocation73_spill] sm:$0xff]  ;;  %v4998_v34 = vld [vmem:[#allocation34_spill] sm:$0xff] }
 0x266   : > { %v3851_v35 = vadd.f32 %v1610_v16, %v4983_v8  ;;  %v3863_v5 = vadd.f32 %v3605_v28, %v3483_v51  ;;  %v3867_v11 = vadd.f32 %v3599_v7, %v3486_v59  ;;  %v3871_v20 = vadd.f32 %v3608_v25, %v3489_v54  ;;  %v4984_v28 = vld [vmem:[#allocation69_spill] sm:$0xff]  ;;  %v4985_v59 = vld [vmem:[#allocation146_spill] sm:$0xff]  ;;  %v4995_v16 = vld [vmem:[#allocation95_spill] sm:$0xff] }
 0x267   : > { %v3875_v37 = vadd.f32 %v3612_v41, %v3492_v48  ;;  %v3879_v33 = vadd.f32 %v3615_v0, %v3495_v9  ;;  %v3883_v51 = vadd.f32 %v3619_v31, %v3498_v29  ;;  %v3887_v7 = vadd.f32 %v4984_v28, %v3501_v49  ;;  %v4988_v24 = vld [vmem:[#allocation149_spill] sm:$0xff]  ;;  %v4991_v41 = vld [vmem:[#allocation150_spill] sm:$0xff]  ;;  %v4994_v0 = vld [vmem:[#allocation152_spill] sm:$0xff] }
 0x268   : > { %v3891_v54 = vadd.f32 %v4986_v39, %v4985_v59  ;;  %v4989_v25 = vld [vmem:[#allocation77_spill] sm:$0xff]  ;;  %v3903_v29 = vadd.f32 %v4995_v16, %v4994_v0  ;;  %v4997_v31 = vld [vmem:[#allocation154_spill] sm:$0xff]  ;;  %v5000_v50 = vld [vmem:[#allocation155_spill] sm:$0xff] }
 0x269   : > { %v3895_v48 = vadd.f32 %v4989_v25, %v4988_v24  ;;  %v4992_v27 = vld [vmem:[#allocation81_spill] sm:$0xff]  ;;  %v3907_v49 = vadd.f32 %v4998_v34, %v4997_v31  ;;  %v5001_v1 = vld [vmem:[#allocation16_spill] sm:$0xff]  ;;  %v5004_v19 = vld [vmem:[#allocation54_spill] sm:$0xff] }
 0x26a   : > { %4987 = vst [vmem:[#allocation151_spill] sm:$0xff] %v3891_v54  ;;  %v3899_v9 = vadd.f32 %v4992_v27, %v4991_v41  ;;  %v3911_v45 = vadd.f32 %v5001_v1, %v5000_v50  ;;  %v5003_v58 = vld [vmem:[#allocation156_spill] sm:$0xff]  ;;  %v5006_v8 = vld [vmem:[#allocation157_spill] sm:$0xff]  ;;  %v5009_v39 = vld [vmem:[#allocation158_spill] sm:$0xff] }
 0x26b   : > { %4990 = vst [vmem:[#allocation153_spill] sm:$0xff] %v3895_v48  ;;  %v3915_v21 = vadd.f32 %v5004_v19, %v5003_v58  ;;  %v5007_v28 = vld [vmem:[#allocation44_spill] sm:$0xff]  ;;  %v5010_v24 = vld [vmem:[#allocation10_spill] sm:$0xff]  ;;  %v5012_v41 = vld [vmem:[#allocation159_spill] sm:$0xff] }
 0x26c   : > { %4993 = vst [vmem:[#allocation87_spill] sm:$0xff] %v3899_v9  ;;  %v3919_v59 = vadd.f32 %v5007_v28, %v5006_v8  ;;  %v3923_v25 = vadd.f32 %v5010_v24, %v5009_v39  ;;  %v5013_v27 = vld [vmem:[#allocation24_spill] sm:$0xff]  ;;  %v5016_v31 = vld [vmem:[#allocation71_spill] sm:$0xff]  ;;  %v5018_v50 = vld [vmem:[#allocation142_spill] sm:$0xff] }
 0x26d   : > { %4996 = vst [vmem:[#allocation68_spill] sm:$0xff] %v3903_v29  ;;  %v3927_v0 = vadd.f32 %v5013_v27, %v5012_v41  ;;  %v5015_v16 = vld [vmem:[#allocation160_spill] sm:$0xff]  ;;  %v5019_v1 = vld [vmem:[#allocation79_spill] sm:$0xff]  ;;  %v5024_v28 = vld [vmem:[#allocation161_spill] sm:$0xff] }
 0x26e   : > { %4999 = vst [vmem:[#allocation169_spill] sm:$0xff] %v3907_v49  ;;  %v3931_v34 = vadd.f32 %v5016_v31, %v5015_v16  ;;  %v3935_v58 = vadd.f32 %v5019_v1, %v5018_v50  ;;  %v5021_v19 = vld [vmem:[#allocation143_spill] sm:$0xff]  ;;  %v5027_v24 = vld [vmem:[#allocation82_spill] sm:$0xff]  ;;  %v5030_v27 = vld [vmem:[#allocation13_spill] sm:$0xff] }
 0x26f   : > { %5002 = vst [vmem:[#allocation96_spill] sm:$0xff] %v3911_v45  ;;  %v5033_v31 = vld [vmem:[#allocation22_spill] sm:$0xff]  ;;  %v5081_v49 = vld [vmem:[#allocation112_spill] sm:$0xff]  ;;  %v5091_v54 = vld [vmem:[#allocation117_spill] sm:$0xff] }
 0x270   : > { %5005 = vst [vmem:[#allocation88_spill] sm:$0xff] %v3915_v21  ;;  %v5022_v21 = vld [vmem:[#allocation72_spill] sm:$0xff]  ;;  %v5036_v1 = vld [vmem:[#allocation30_spill] sm:$0xff] }
 0x271   : > { %5008 = vst [vmem:[#allocation170_spill] sm:$0xff] %v3919_v59  ;;  %v3939_v8 = vadd.f32 %v5022_v21, %v5021_v19  ;;  %v5025_v59 = vld [vmem:[#allocation78_spill] sm:$0xff]  ;;  %v5039_v19 = vld [vmem:[#allocation41_spill] sm:$0xff]  ;;  %v5089_v48 = vld [vmem:[#allocation116_spill] sm:$0xff] }
 0x272   : > { %5011 = vst [vmem:[#allocation28_spill] sm:$0xff] %v3923_v25  ;;  %v3943_v39 = vadd.f32 %v5025_v59, %v5024_v28  ;;  %v5028_v25 = vld [vmem:[#allocation84_spill] sm:$0xff]  ;;  %v5084_v29 = vld [vmem:[#allocation46_spill] sm:$0xff] }
 0x273   : > { %5014 = vst [vmem:[#allocation27_spill] sm:$0xff] %v3927_v0  ;;  %v3947_v41 = vadd.f32 %v5028_v25, %v5027_v24  ;;  %v5031_v0 = vld [vmem:[#allocation83_spill] sm:$0xff]  ;;  %v5042_v28 = vld [vmem:[#allocation144_spill] sm:$0xff]  ;;  %v5045_v24 = vld [vmem:[#allocation145_spill] sm:$0xff] }
 0x274   : > { %5017 = vst [vmem:[#allocation171_spill] sm:$0xff] %v3931_v34  ;;  %v3951_v16 = vadd.f32 %v5031_v0, %v5030_v27  ;;  %v5034_v34 = vld [vmem:[#allocation162_spill] sm:$0xff]  ;;  %v5048_v27 = vld [vmem:[#allocation67_spill] sm:$0xff] }
 0x275   : > { %5020 = vst [vmem:[#allocation48_spill] sm:$0xff] %v3935_v58  ;;  %v3955_v50 = vadd.f32 %v5034_v34, %v5033_v31  ;;  %v5037_v58 = vld [vmem:[#allocation17_spill] sm:$0xff]  ;;  %v5051_v31 = vld [vmem:[#allocation76_spill] sm:$0xff] }
 0x276   : > { %5023 = vst [vmem:[#allocation47_spill] sm:$0xff] %v3939_v8  ;;  %v3959_v21 = vadd.f32 %v5037_v58, %v5036_v1  ;;  %v5040_v8 = vld [vmem:[#allocation11_spill] sm:$0xff]  ;;  %v5054_v1 = vld [vmem:[#allocation80_spill] sm:$0xff] }
 0x277   : > { %5026 = vst [vmem:[#allocation172_spill] sm:$0xff] %v3943_v39  ;;  %v3963_v59 = vadd.f32 %v5040_v8, %v5039_v19  ;;  %v5043_v39 = vld [vmem:[#allocation163_spill] sm:$0xff]  ;;  %v5057_v19 = vld [vmem:[#allocation93_spill] sm:$0xff] }
 0x278   : > { %5029 = vst [vmem:[#allocation89_spill] sm:$0xff] %v3947_v41  ;;  %v3967_v25 = vadd.f32 %v5043_v39, %v5042_v28  ;;  %v5046_v41 = vld [vmem:[#allocation35_spill] sm:$0xff] }
 0x279   : > { %5032 = vst [vmem:[#allocation56_spill] sm:$0xff] %v3951_v16  ;;  %v3971_v0 = vadd.f32 %v5046_v41, %v5045_v24  ;;  %v5049_v16 = vld [vmem:[#allocation25_spill] sm:$0xff]  ;;  %v5060_v28 = vld [vmem:[#allocation15_spill] sm:$0xff] }
 0x27a   : > { %5035 = vst [vmem:[#allocation173_spill] sm:$0xff] %v3955_v50  ;;  %v3975_v34 = vadd.f32 %v5049_v16, %v5048_v27  ;;  %v5052_v50 = vld [vmem:[#allocation164_spill] sm:$0xff]  ;;  %v5063_v24 = vld [vmem:[#allocation23_spill] sm:$0xff] }
 0x27b   : > { %5038 = vst [vmem:[#allocation91_spill] sm:$0xff] %v3959_v21  ;;  %v3979_v58 = vadd.f32 %v5052_v50, %v5051_v31  ;;  %v5055_v21 = vld [vmem:[#allocation55_spill] sm:$0xff]  ;;  %v5066_v27 = vld [vmem:[#allocation32_spill] sm:$0xff] }
 0x27c   : > { %5041 = vst [vmem:[#allocation90_spill] sm:$0xff] %v3963_v59  ;;  %v3983_v8 = vadd.f32 %v5055_v21, %v5054_v1  ;;  %v5058_v59 = vld [vmem:[#allocation45_spill] sm:$0xff]  ;;  %v5069_v31 = vld [vmem:[#allocation43_spill] sm:$0xff] }
 0x27d   : > { %5044 = vst [vmem:[#allocation174_spill] sm:$0xff] %v3967_v25  ;;  %v3987_v39 = vadd.f32 %v5058_v59, %v5057_v19  ;;  %v5061_v25 = vld [vmem:[#allocation165_spill] sm:$0xff] }
 0x27e   : > { %5047 = vst [vmem:[#allocation97_spill] sm:$0xff] %v3971_v0  ;;  %v3991_v41 = vadd.f32 %v5061_v25, %v5060_v28  ;;  %v5064_v0 = vld [vmem:[#allocation74_spill] sm:$0xff]  ;;  %v5072_v1 = vld [vmem:[#allocation53_spill] sm:$0xff] }
 0x27f   : > { %5050 = vst [vmem:[#allocation92_spill] sm:$0xff] %v3975_v34  ;;  %v3995_v16 = vadd.f32 %v5064_v0, %v5063_v24  ;;  %v5067_v34 = vld [vmem:[#allocation147_spill] sm:$0xff]  ;;  %v5075_v19 = vld [vmem:[#allocation109_spill] sm:$0xff]  ;;  %v5077_v28 = vld [vmem:[#allocation110_spill] sm:$0xff] }
 0x280   : > { %5053 = vst [vmem:[#allocation175_spill] sm:$0xff] %v3979_v58  ;;  %v3999_v50 = vadd.f32 %v5067_v34, %v5066_v27  ;;  %v5070_v58 = vld [vmem:[#allocation148_spill] sm:$0xff]  ;;  %v5079_v0 = vld [vmem:[#allocation111_spill] sm:$0xff]  ;;  %v5080_v24 = vld [vmem:[#allocation14_spill] sm:$0xff] }
 0x281   : > { %5056 = vst [vmem:[#allocation61_spill] sm:$0xff] %v3983_v8  ;;  %v4003_v21 = vadd.f32 %v5070_v58, %v5069_v31  ;;  %v5073_v8 = vld [vmem:[#allocation86_spill] sm:$0xff]  ;;  %v5082_v34 = vld [vmem:[#allocation167_spill] sm:$0xff] }
 0x282   : > { %5059 = vst [vmem:[#allocation63_spill] sm:$0xff] %v3987_v39  ;;  %v4007_v59 = vadd.f32 %v5073_v8, %v5072_v1  ;;  %v5076_v39 = vld [vmem:[#allocation166_spill] sm:$0xff]  ;;  %v1694_v27 = vadd.f32 %v5082_v34, %v5081_v49  ;;  %v5087_v8 = vld [vmem:[#allocation115_spill] sm:$0xff]  ;;  %v5088_v1 = vld [vmem:[#allocation168_spill] sm:$0xff] }
 0x283   : > { %5062 = vst [vmem:[#allocation12_spill] sm:$0xff] %v3991_v41  ;;  %v1691_v25 = vadd.f32 %v5076_v39, %v5075_v19  ;;  %v5078_v41 = vld [vmem:[#allocation26_spill] sm:$0xff]  ;;  %v5090_v39 = vld [vmem:[#allocation64_spill] sm:$0xff] }
 0x284   : > { %5065 = vst [vmem:[#allocation18_spill] sm:$0xff] %v3995_v16  ;;  %v1692_v45 = vadd.f32 %v5078_v41, %v5077_v28  ;;  %v1693_v16 = vadd.f32 %v5080_v24, %v5079_v0  ;;  %v5085_v31 = vld [vmem:[#allocation114_spill] sm:$0xff]  ;;  %v1698_v19 = vadd.f32 %v5090_v39, %v5089_v48  ;;  %v1699_v41 = vadd.f32 %v3758_v2, %v5091_v54  ;;  %v5093_v24 = vld [vmem:[#allocation119_spill] sm:$0xff]  ;;  %v5094_v34 = vld [vmem:[#allocation120_spill] sm:$0xff] }
 0x285   : > { %5068 = vst [vmem:[#allocation29_spill] sm:$0xff] %v3999_v50  ;;  %v5083_v50 = vld [vmem:[#allocation113_spill] sm:$0xff]  ;;  %v5092_v28 = vld [vmem:[#allocation118_spill] sm:$0xff]  ;;  %v1701_v49 = vadd.f32 %v3764_v32, %v5093_v24  ;;  %v5098_v39 = vld [vmem:[#allocation124_spill] sm:$0xff] }
 0x286   : > { %5071 = vst [vmem:[#allocation37_spill] sm:$0xff] %v4003_v21  ;;  %v1695_v58 = vadd.f32 %v5084_v29, %v5083_v50  ;;  %v5086_v21 = vld [vmem:[#allocation33_spill] sm:$0xff]  ;;  %v1700_v0 = vadd.f32 %v3761_v15, %v5092_v28  ;;  %v1702_v29 = vadd.f32 %v3767_v52, %v5094_v34  ;;  %v1706_v2 = vadd.f32 %v3779_v40, %v5098_v39  ;;  %v5100_v28 = vld [vmem:[#allocation126_spill] sm:$0xff]  ;;  %v5101_v24 = vld [vmem:[#allocation176_spill] sm:$0xff] }
 0x287   : > { %5074 = vst [vmem:[#allocation49_spill] sm:$0xff] %v4007_v59  ;;  %v1696_v9 = vadd.f32 %v5086_v21, %v5085_v31  ;;  %v1697_v59 = vadd.f32 %v5088_v1, %v5087_v8  ;;  %v5095_v50 = vld [vmem:[#allocation121_spill] sm:$0xff]  ;;  %v5096_v31 = vld [vmem:[#allocation122_spill] sm:$0xff]  ;;  %v5097_v1 = vld [vmem:[#allocation123_spill] sm:$0xff]  ;;  %v1708_v32 = vadd.f32 %v3785_v26, %v5100_v28  ;;  %v1709_v52 = vadd.f32 %v3788_v22, %v5101_v24 }
 0x288   : > { %v1703_v21 = vadd.f32 %v3770_v30, %v5095_v50  ;;  %v1704_v8 = vadd.f32 %v3773_v56, %v5096_v31  ;;  %v1705_v48 = vadd.f32 %v3776_v12, %v5097_v1  ;;  %v5099_v54 = vld [vmem:[#allocation125_spill] sm:$0xff]  ;;  %v5102_v34 = vld [vmem:[#allocation127_spill] sm:$0xff]  ;;  %v5103_v50 = vld [vmem:[#allocation128_spill] sm:$0xff] }
 0x289   : > { %v1707_v15 = vadd.f32 %v3782_v62, %v5099_v54  ;;  %v1710_v30 = vadd.f32 %v3791_v38, %v5102_v34  ;;  %v1711_v56 = vadd.f32 %v3794_v3, %v5103_v50  ;;  %v5104_v31 = vld [vmem:[#allocation177_spill] sm:$0xff]  ;;  %v5105_v1 = vld [vmem:[#allocation178_spill] sm:$0xff]  ;;  %v5106_v39 = vld [vmem:[#allocation179_spill] sm:$0xff] }
 0x28a   : > { %v1712_v12 = vadd.f32 %v3797_v47, %v5104_v31  ;;  %v1713_v40 = vadd.f32 %v3800_v36, %v5105_v1  ;;  %v1714_v62 = vadd.f32 %v3803_v61, %v5106_v39  ;;  %v5107_v54 = vld [vmem:[#allocation180_spill] sm:$0xff]  ;;  %v5108_v28 = vld [vmem:[#allocation129_spill] sm:$0xff]  ;;  %v5110_v34 = vld [vmem:[#allocation130_spill] sm:$0xff] }
 0x28b   : > { %v1715_v26 = vadd.f32 %v3806_v53, %v5107_v54  ;;  %v1716_v22 = vadd.f32 %v3809_v63, %v5108_v28  ;;  %v5109_v24 = vld [vmem:[#allocation181_spill] sm:$0xff]  ;;  %v1718_v3 = vadd.f32 %v3815_v42, %v5110_v34  ;;  %v5111_v50 = vld [vmem:[#allocation131_spill] sm:$0xff]  ;;  %v5112_v31 = vld [vmem:[#allocation132_spill] sm:$0xff] }
 0x28c   : > { %v1717_v38 = vadd.f32 %v3812_v23, %v5109_v24  ;;  %v1719_v47 = vadd.f32 %v3818_v55, %v5111_v50  ;;  %v1720_v36 = vadd.f32 %v3821_v57, %v5112_v31  ;;  %v5113_v1 = vld [vmem:[#allocation133_spill] sm:$0xff]  ;;  %v5114_v39 = vld [vmem:[#allocation134_spill] sm:$0xff]  ;;  %v5115_v54 = vld [vmem:[#allocation135_spill] sm:$0xff] }
 0x28d   : > { %v1721_v61 = vadd.f32 %v3824_v17, %v5113_v1  ;;  %v1722_v53 = vadd.f32 %v3827_v46, %v5114_v39  ;;  %v1723_v63 = vadd.f32 %v3830_v10, %v5115_v54  ;;  %v5116_v28 = vld [vmem:[#allocation136_spill] sm:$0xff]  ;;  %v5117_v24 = vld [vmem:[#allocation137_spill] sm:$0xff]  ;;  %v5118_v34 = vld [vmem:[#allocation138_spill] sm:$0xff] }
 0x28e   : > { %v1724_v23 = vadd.f32 %v3833_v18, %v5116_v28  ;;  %v1725_v42 = vadd.f32 %v3836_v43, %v5117_v24  ;;  %v1726_v55 = vadd.f32 %v3839_v4, %v5118_v34  ;;  %v5119_v50 = vld [vmem:[#allocation139_spill] sm:$0xff]  ;;  %v5120_v31 = vld [vmem:[#allocation140_spill] sm:$0xff]  ;;  %v5121_v1 = vld [vmem:[#allocation141_spill] sm:$0xff]  ;;  %v1732_v28 = vadd.f32 %v1692_v45, %v3855_v60 }
 0x28f   : > { %v1727_v57 = vadd.f32 %v3842_v13, %v5119_v50  ;;  %v1728_v17 = vadd.f32 %v3845_v6, %v5120_v31  ;;  %v1729_v46 = vadd.f32 %v3848_v44, %v5121_v1  ;;  %v5122_v39 = vld [vmem:[#allocation182_spill] sm:$0xff]  ;;  %v5123_v54 = vld [vmem:[#allocation85_spill] sm:$0xff]  ;;  %v1733_v43 = vadd.f32 %v1693_v16, %v3859_v14  ;;  %v5124_v50 = vld [vmem:[#allocation151_spill] sm:$0xff] }
 0x290   : > { %v1730_v10 = vadd.f32 %v3851_v35, %v5122_v39  ;;  %v1731_v18 = vadd.f32 %v1691_v25, %v5123_v54  ;;  %v1734_v4 = vadd.f32 %v1694_v27, %v3863_v5  ;;  %v1735_v24 = vadd.f32 %v1695_v58, %v3867_v11  ;;  %v5125_v31 = vld [vmem:[#allocation153_spill] sm:$0xff]  ;;  %v5126_v45 = vld [vmem:[#allocation87_spill] sm:$0xff]  ;;  %v5127_v16 = vld [vmem:[#allocation68_spill] sm:$0xff] }
 0x291   : > { %v1736_v13 = vadd.f32 %v1696_v9, %v3871_v20  ;;  %v1737_v6 = vadd.f32 %v1697_v59, %v3875_v37  ;;  %v1738_v34 = vadd.f32 %v1698_v19, %v3879_v33  ;;  %v1739_v44 = vadd.f32 %v1699_v41, %v3883_v51  ;;  %v5128_v27 = vld [vmem:[#allocation169_spill] sm:$0xff]  ;;  %v5129_v58 = vld [vmem:[#allocation96_spill] sm:$0xff]  ;;  %v5131_v33 = vld [vmem:[#allocation170_spill] sm:$0xff] }
 0x292   : > { %v1740_v35 = vadd.f32 %v1700_v0, %v3887_v7  ;;  %v1741_v25 = vadd.f32 %v1701_v49, %v5124_v50  ;;  %v1742_v60 = vadd.f32 %v1702_v29, %v5125_v31  ;;  %v1743_v14 = vadd.f32 %v1703_v21, %v5126_v45  ;;  %v5130_v9 = vld [vmem:[#allocation88_spill] sm:$0xff]  ;;  %v5133_v19 = vld [vmem:[#allocation27_spill] sm:$0xff] }
 0x293   : > { %v1744_v5 = vadd.f32 %v1704_v8, %v5127_v16  ;;  %v1745_v11 = vadd.f32 %v1705_v48, %v5128_v27  ;;  %v1746_v20 = vadd.f32 %v1706_v2, %v5129_v58  ;;  %v4106_v37 = vadd.f32 %v1707_v15, %v5130_v9  ;;  %v5132_v51 = vld [vmem:[#allocation28_spill] sm:$0xff]  ;;  %v5134_v0 = vld [vmem:[#allocation171_spill] sm:$0xff] }
 0x294   : > { %v4109_v59 = vadd.f32 %v1708_v32, %v5131_v33  ;;  %v4112_v7 = vadd.f32 %v1709_v52, %v5132_v51  ;;  %v4115_v41 = vadd.f32 %v1710_v30, %v5133_v19  ;;  %v4118_v49 = vadd.f32 %v1711_v56, %v5134_v0  ;;  %v5135_v29 = vld [vmem:[#allocation48_spill] sm:$0xff]  ;;  %v5136_v8 = vld [vmem:[#allocation47_spill] sm:$0xff]  ;;  %v5138_v32 = vld [vmem:[#allocation89_spill] sm:$0xff] }
 0x295   : > { %v4121_v21 = vadd.f32 %v1712_v12, %v5135_v29  ;;  %v4124_v48 = vadd.f32 %v1713_v40, %v5136_v8  ;;  %v5137_v2 = vld [vmem:[#allocation172_spill] sm:$0xff]  ;;  %v4130_v1 = vadd.f32 %v1715_v26, %v5138_v32  ;;  %v5140_v30 = vld [vmem:[#allocation173_spill] sm:$0xff]  ;;  %v5141_v56 = vld [vmem:[#allocation91_spill] sm:$0xff]  ;;  %v4185_v32 = vmul.f32 %v1735_v24, %v1735_v24 }
 0x296   : > { %v4127_v15 = vadd.f32 %v1714_v62, %v5137_v2  ;;  %v5139_v52 = vld [vmem:[#allocation56_spill] sm:$0xff]  ;;  %v4136_v54 = vadd.f32 %v1717_v38, %v5140_v30  ;;  %v4139_v50 = vadd.f32 %v1718_v3, %v5141_v56  ;;  %v5142_v12 = vld [vmem:[#allocation90_spill] sm:$0xff]  ;;  %v5144_v62 = vld [vmem:[#allocation97_spill] sm:$0xff]  ;;  %v4179_v2 = vmul.f32 %v1732_v28, %v1732_v28 }
 0x297   : > { %v4133_v39 = vadd.f32 %v1716_v22, %v5139_v52  ;;  %v4142_v31 = vadd.f32 %v1719_v47, %v5142_v12  ;;  %v5143_v40 = vld [vmem:[#allocation174_spill] sm:$0xff]  ;;  %v4148_v16 = vadd.f32 %v1721_v61, %v5144_v62  ;;  %v5145_v26 = vld [vmem:[#allocation92_spill] sm:$0xff]  ;;  %v5146_v22 = vld [vmem:[#allocation175_spill] sm:$0xff]  ;;  %v4191_v52 = vmul.f32 %v1738_v34, %v1738_v34 }
 0x298   : > { %v4145_v45 = vadd.f32 %v1720_v36, %v5143_v40  ;;  %v4151_v27 = vadd.f32 %v1722_v53, %v5145_v26  ;;  %v4154_v58 = vadd.f32 %v1723_v63, %v5146_v22  ;;  %v5147_v38 = vld [vmem:[#allocation61_spill] sm:$0xff]  ;;  %v5148_v3 = vld [vmem:[#allocation63_spill] sm:$0xff]  ;;  %v5149_v47 = vld [vmem:[#allocation12_spill] sm:$0xff]  ;;  %v1780_v30 = vmul.f32 %v1740_v35, %v1740_v35 }
 0x299   : > { %v4157_v9 = vadd.f32 %v1724_v23, %v5147_v38  ;;  %v4160_v33 = vadd.f32 %v1725_v42, %v5148_v3  ;;  %v4163_v51 = vadd.f32 %v1726_v55, %v5149_v47  ;;  %v5150_v36 = vld [vmem:[#allocation18_spill] sm:$0xff]  ;;  %v5151_v61 = vld [vmem:[#allocation29_spill] sm:$0xff]  ;;  %v4177_v23 = vmul.f32 %v1731_v18, %v1731_v18 }
 0x29a   : > { %v4166_v19 = vadd.f32 %v1727_v57, %v5150_v36  ;;  %v4169_v0 = vadd.f32 %v1728_v17, %v5151_v61  ;;  %v5152_v53 = vld [vmem:[#allocation37_spill] sm:$0xff]  ;;  %v4181_v42 = vmul.f32 %v1733_v43, %v1733_v43  ;;  %v4183_v55 = vmul.f32 %v1734_v4, %v1734_v4 }
 0x29b   : > { %v4172_v29 = vadd.f32 %v1729_v46, %v5152_v53  ;;  %v5153_v63 = vld [vmem:[#allocation49_spill] sm:$0xff]  ;;  %v4187_v57 = vmul.f32 %v1736_v13, %v1736_v13  ;;  %v4189_v17 = vmul.f32 %v1737_v6, %v1737_v6  ;;  %v1779_v46 = vmul.f32 %v1739_v44, %v1739_v44 }
 0x29c   : > { %v4175_v8 = vadd.f32 %v1730_v10, %v5153_v63  ;;  %v4193_v10 = vmul.f32 %v1741_v25, %v1741_v25  ;;  %v4195_v56 = vmul.f32 %v1742_v60, %v1742_v60  ;;  %v4197_v12 = vmul.f32 %v1743_v14, %v1743_v14 }
 0x29d   : > { %v4199_v40 = vmul.f32 %v1744_v5, %v1744_v5  ;;  %v4201_v62 = vmul.f32 %v1745_v11, %v1745_v11  ;;  %v4203_v26 = vmul.f32 %v1746_v20, %v1746_v20  ;;  %v4205_v22 = vmul.f32 %v1739_v44, %v1731_v18 }
 0x29e   : > { %5154 = vst [vmem:[#allocation57_spill] sm:$0xff] %v4175_v8  ;;  %v4207_v38 = vmul.f32 %v1740_v35, %v1732_v28  ;;  %v4209_v3 = vmul.f32 %v1741_v25, %v1733_v43  ;;  %v4211_v47 = vmul.f32 %v1742_v60, %v1734_v4  ;;  %v4213_v36 = vmul.f32 %v1743_v14, %v1735_v24 }
 0x29f   : > { %v4215_v61 = vmul.f32 %v1744_v5, %v1736_v13  ;;  %v4217_v53 = vmul.f32 %v1745_v11, %v1737_v6  ;;  %v4219_v63 = vmul.f32 %v1746_v20, %v1738_v34  ;;  %v1795_v8 = vsub.f32 %v4106_v37, %v4177_v23 }
 0x2a0   : > { %v1796_v18 = vsub.f32 %v4109_v59, %v4179_v2  ;;  %v1797_v28 = vsub.f32 %v4112_v7, %v4181_v42  ;;  %v1798_v43 = vsub.f32 %v4115_v41, %v4183_v55  ;;  %v1799_v4 = vsub.f32 %v4118_v49, %v4185_v32 }
 0x2a1   : > { %v1800_v24 = vsub.f32 %v4121_v21, %v4187_v57  ;;  %v1801_v13 = vsub.f32 %v4124_v48, %v4189_v17  ;;  %v1802_v6 = vsub.f32 %v4127_v15, %v4191_v52  ;;  %v1803_v34 = vsub.f32 %v4130_v1, %v1779_v46 }
 0x2a2   : > { %v1804_v44 = vsub.f32 %v4133_v39, %v1780_v30  ;;  %v1805_v35 = vsub.f32 %v4136_v54, %v4193_v10  ;;  %v1806_v25 = vsub.f32 %v4139_v50, %v4195_v56  ;;  %v1807_v60 = vsub.f32 %v4142_v31, %v4197_v12 }
 0x2a3   : > { %v1808_v14 = vsub.f32 %v4145_v45, %v4199_v40  ;;  %v1809_v5 = vsub.f32 %v4148_v16, %v4201_v62  ;;  %v1810_v11 = vsub.f32 %v4151_v27, %v4203_v26  ;;  %v1811_v20 = vsub.f32 %v4154_v58, %v4205_v22 }
 0x2a4   : > { %v1812_v37 = vsub.f32 %v4157_v9, %v4207_v38  ;;  %v1813_v59 = vsub.f32 %v4160_v33, %v4209_v3  ;;  %v1819_v21 = vmul.f32 2.0, %v4205_v22  ;;  %v1859_v39 = vadd.f32 %v1779_v46, %v4177_v23 }
 0x2a5   : > { %v5155_v15 = vld [vmem:[#allocation57_spill] sm:$0xff]  ;;  %v1860_v54 = vadd.f32 %v1780_v30, %v4179_v2  ;;  %v1820_v50 = vmul.f32 2.0, %v4207_v38  ;;  %v1821_v31 = vmul.f32 2.0, %v4209_v3  ;;  %v1861_v45 = vadd.f32 %v4193_v10, %v4181_v42 }
 0x2a6   : > { %v1862_v16 = vadd.f32 %v4195_v56, %v4183_v55  ;;  %v1822_v27 = vmul.f32 2.0, %v4211_v47  ;;  %v1823_v58 = vmul.f32 2.0, %v4213_v36  ;;  %v1824_v9 = vmul.f32 2.0, %v4215_v61 }
 0x2a7   : > { %v1863_v33 = vadd.f32 %v4197_v12, %v4185_v32  ;;  %v1825_v23 = vmul.f32 2.0, %v4217_v53  ;;  %v4283_v2 = vmul.f32 2.0, %v4219_v63  ;;  %v4285_v46 = vadd.f32 0.0001, %v1819_v21 }
 0x2a8   : > { %v1864_v42 = vadd.f32 %v4199_v40, %v4187_v57  ;;  %v1865_v55 = vadd.f32 %v4201_v62, %v4189_v17  ;;  %v1867_v30 = vadd.f32 0.0001, %v1859_v39  ;;  %v1868_v10 = vadd.f32 0.0001, %v1860_v54 }
 0x2a9   : > { %5156 = vst [vmem:[#allocation94_spill] sm:$0xff] %v4283_v2  ;;  %v1875_v56 = vadd.f32 %v1803_v34, %v1795_v8  ;;  %v1869_v22 = vadd.f32 0.0001, %v1861_v45  ;;  %v1870_v38 = vadd.f32 0.0001, %v1862_v16  ;;  %v1876_v32 = vadd.f32 %v1804_v44, %v1796_v18 }
 0x2aa   : > { %v1871_v3 = vadd.f32 0.0001, %v1863_v33  ;;  %v1872_v12 = vadd.f32 0.0001, %v1864_v42  ;;  %v1877_v1 = vadd.f32 %v1805_v35, %v1797_v28  ;;  %v1878_v48 = vadd.f32 %v1806_v25, %v1798_v43 }
 0x2ab   : > { %v1879_v49 = vadd.f32 %v1807_v60, %v1799_v4  ;;  %v1880_v41 = vadd.f32 %v1808_v14, %v1800_v24  ;;  %v1881_v21 = vadd.f32 %v1809_v5, %v1801_v13  ;;  %v1882_v7 = vadd.f32 %v1810_v11, %v1802_v6 }
 0x2ac   : > { %v1883_v2 = vadd.f32 0.0009, %v1875_v56  ;;  %v1866_v57 = vadd.f32 %v4203_v26, %v4191_v52  ;;  %v1884_v40 = vadd.f32 0.0009, %v1876_v32  ;;  %v1885_v17 = vadd.f32 0.0009, %v1877_v1 }
 0x2ad   : > { %v1886_v62 = vadd.f32 0.0009, %v1878_v48  ;;  %v1887_v39 = vadd.f32 0.0009, %v1879_v49  ;;  %v1888_v8 = vadd.f32 0.0009, %v1880_v41  ;;  %v5157_v11 = vsub.f32 %v4163_v51, %v4211_v47 }
 0x2ae   : > { %v1889_v34 = vadd.f32 0.0009, %v1881_v21  ;;  %v1891_v54 = vmul.f32 %v1883_v2, %v1867_v30  ;;  %v1890_v45 = vadd.f32 0.0009, %v1882_v7  ;;  %v1892_v18 = vmul.f32 %v1884_v40, %v1868_v10 }
 0x2af   : > { %v1893_v44 = vmul.f32 %v1885_v17, %v1869_v22  ;;  %v1894_v28 = vmul.f32 %v1886_v62, %v1870_v38  ;;  %v1828_v43 = vadd.f32 0.0001, %v1820_v50  ;;  %v1873_v4 = vadd.f32 0.0001, %v1865_v55 }
 0x2b0   : > { %v1895_v24 = vmul.f32 %v1887_v39, %v1871_v3  ;;  %2175 = vrcp.f32 %v1891_v54  ;;  %v1829_v13 = vadd.f32 0.0001, %v1821_v31  ;;  %v1874_v6 = vadd.f32 0.0001, %v1866_v57 }
 0x2b1   : > { %v1896_v35 = vmul.f32 %v1888_v8, %v1872_v12  ;;  %2177 = vrcp.f32 %v1892_v18  ;;  %v1835_v52 = vmul.f32 2.0, %v1811_v20  ;;  %v1836_v26 = vmul.f32 2.0, %v1812_v37 }
 0x2b2   : > { %v1897_v25 = vmul.f32 %v1889_v34, %v1873_v4  ;;  %2179 = vrcp.f32 %v1893_v44  ;;  %v1830_v60 = vadd.f32 0.0001, %v1822_v27  ;;  %v1837_v14 = vmul.f32 2.0, %v1813_v59 }
 0x2b3   : > { %v1898_v5 = vmul.f32 %v1890_v45, %v1874_v6  ;;  %2181 = vrcp.f32 %v1894_v28  ;;  %v1838_v7 = vmul.f32 2.0, %v5157_v11  ;;  %v5158_v41 = vsub.f32 %v4166_v19, %v4213_v36 }
 0x2b4   : > { %v5159_v48 = vsub.f32 %v4169_v0, %v4215_v61  ;;  %2183 = vrcp.f32 %v1895_v24  ;;  %v1831_v20 = vadd.f32 0.0001, %v1823_v58  ;;  %v5160_v37 = vsub.f32 %v4172_v29, %v4217_v53 }
 0x2b5   : > { %v1839_v49 = vmul.f32 2.0, %v5158_v41  ;;  %v5161_v50 = vsub.f32 %v5155_v15, %v4219_v63  ;;  %2185 = vrcp.f32 %v1896_v35  ;;  %v1832_v47 = vadd.f32 0.0001, %v1824_v9 }
 0x2b6   : > { %v1840_v1 = vmul.f32 2.0, %v5159_v48  ;;  %v1841_v59 = vmul.f32 2.0, %v5160_v37  ;;  %v2176_v51 = vpop.eup %2175  ;;  %v1843_v16 = vadd.f32 0.0009, %v1835_v52  ;;  %v1844_v19 = vadd.f32 0.0009, %v1836_v26 }
 0x2b7   : > { %v1842_v31 = vmul.f32 2.0, %v5161_v50  ;;  %2187 = vrcp.f32 %v1897_v25  ;;  %v2178_v36 = vpop.eup %2177  ;;  %v1833_v27 = vadd.f32 0.0001, %v1825_v23  ;;  %v1845_v0 = vadd.f32 0.0009, %v1837_v14  ;;  %v5162_v14 = vld [vmem:[#allocation94_spill] sm:$0xff] }
 0x2b8   : > { %2189 = vrcp.f32 %v1898_v5  ;;  %v1907_v61 = vmul.f32 %v2176_v51, %v1891_v54  ;;  %v2180_v58 = vpop.eup %2179  ;;  %v1846_v33 = vadd.f32 0.0009, %v1838_v7  ;;  %v1847_v2 = vadd.f32 0.0009, %v1839_v49 }
 0x2b9   : > { %v1848_v29 = vadd.f32 0.0009, %v1840_v1  ;;  %v1908_v53 = vmul.f32 %v2178_v36, %v1892_v18  ;;  %v2182_v42 = vpop.eup %2181  ;;  %v1849_v55 = vadd.f32 0.0009, %v1841_v59  ;;  %v1850_v63 = vadd.f32 0.0009, %v1842_v31 }
 0x2ba   : > { %v1909_v15 = vmul.f32 %v2180_v58, %v1893_v44  ;;  %v1915_v30 = vsub.f32 2.0, %v1907_v61  ;;  %v2184_v10 = vpop.eup %2183  ;;  %v1851_v9 = vmul.f32 %v1843_v16, %v4285_v46  ;;  %v1852_v56 = vmul.f32 %v1844_v19, %v1828_v43 }
 0x2bb   : > { %v1910_v22 = vmul.f32 %v2182_v42, %v1894_v28  ;;  %v1916_v38 = vsub.f32 2.0, %v1908_v53  ;;  %v2186_v23 = vpop.eup %2185  ;;  %v1853_v3 = vmul.f32 %v1845_v0, %v1829_v13  ;;  %v1911_v32 = vmul.f32 %v2184_v10, %v1895_v24 }
 0x2bc   : > { %v1917_v12 = vsub.f32 2.0, %v1909_v15  ;;  %v1923_v21 = vmul.f32 %v2176_v51, %v1915_v30  ;;  %v1854_v40 = vmul.f32 %v1846_v33, %v1830_v60  ;;  %v1912_v17 = vmul.f32 %v2186_v23, %v1896_v35 }
 0x2bd   : > { %v2188_v57 = vpop.eup %2187  ;;  %v1918_v62 = vsub.f32 2.0, %v1910_v22  ;;  %v1924_v39 = vmul.f32 %v2178_v36, %v1916_v38  ;;  %v1919_v54 = vsub.f32 2.0, %v1911_v32  ;;  %v1855_v4 = vmul.f32 %v1847_v2, %v1831_v20 }
 0x2be   : > { %v2190_v8 = vpop.eup %2189  ;;  %v1913_v34 = vmul.f32 %v2188_v57, %v1897_v25  ;;  %v1925_v45 = vmul.f32 %v2180_v58, %v1917_v12  ;;  %v1931_v18 = vmul.f32 %v1923_v21, %v1851_v9  ;;  %v1920_v46 = vsub.f32 2.0, %v1912_v17 }
 0x2bf   : > { %v1914_v44 = vmul.f32 %v2190_v8, %v1898_v5  ;;  %v1926_v43 = vmul.f32 %v2182_v42, %v1918_v62  ;;  %v1932_v28 = vmul.f32 %v1924_v39, %v1852_v56  ;;  %v1927_v6 = vmul.f32 %v2184_v10, %v1919_v54 }
 0x2c0   : > { %v1933_v13 = vmul.f32 %v1925_v45, %v1853_v3  ;;  %v1939_v24 = vsel %vm320_vm0, %v1931_v18, 0.0  ;;  %v1921_v52 = vsub.f32 2.0, %v1913_v34  ;;  %v1928_v26 = vmul.f32 %v2186_v23, %v1920_v46 }
 0x2c1   : > { %v1934_v60 = vmul.f32 %v1926_v43, %v1854_v40  ;;  %v1940_v35 = vsel %vm320_vm0, %v1932_v28, 0.0  ;;  %v1834_v11 = vadd.f32 0.0001, %v5162_v14  ;;  %v1856_v25 = vmul.f32 %v1848_v29, %v1832_v47 }
 0x2c2   : > { %v1941_v7 = vadd.f32 %v1940_v35, %v1939_v24  ;;  %v1857_v41 = vmul.f32 %v1849_v55, %v1833_v27  ;;  %v1922_v49 = vsub.f32 2.0, %v1914_v44  ;;  %v1935_v5 = vmul.f32 %v1927_v6, %v1855_v4 }
 0x2c3   : > { %v1942_v48 = vsel %vm320_vm0, %v1933_v13, 0.0  ;;  %v1858_v20 = vmul.f32 %v1850_v63, %v1834_v11  ;;  %v1929_v37 = vmul.f32 %v2188_v57, %v1921_v52  ;;  %v1936_v59 = vmul.f32 %v1928_v26, %v1856_v25 }
 0x2c4   : > { %v1943_v1 = vadd.f32 %v1942_v48, %v1941_v7  ;;  %v1944_v50 = vsel %vm320_vm0, %v1934_v60, 0.0  ;;  %v1930_v51 = vmul.f32 %v2190_v8, %v1922_v49  ;;  %v1946_v19 = vsel %vm320_vm0, %v1935_v5, 0.0 }
 0x2c5   : > { %v1937_v16 = vmul.f32 %v1929_v37, %v1857_v41  ;;  %v1948_v47 = vsel %vm320_vm0, %v1936_v59, 0.0 }
 0x2c6   : > { %v1945_v31 = vadd.f32 %v1944_v50, %v1943_v1  ;;  %v1938_v0 = vmul.f32 %v1930_v51, %v1858_v20 }
 0x2c7   : > { %v1950_v61 = vsel %vm320_vm0, %v1937_v16, 0.0 }
 0x2c8   : > { %v1947_v36 = vadd.f32 %v1946_v19, %v1945_v31  ;;  %v1952_v33 = vsel %vm320_vm0, %v1938_v0, 0.0 }
 0x2ca   : > { %v1949_v27 = vadd.f32 %v1948_v47, %v1947_v36 }
 0x2cc   : > { %v1951_v58 = vadd.f32 %v1950_v61, %v1949_v27 }
 0x2ce   : > { %v1953_v2 = vadd.f32 %v1952_v33, %v1951_v58 }
 0x2d0   : > { %1954 = vadd.xlane.f32.xlu0 %v1953_v2 }
 0x343   : > { %v1955_v29 = vpop.xlane.xlu0 %1954 }
 0x344   : > { %v1956_v53 = vrot.slane %v1955_v29, 4 }
 0x346   : > { %v1957_v42 = vadd.f32 %v1956_v53, %v1955_v29 }
 0x348   : > { %v1958_v55 = vrot.slane %v1957_v42, 2 }
 0x34a   : > { %v1959_v63 = vadd.f32 %v1958_v55, %v1957_v42 }
 0x34c   : > { %v1960_v15 = vrot.slane %v1959_v63, 1 }
 0x34e   : > { %v1961_v30 = vadd.f32 %v1960_v15, %v1959_v63 }
 0x350   : > { %2113 = vpush %v1961_v30 }
 0x381   : > { %s2114_s5 = spop %2113 }
 0x382   : > { %v1963_v10 = vstv %s2114_s5 }
 0x383   : > { %1964 = vst [vmem:[%s250_s4] sm:$0xff] %v1963_v10 }
 0x384 PF: > { %p14_p7 = scmp.ge.s32.totalorder %s2408_s16, 4   ;;  %s5163_s12 = smov %s2351_s13 }
 0x385   : > { %s5164_s13 = smov %s2355_s14  ;;  %s5165_s14 = smov %s2418_s19 }
 0x386   : > { %s5166_s15 = smov %s2408_s16  ;;  %16 = sbr.rel (!%p14_p7) target bundleno = 4 (0x4), region = 88 }
 0x38b   :  { %1984 = vsyncpa [#allocation4], 1 }
 0x38c   :  { %1986 = vsyncpa [#allocation4 + $0x1], 1 }
 0x38d   :  { %1987 = vsyncpa [#allocation6], 1 }
 0x38e   :  { %1989 = vsyncpa [#allocation6 + $0x1], 1 }

</bundles_post_ra>
